<compile_context>
chip_gen: v6e
topology: v6e:2x2x1
jax: 0.10.0
libtpu: 0.0.40
codegen_flags: <defaults>
</compile_context>

<pallas_src>
import functools

import jax
import jax.numpy as jnp
from jax.experimental import pallas as pl
from jax.experimental.pallas import tpu as pltpu


# ----------------------------------------------------------------------------- helpers
def _layernorm(x, g, b, eps=1e-5):
    mu = jnp.mean(x, axis=-1, keepdims=True)
    var = jnp.mean((x - mu) ** 2, axis=-1, keepdims=True)
    return (x - mu) * jax.lax.rsqrt(var + eps) * g + b


# ----------------------------------------------------------------------------- fused kernel
def _ensemble_kernel(layers, w_ref, x_ref, wemb_ref, bemb_ref, wvo_ref,
                     wf1_ref, wf2_ref, vecs_ref, wfc_ref, bfc_ref, out_ref):
    # layers: static tuple of per-member depths, e.g. (2, 4, 8). Everything below is
    # fully unrolled at trace time — no grid, no in-kernel dynamic control flow.
    x = x_ref[...]
    out = jnp.zeros(out_ref.shape, jnp.float32)

    for m, num_layers in enumerate(layers):
        # Embedding: (B, D) @ (D, H)
        h = jnp.dot(x, wemb_ref[m], preferred_element_type=jnp.float32) + bemb_ref[m]

        for l in range(num_layers):
            vec = vecs_ref[m, l]                       # (8, H) packed per-layer vectors
            bvo, ln1g, ln1b = vec[0:1], vec[1:2], vec[2:3]
            bf1, bf2 = vec[3:4], vec[4:5]
            ln2g, ln2b = vec[5:6], vec[6:7]

            # Self-attention (seq_len == 1 => softmax == 1), with wv@wo pre-folded.
            attn = jnp.dot(h, wvo_ref[m, l], preferred_element_type=jnp.float32) + bvo
            h = _layernorm(h + attn, ln1g, ln1b)

            # Feed-forward (ReLU), post-LN residual. Dropout = identity (eval mode).
            ff = jnp.maximum(
                jnp.dot(h, wf1_ref[m, l], preferred_element_type=jnp.float32) + bf1, 0.0)
            ff = jnp.dot(ff, wf2_ref[m, l], preferred_element_type=jnp.float32) + bf2
            h = _layernorm(h + ff, ln2g, ln2b)

        # Output head (lane-padded to 128) + weighted vote, accumulated in-register.
        out = out + w_ref[m] * (
            jnp.dot(h, wfc_ref[m], preferred_element_type=jnp.float32) + bfc_ref[m])

    out_ref[...] = out                                 # single lane-dense store


@functools.partial(jax.jit, static_argnames=("layers", "output_dim"))
def ensemble_forward(x, packed, voting_weights, layers, output_dim):
    B = x.shape[0]
    opad = packed["wfc"].shape[-1]
    out_padded = pl.pallas_call(
        functools.partial(_ensemble_kernel, layers),
        out_shape=jax.ShapeDtypeStruct((B, opad), jnp.float32),
        in_specs=[pl.BlockSpec(memory_space=pltpu.MemorySpace.SMEM)]      # voting weights
        + [pl.BlockSpec(memory_space=pltpu.MemorySpace.VMEM)] * 9,        # x + all weights
        out_specs=pl.BlockSpec(memory_space=pltpu.MemorySpace.VMEM),
    )(voting_weights, x,
      packed["wemb"], packed["bemb"], packed["wvo"],
      packed["wf1"], packed["wf2"], packed["vecs"],
      packed["wfc"], packed["bfc"])
    return out_padded[:, :output_dim]


# ----------------------------------------------------------------------------- param init / packing
def init_transformer_params(key, input_dim, hidden_dim, output_dim, num_layers):
    ff_dim = hidden_dim  # TODO(synk): assumes dim_feedforward == hidden_dim (class not given).
    ks = jax.random.split(key, 6)

    def lin(k, fan_in, shape):
        return jax.random.normal(k, shape, jnp.float32) / jnp.sqrt(float(fan_in))

    L, H, F, O = num_layers, hidden_dim, ff_dim, output_dim
    return dict(
        wemb=lin(ks[0], input_dim, (input_dim, H)),
        bemb=jnp.zeros((1, H), jnp.float32),
        wv=lin(ks[1], H, (L, H, H)),
        bv=jnp.zeros((L, 1, H), jnp.float32),
        wo=lin(ks[2], H, (L, H, H)),
        bo=jnp.zeros((L, 1, H), jnp.float32),
        ln1g=jnp.ones((L, 1, H), jnp.float32),
        ln1b=jnp.zeros((L, 1, H), jnp.float32),
        wf1=lin(ks[3], H, (L, H, F)),
        bf1=jnp.zeros((L, 1, F), jnp.float32),
        wf2=lin(ks[4], F, (L, F, H)),
        bf2=jnp.zeros((L, 1, H), jnp.float32),
        ln2g=jnp.ones((L, 1, H), jnp.float32),
        ln2b=jnp.zeros((L, 1, H), jnp.float32),
        wfc=lin(ks[5], H, (H, O)),
        bfc=jnp.zeros((1, O), jnp.float32),
    )


def pack_ensemble_params(params_list, output_dim, opad=128):
    """Fold wv@wo, pack per-layer vectors, pad L to max depth & O to 128 lanes, stack members."""
    lmax = max(p["wv"].shape[0] for p in params_list)

    def pad_L(a):
        return jnp.pad(a, [(0, lmax - a.shape[0])] + [(0, 0)] * (a.ndim - 1))

    wemb, bemb, wvo, wf1, wf2, vecs, wfc, bfc = [], [], [], [], [], [], [], []
    for p in params_list:
        L, H, F = p["wf1"].shape
        assert F == H, "packed vector layout assumes dim_feedforward == hidden_dim"
        wvo_m = jnp.einsum("lij,ljk->lik", p["wv"], p["wo"])
        bvo_m = jnp.einsum("lij,ljk->lik", p["bv"], p["wo"]) + p["bo"]
        vecs_m = jnp.concatenate(
            [bvo_m, p["ln1g"], p["ln1b"], p["bf1"], p["bf2"],
             p["ln2g"], p["ln2b"], jnp.zeros((L, 1, H), jnp.float32)], axis=1)  # (L, 8, H)

        wemb.append(p["wemb"])
        bemb.append(p["bemb"])
        wvo.append(pad_L(wvo_m))
        wf1.append(pad_L(p["wf1"]))
        wf2.append(pad_L(p["wf2"]))
        vecs.append(pad_L(vecs_m))
        wfc.append(jnp.pad(p["wfc"], ((0, 0), (0, opad - output_dim))))
        bfc.append(jnp.pad(p["bfc"], ((0, 0), (0, opad - output_dim))))

    stack = lambda xs: jnp.stack(xs, axis=0)
    return dict(wemb=stack(wemb), bemb=stack(bemb), wvo=stack(wvo),
                wf1=stack(wf1), wf2=stack(wf2), vecs=stack(vecs),
                wfc=stack(wfc), bfc=stack(bfc))


# ----------------------------------------------------------------------------- pure-JAX reference
def transformer_ref(x, p):
    h = x @ p["wemb"] + p["bemb"]
    L = p["wv"].shape[0]
    for l in range(L):
        v = h @ p["wv"][l] + p["bv"][l]
        attn = v @ p["wo"][l] + p["bo"][l]
        h = _layernorm(h + attn, p["ln1g"][l], p["ln1b"][l])
        ff = jnp.maximum(h @ p["wf1"][l] + p["bf1"][l], 0.0) @ p["wf2"][l] + p["bf2"][l]
        h = _layernorm(h + ff, p["ln2g"][l], p["ln2b"][l])
    return h @ p["wfc"] + p["bfc"]


# ----------------------------------------------------------------------------- main
if __name__ == "__main__":
    BATCH, INPUT_DIM, HIDDEN_DIM, OUTPUT_DIM = 2, 16, 32, 4
    LAYERS = (2, 4, 8)   # t1 / t2 / t3 (num_heads 2/4/8 have no numerical effect at seq_len=1)

    root = jax.random.PRNGKey(0)
    kx, k1, k2, k3 = jax.random.split(root, 4)
    x = jax.random.normal(kx, (BATCH, INPUT_DIM), jnp.float32)

    params_list = [
        init_transformer_params(k, INPUT_DIM, HIDDEN_DIM, OUTPUT_DIM, L)
        for k, L in zip((k1, k2, k3), LAYERS)
    ]
    voting_weights = jnp.ones((3,), jnp.float32) / 3.0

    packed = pack_ensemble_params(params_list, OUTPUT_DIM)
    out = ensemble_forward(x, packed, voting_weights, LAYERS, OUTPUT_DIM)
    out = jax.block_until_ready(out)

    # Cross-check against a pure-JAX reference of the same math (unfolded weights).
    ref = sum(w * transformer_ref(x, p) for w, p in zip(voting_weights, params_list))
    assert out.shape == (BATCH, OUTPUT_DIM)
    assert jnp.allclose(out, ref, atol=1e-4, rtol=1e-4)

    print("KERNEL_OK")
</pallas_src>

<mosaic_0001>
module attributes {stable_mosaic.version = 11 : i64} {
  func.func @_ensemble_kernel(%arg0: memref<3xf32, #tpu.memory_space<smem>>, %arg1: memref<2x16xf32, #tpu.memory_space<vmem>>, %arg2: memref<3x16x32xf32, #tpu.memory_space<vmem>>, %arg3: memref<3x1x32xf32, #tpu.memory_space<vmem>>, %arg4: memref<3x8x32x32xf32, #tpu.memory_space<vmem>>, %arg5: memref<3x8x32x32xf32, #tpu.memory_space<vmem>>, %arg6: memref<3x8x32x32xf32, #tpu.memory_space<vmem>>, %arg7: memref<3x8x8x32xf32, #tpu.memory_space<vmem>>, %arg8: memref<3x32x128xf32, #tpu.memory_space<vmem>>, %arg9: memref<3x1x128xf32, #tpu.memory_space<vmem>>, %arg10: memref<2x128xf32, #tpu.memory_space<vmem>>) attributes {dimension_semantics = [], scalar_prefetch = 0 : i64, scratch_operands = 0 : i64, tpu.core_type = #tpu.core_type<tc>} {
    %c0 = arith.constant 0 : index
    %c0_0 = arith.constant 0 : index
    %0 = vector.load %arg1[%c0, %c0_0] : memref<2x16xf32, #tpu.memory_space<vmem>>, vector<2x16xf32>
    %cst = arith.constant 0.000000e+00 : f32
    %1 = vector.broadcast %cst : f32 to vector<2x128xf32>
    %c0_1 = arith.constant 0 : index
    %c0_2 = arith.constant 0 : index
    %c0_3 = arith.constant 0 : index
    %2 = vector.load %arg2[%c0_1, %c0_2, %c0_3] : memref<3x16x32xf32, #tpu.memory_space<vmem>>, vector<1x16x32xf32>
    %3 = vector.shape_cast %2 : vector<1x16x32xf32> to vector<16x32xf32>
    %cst_4 = arith.constant dense<0.000000e+00> : vector<2x32xf32>
    %4 = tpu.matmul %0, %3, %cst_4 {dimension_numbers = #tpu.dot_dimension_numbers<[1], [0], [0], [1], [0, 0, 1, 1], [], []>} : vector<2x16xf32>, vector<16x32xf32>, vector<2x32xf32> -> vector<2x32xf32>
    %c0_5 = arith.constant 0 : index
    %c0_6 = arith.constant 0 : index
    %c0_7 = arith.constant 0 : index
    %5 = vector.load %arg3[%c0_5, %c0_6, %c0_7] : memref<3x1x32xf32, #tpu.memory_space<vmem>>, vector<1x1x32xf32>
    %6 = vector.shape_cast %5 : vector<1x1x32xf32> to vector<1x32xf32>
    %7 = vector.broadcast %6 : vector<1x32xf32> to vector<2x32xf32>
    %8 = arith.addf %4, %7 : vector<2x32xf32>
    %c0_8 = arith.constant 0 : index
    %c0_9 = arith.constant 0 : index
    %c0_10 = arith.constant 0 : index
    %c0_11 = arith.constant 0 : index
    %9 = vector.load %arg7[%c0_8, %c0_9, %c0_10, %c0_11] : memref<3x8x8x32xf32, #tpu.memory_space<vmem>>, vector<1x1x8x32xf32>
    %10 = vector.shape_cast %9 : vector<1x1x8x32xf32> to vector<8x32xf32>
    %11 = vector.extract_strided_slice %10 {offsets = [0, 0], sizes = [1, 32], strides = [1, 1]} : vector<8x32xf32> to vector<1x32xf32>
    %12 = vector.extract_strided_slice %10 {offsets = [1, 0], sizes = [1, 32], strides = [1, 1]} : vector<8x32xf32> to vector<1x32xf32>
    %13 = vector.extract_strided_slice %10 {offsets = [2, 0], sizes = [1, 32], strides = [1, 1]} : vector<8x32xf32> to vector<1x32xf32>
    %14 = vector.extract_strided_slice %10 {offsets = [3, 0], sizes = [1, 32], strides = [1, 1]} : vector<8x32xf32> to vector<1x32xf32>
    %15 = vector.extract_strided_slice %10 {offsets = [4, 0], sizes = [1, 32], strides = [1, 1]} : vector<8x32xf32> to vector<1x32xf32>
    %16 = vector.extract_strided_slice %10 {offsets = [5, 0], sizes = [1, 32], strides = [1, 1]} : vector<8x32xf32> to vector<1x32xf32>
    %17 = vector.extract_strided_slice %10 {offsets = [6, 0], sizes = [1, 32], strides = [1, 1]} : vector<8x32xf32> to vector<1x32xf32>
    %c0_12 = arith.constant 0 : index
    %c0_13 = arith.constant 0 : index
    %c0_14 = arith.constant 0 : index
    %c0_15 = arith.constant 0 : index
    %18 = vector.load %arg4[%c0_12, %c0_13, %c0_14, %c0_15] : memref<3x8x32x32xf32, #tpu.memory_space<vmem>>, vector<1x1x32x32xf32>
    %19 = vector.shape_cast %18 : vector<1x1x32x32xf32> to vector<32x32xf32>
    %cst_16 = arith.constant dense<0.000000e+00> : vector<2x32xf32>
    %20 = tpu.matmul %8, %19, %cst_16 {dimension_numbers = #tpu.dot_dimension_numbers<[1], [0], [0], [1], [0, 0, 1, 1], [], []>} : vector<2x32xf32>, vector<32x32xf32>, vector<2x32xf32> -> vector<2x32xf32>
    %21 = vector.broadcast %11 : vector<1x32xf32> to vector<2x32xf32>
    %22 = arith.addf %20, %21 : vector<2x32xf32>
    %23 = arith.addf %8, %22 : vector<2x32xf32>
    %cst_17 = arith.constant dense<0.000000e+00> : vector<2xf32>
    %24 = vector.multi_reduction <add>, %23, %cst_17 [1] : vector<2x32xf32> to vector<2xf32>
    %25 = vector.shape_cast %24 : vector<2xf32> to vector<2x1xf32>
    %cst_18 = arith.constant 3.200000e+01 : f32
    %26 = vector.broadcast %cst_18 : f32 to vector<2x1xf32>
    %27 = arith.divf %25, %26 : vector<2x1xf32>
    %28 = vector.broadcast %27 : vector<2x1xf32> to vector<2x32xf32>
    %29 = arith.subf %23, %28 : vector<2x32xf32>
    %30 = arith.mulf %29, %29 : vector<2x32xf32>
    %cst_19 = arith.constant dense<0.000000e+00> : vector<2xf32>
    %31 = vector.multi_reduction <add>, %30, %cst_19 [1] : vector<2x32xf32> to vector<2xf32>
    %32 = vector.shape_cast %31 : vector<2xf32> to vector<2x1xf32>
    %cst_20 = arith.constant 3.200000e+01 : f32
    %33 = vector.broadcast %cst_20 : f32 to vector<2x1xf32>
    %34 = arith.divf %32, %33 : vector<2x1xf32>
    %35 = vector.broadcast %27 : vector<2x1xf32> to vector<2x32xf32>
    %36 = arith.subf %23, %35 : vector<2x32xf32>
    %cst_21 = arith.constant 9.99999974E-6 : f32
    %37 = vector.broadcast %cst_21 : f32 to vector<2x1xf32>
    %38 = arith.addf %34, %37 : vector<2x1xf32>
    %39 = math.rsqrt %38 : vector<2x1xf32>
    %40 = vector.broadcast %39 : vector<2x1xf32> to vector<2x32xf32>
    %41 = arith.mulf %36, %40 : vector<2x32xf32>
    %42 = vector.broadcast %12 : vector<1x32xf32> to vector<2x32xf32>
    %43 = arith.mulf %41, %42 : vector<2x32xf32>
    %44 = vector.broadcast %13 : vector<1x32xf32> to vector<2x32xf32>
    %45 = arith.addf %43, %44 : vector<2x32xf32>
    %c0_22 = arith.constant 0 : index
    %c0_23 = arith.constant 0 : index
    %c0_24 = arith.constant 0 : index
    %c0_25 = arith.constant 0 : index
    %46 = vector.load %arg5[%c0_22, %c0_23, %c0_24, %c0_25] : memref<3x8x32x32xf32, #tpu.memory_space<vmem>>, vector<1x1x32x32xf32>
    %47 = vector.shape_cast %46 : vector<1x1x32x32xf32> to vector<32x32xf32>
    %cst_26 = arith.constant dense<0.000000e+00> : vector<2x32xf32>
    %48 = tpu.matmul %45, %47, %cst_26 {dimension_numbers = #tpu.dot_dimension_numbers<[1], [0], [0], [1], [0, 0, 1, 1], [], []>} : vector<2x32xf32>, vector<32x32xf32>, vector<2x32xf32> -> vector<2x32xf32>
    %49 = vector.broadcast %14 : vector<1x32xf32> to vector<2x32xf32>
    %50 = arith.addf %48, %49 : vector<2x32xf32>
    %cst_27 = arith.constant 0.000000e+00 : f32
    %51 = vector.broadcast %cst_27 : f32 to vector<2x32xf32>
    %52 = arith.maximumf %50, %51 : vector<2x32xf32>
    %c0_28 = arith.constant 0 : index
    %c0_29 = arith.constant 0 : index
    %c0_30 = arith.constant 0 : index
    %c0_31 = arith.constant 0 : index
    %53 = vector.load %arg6[%c0_28, %c0_29, %c0_30, %c0_31] : memref<3x8x32x32xf32, #tpu.memory_space<vmem>>, vector<1x1x32x32xf32>
    %54 = vector.shape_cast %53 : vector<1x1x32x32xf32> to vector<32x32xf32>
    %cst_32 = arith.constant dense<0.000000e+00> : vector<2x32xf32>
    %55 = tpu.matmul %52, %54, %cst_32 {dimension_numbers = #tpu.dot_dimension_numbers<[1], [0], [0], [1], [0, 0, 1, 1], [], []>} : vector<2x32xf32>, vector<32x32xf32>, vector<2x32xf32> -> vector<2x32xf32>
    %56 = vector.broadcast %15 : vector<1x32xf32> to vector<2x32xf32>
    %57 = arith.addf %55, %56 : vector<2x32xf32>
    %58 = arith.addf %45, %57 : vector<2x32xf32>
    %cst_33 = arith.constant dense<0.000000e+00> : vector<2xf32>
    %59 = vector.multi_reduction <add>, %58, %cst_33 [1] : vector<2x32xf32> to vector<2xf32>
    %60 = vector.shape_cast %59 : vector<2xf32> to vector<2x1xf32>
    %cst_34 = arith.constant 3.200000e+01 : f32
    %61 = vector.broadcast %cst_34 : f32 to vector<2x1xf32>
    %62 = arith.divf %60, %61 : vector<2x1xf32>
    %63 = vector.broadcast %62 : vector<2x1xf32> to vector<2x32xf32>
    %64 = arith.subf %58, %63 : vector<2x32xf32>
    %65 = arith.mulf %64, %64 : vector<2x32xf32>
    %cst_35 = arith.constant dense<0.000000e+00> : vector<2xf32>
    %66 = vector.multi_reduction <add>, %65, %cst_35 [1] : vector<2x32xf32> to vector<2xf32>
    %67 = vector.shape_cast %66 : vector<2xf32> to vector<2x1xf32>
    %cst_36 = arith.constant 3.200000e+01 : f32
    %68 = vector.broadcast %cst_36 : f32 to vector<2x1xf32>
    %69 = arith.divf %67, %68 : vector<2x1xf32>
    %70 = vector.broadcast %62 : vector<2x1xf32> to vector<2x32xf32>
    %71 = arith.subf %58, %70 : vector<2x32xf32>
    %cst_37 = arith.constant 9.99999974E-6 : f32
    %72 = vector.broadcast %cst_37 : f32 to vector<2x1xf32>
    %73 = arith.addf %69, %72 : vector<2x1xf32>
    %74 = math.rsqrt %73 : vector<2x1xf32>
    %75 = vector.broadcast %74 : vector<2x1xf32> to vector<2x32xf32>
    %76 = arith.mulf %71, %75 : vector<2x32xf32>
    %77 = vector.broadcast %16 : vector<1x32xf32> to vector<2x32xf32>
    %78 = arith.mulf %76, %77 : vector<2x32xf32>
    %79 = vector.broadcast %17 : vector<1x32xf32> to vector<2x32xf32>
    %80 = arith.addf %78, %79 : vector<2x32xf32>
    %c0_38 = arith.constant 0 : index
    %c1 = arith.constant 1 : index
    %c0_39 = arith.constant 0 : index
    %c0_40 = arith.constant 0 : index
    %81 = vector.load %arg7[%c0_38, %c1, %c0_39, %c0_40] : memref<3x8x8x32xf32, #tpu.memory_space<vmem>>, vector<1x1x8x32xf32>
    %82 = vector.shape_cast %81 : vector<1x1x8x32xf32> to vector<8x32xf32>
    %83 = vector.extract_strided_slice %82 {offsets = [0, 0], sizes = [1, 32], strides = [1, 1]} : vector<8x32xf32> to vector<1x32xf32>
    %84 = vector.extract_strided_slice %82 {offsets = [1, 0], sizes = [1, 32], strides = [1, 1]} : vector<8x32xf32> to vector<1x32xf32>
    %85 = vector.extract_strided_slice %82 {offsets = [2, 0], sizes = [1, 32], strides = [1, 1]} : vector<8x32xf32> to vector<1x32xf32>
    %86 = vector.extract_strided_slice %82 {offsets = [3, 0], sizes = [1, 32], strides = [1, 1]} : vector<8x32xf32> to vector<1x32xf32>
    %87 = vector.extract_strided_slice %82 {offsets = [4, 0], sizes = [1, 32], strides = [1, 1]} : vector<8x32xf32> to vector<1x32xf32>
    %88 = vector.extract_strided_slice %82 {offsets = [5, 0], sizes = [1, 32], strides = [1, 1]} : vector<8x32xf32> to vector<1x32xf32>
    %89 = vector.extract_strided_slice %82 {offsets = [6, 0], sizes = [1, 32], strides = [1, 1]} : vector<8x32xf32> to vector<1x32xf32>
    %c0_41 = arith.constant 0 : index
    %c1_42 = arith.constant 1 : index
    %c0_43 = arith.constant 0 : index
    %c0_44 = arith.constant 0 : index
    %90 = vector.load %arg4[%c0_41, %c1_42, %c0_43, %c0_44] : memref<3x8x32x32xf32, #tpu.memory_space<vmem>>, vector<1x1x32x32xf32>
    %91 = vector.shape_cast %90 : vector<1x1x32x32xf32> to vector<32x32xf32>
    %cst_45 = arith.constant dense<0.000000e+00> : vector<2x32xf32>
    %92 = tpu.matmul %80, %91, %cst_45 {dimension_numbers = #tpu.dot_dimension_numbers<[1], [0], [0], [1], [0, 0, 1, 1], [], []>} : vector<2x32xf32>, vector<32x32xf32>, vector<2x32xf32> -> vector<2x32xf32>
    %93 = vector.broadcast %83 : vector<1x32xf32> to vector<2x32xf32>
    %94 = arith.addf %92, %93 : vector<2x32xf32>
    %95 = arith.addf %80, %94 : vector<2x32xf32>
    %cst_46 = arith.constant dense<0.000000e+00> : vector<2xf32>
    %96 = vector.multi_reduction <add>, %95, %cst_46 [1] : vector<2x32xf32> to vector<2xf32>
    %97 = vector.shape_cast %96 : vector<2xf32> to vector<2x1xf32>
    %cst_47 = arith.constant 3.200000e+01 : f32
    %98 = vector.broadcast %cst_47 : f32 to vector<2x1xf32>
    %99 = arith.divf %97, %98 : vector<2x1xf32>
    %100 = vector.broadcast %99 : vector<2x1xf32> to vector<2x32xf32>
    %101 = arith.subf %95, %100 : vector<2x32xf32>
    %102 = arith.mulf %101, %101 : vector<2x32xf32>
    %cst_48 = arith.constant dense<0.000000e+00> : vector<2xf32>
    %103 = vector.multi_reduction <add>, %102, %cst_48 [1] : vector<2x32xf32> to vector<2xf32>
    %104 = vector.shape_cast %103 : vector<2xf32> to vector<2x1xf32>
    %cst_49 = arith.constant 3.200000e+01 : f32
    %105 = vector.broadcast %cst_49 : f32 to vector<2x1xf32>
    %106 = arith.divf %104, %105 : vector<2x1xf32>
    %107 = vector.broadcast %99 : vector<2x1xf32> to vector<2x32xf32>
    %108 = arith.subf %95, %107 : vector<2x32xf32>
    %cst_50 = arith.constant 9.99999974E-6 : f32
    %109 = vector.broadcast %cst_50 : f32 to vector<2x1xf32>
    %110 = arith.addf %106, %109 : vector<2x1xf32>
    %111 = math.rsqrt %110 : vector<2x1xf32>
    %112 = vector.broadcast %111 : vector<2x1xf32> to vector<2x32xf32>
    %113 = arith.mulf %108, %112 : vector<2x32xf32>
    %114 = vector.broadcast %84 : vector<1x32xf32> to vector<2x32xf32>
    %115 = arith.mulf %113, %114 : vector<2x32xf32>
    %116 = vector.broadcast %85 : vector<1x32xf32> to vector<2x32xf32>
    %117 = arith.addf %115, %116 : vector<2x32xf32>
    %c0_51 = arith.constant 0 : index
    %c1_52 = arith.constant 1 : index
    %c0_53 = arith.constant 0 : index
    %c0_54 = arith.constant 0 : index
    %118 = vector.load %arg5[%c0_51, %c1_52, %c0_53, %c0_54] : memref<3x8x32x32xf32, #tpu.memory_space<vmem>>, vector<1x1x32x32xf32>
    %119 = vector.shape_cast %118 : vector<1x1x32x32xf32> to vector<32x32xf32>
    %cst_55 = arith.constant dense<0.000000e+00> : vector<2x32xf32>
    %120 = tpu.matmul %117, %119, %cst_55 {dimension_numbers = #tpu.dot_dimension_numbers<[1], [0], [0], [1], [0, 0, 1, 1], [], []>} : vector<2x32xf32>, vector<32x32xf32>, vector<2x32xf32> -> vector<2x32xf32>
    %121 = vector.broadcast %86 : vector<1x32xf32> to vector<2x32xf32>
    %122 = arith.addf %120, %121 : vector<2x32xf32>
    %cst_56 = arith.constant 0.000000e+00 : f32
    %123 = vector.broadcast %cst_56 : f32 to vector<2x32xf32>
    %124 = arith.maximumf %122, %123 : vector<2x32xf32>
    %c0_57 = arith.constant 0 : index
    %c1_58 = arith.constant 1 : index
    %c0_59 = arith.constant 0 : index
    %c0_60 = arith.constant 0 : index
    %125 = vector.load %arg6[%c0_57, %c1_58, %c0_59, %c0_60] : memref<3x8x32x32xf32, #tpu.memory_space<vmem>>, vector<1x1x32x32xf32>
    %126 = vector.shape_cast %125 : vector<1x1x32x32xf32> to vector<32x32xf32>
    %cst_61 = arith.constant dense<0.000000e+00> : vector<2x32xf32>
    %127 = tpu.matmul %124, %126, %cst_61 {dimension_numbers = #tpu.dot_dimension_numbers<[1], [0], [0], [1], [0, 0, 1, 1], [], []>} : vector<2x32xf32>, vector<32x32xf32>, vector<2x32xf32> -> vector<2x32xf32>
    %128 = vector.broadcast %87 : vector<1x32xf32> to vector<2x32xf32>
    %129 = arith.addf %127, %128 : vector<2x32xf32>
    %130 = arith.addf %117, %129 : vector<2x32xf32>
    %cst_62 = arith.constant dense<0.000000e+00> : vector<2xf32>
    %131 = vector.multi_reduction <add>, %130, %cst_62 [1] : vector<2x32xf32> to vector<2xf32>
    %132 = vector.shape_cast %131 : vector<2xf32> to vector<2x1xf32>
    %cst_63 = arith.constant 3.200000e+01 : f32
    %133 = vector.broadcast %cst_63 : f32 to vector<2x1xf32>
    %134 = arith.divf %132, %133 : vector<2x1xf32>
    %135 = vector.broadcast %134 : vector<2x1xf32> to vector<2x32xf32>
    %136 = arith.subf %130, %135 : vector<2x32xf32>
    %137 = arith.mulf %136, %136 : vector<2x32xf32>
    %cst_64 = arith.constant dense<0.000000e+00> : vector<2xf32>
    %138 = vector.multi_reduction <add>, %137, %cst_64 [1] : vector<2x32xf32> to vector<2xf32>
    %139 = vector.shape_cast %138 : vector<2xf32> to vector<2x1xf32>
    %cst_65 = arith.constant 3.200000e+01 : f32
    %140 = vector.broadcast %cst_65 : f32 to vector<2x1xf32>
    %141 = arith.divf %139, %140 : vector<2x1xf32>
    %142 = vector.broadcast %134 : vector<2x1xf32> to vector<2x32xf32>
    %143 = arith.subf %130, %142 : vector<2x32xf32>
    %cst_66 = arith.constant 9.99999974E-6 : f32
    %144 = vector.broadcast %cst_66 : f32 to vector<2x1xf32>
    %145 = arith.addf %141, %144 : vector<2x1xf32>
    %146 = math.rsqrt %145 : vector<2x1xf32>
    %147 = vector.broadcast %146 : vector<2x1xf32> to vector<2x32xf32>
    %148 = arith.mulf %143, %147 : vector<2x32xf32>
    %149 = vector.broadcast %88 : vector<1x32xf32> to vector<2x32xf32>
    %150 = arith.mulf %148, %149 : vector<2x32xf32>
    %151 = vector.broadcast %89 : vector<1x32xf32> to vector<2x32xf32>
    %152 = arith.addf %150, %151 : vector<2x32xf32>
    %c0_67 = arith.constant 0 : index
    %153 = memref.load %arg0[%c0_67] : memref<3xf32, #tpu.memory_space<smem>>
    %c0_68 = arith.constant 0 : index
    %c0_69 = arith.constant 0 : index
    %c0_70 = arith.constant 0 : index
    %154 = vector.load %arg8[%c0_68, %c0_69, %c0_70] : memref<3x32x128xf32, #tpu.memory_space<vmem>>, vector<1x32x128xf32>
    %155 = vector.shape_cast %154 : vector<1x32x128xf32> to vector<32x128xf32>
    %cst_71 = arith.constant dense<0.000000e+00> : vector<2x128xf32>
    %156 = tpu.matmul %152, %155, %cst_71 {dimension_numbers = #tpu.dot_dimension_numbers<[1], [0], [0], [1], [0, 0, 1, 1], [], []>} : vector<2x32xf32>, vector<32x128xf32>, vector<2x128xf32> -> vector<2x128xf32>
    %c0_72 = arith.constant 0 : index
    %c0_73 = arith.constant 0 : index
    %c0_74 = arith.constant 0 : index
    %157 = vector.load %arg9[%c0_72, %c0_73, %c0_74] : memref<3x1x128xf32, #tpu.memory_space<vmem>>, vector<1x1x128xf32>
    %158 = vector.shape_cast %157 : vector<1x1x128xf32> to vector<1x128xf32>
    %159 = vector.broadcast %158 : vector<1x128xf32> to vector<2x128xf32>
    %160 = arith.addf %156, %159 : vector<2x128xf32>
    %161 = vector.broadcast %153 : f32 to vector<2x128xf32>
    %162 = arith.mulf %161, %160 : vector<2x128xf32>
    %163 = arith.addf %1, %162 : vector<2x128xf32>
    %c1_75 = arith.constant 1 : index
    %c0_76 = arith.constant 0 : index
    %c0_77 = arith.constant 0 : index
    %164 = vector.load %arg2[%c1_75, %c0_76, %c0_77] : memref<3x16x32xf32, #tpu.memory_space<vmem>>, vector<1x16x32xf32>
    %165 = vector.shape_cast %164 : vector<1x16x32xf32> to vector<16x32xf32>
    %cst_78 = arith.constant dense<0.000000e+00> : vector<2x32xf32>
    %166 = tpu.matmul %0, %165, %cst_78 {dimension_numbers = #tpu.dot_dimension_numbers<[1], [0], [0], [1], [0, 0, 1, 1], [], []>} : vector<2x16xf32>, vector<16x32xf32>, vector<2x32xf32> -> vector<2x32xf32>
    %c1_79 = arith.constant 1 : index
    %c0_80 = arith.constant 0 : index
    %c0_81 = arith.constant 0 : index
    %167 = vector.load %arg3[%c1_79, %c0_80, %c0_81] : memref<3x1x32xf32, #tpu.memory_space<vmem>>, vector<1x1x32xf32>
    %168 = vector.shape_cast %167 : vector<1x1x32xf32> to vector<1x32xf32>
    %169 = vector.broadcast %168 : vector<1x32xf32> to vector<2x32xf32>
    %170 = arith.addf %166, %169 : vector<2x32xf32>
    %c1_82 = arith.constant 1 : index
    %c0_83 = arith.constant 0 : index
    %c0_84 = arith.constant 0 : index
    %c0_85 = arith.constant 0 : index
    %171 = vector.load %arg7[%c1_82, %c0_83, %c0_84, %c0_85] : memref<3x8x8x32xf32, #tpu.memory_space<vmem>>, vector<1x1x8x32xf32>
    %172 = vector.shape_cast %171 : vector<1x1x8x32xf32> to vector<8x32xf32>
    %173 = vector.extract_strided_slice %172 {offsets = [0, 0], sizes = [1, 32], strides = [1, 1]} : vector<8x32xf32> to vector<1x32xf32>
    %174 = vector.extract_strided_slice %172 {offsets = [1, 0], sizes = [1, 32], strides = [1, 1]} : vector<8x32xf32> to vector<1x32xf32>
    %175 = vector.extract_strided_slice %172 {offsets = [2, 0], sizes = [1, 32], strides = [1, 1]} : vector<8x32xf32> to vector<1x32xf32>
    %176 = vector.extract_strided_slice %172 {offsets = [3, 0], sizes = [1, 32], strides = [1, 1]} : vector<8x32xf32> to vector<1x32xf32>
    %177 = vector.extract_strided_slice %172 {offsets = [4, 0], sizes = [1, 32], strides = [1, 1]} : vector<8x32xf32> to vector<1x32xf32>
    %178 = vector.extract_strided_slice %172 {offsets = [5, 0], sizes = [1, 32], strides = [1, 1]} : vector<8x32xf32> to vector<1x32xf32>
    %179 = vector.extract_strided_slice %172 {offsets = [6, 0], sizes = [1, 32], strides = [1, 1]} : vector<8x32xf32> to vector<1x32xf32>
    %c1_86 = arith.constant 1 : index
    %c0_87 = arith.constant 0 : index
    %c0_88 = arith.constant 0 : index
    %c0_89 = arith.constant 0 : index
    %180 = vector.load %arg4[%c1_86, %c0_87, %c0_88, %c0_89] : memref<3x8x32x32xf32, #tpu.memory_space<vmem>>, vector<1x1x32x32xf32>
    %181 = vector.shape_cast %180 : vector<1x1x32x32xf32> to vector<32x32xf32>
    %cst_90 = arith.constant dense<0.000000e+00> : vector<2x32xf32>
    %182 = tpu.matmul %170, %181, %cst_90 {dimension_numbers = #tpu.dot_dimension_numbers<[1], [0], [0], [1], [0, 0, 1, 1], [], []>} : vector<2x32xf32>, vector<32x32xf32>, vector<2x32xf32> -> vector<2x32xf32>
    %183 = vector.broadcast %173 : vector<1x32xf32> to vector<2x32xf32>
    %184 = arith.addf %182, %183 : vector<2x32xf32>
    %185 = arith.addf %170, %184 : vector<2x32xf32>
    %cst_91 = arith.constant dense<0.000000e+00> : vector<2xf32>
    %186 = vector.multi_reduction <add>, %185, %cst_91 [1] : vector<2x32xf32> to vector<2xf32>
    %187 = vector.shape_cast %186 : vector<2xf32> to vector<2x1xf32>
    %cst_92 = arith.constant 3.200000e+01 : f32
    %188 = vector.broadcast %cst_92 : f32 to vector<2x1xf32>
    %189 = arith.divf %187, %188 : vector<2x1xf32>
    %190 = vector.broadcast %189 : vector<2x1xf32> to vector<2x32xf32>
    %191 = arith.subf %185, %190 : vector<2x32xf32>
    %192 = arith.mulf %191, %191 : vector<2x32xf32>
    %cst_93 = arith.constant dense<0.000000e+00> : vector<2xf32>
    %193 = vector.multi_reduction <add>, %192, %cst_93 [1] : vector<2x32xf32> to vector<2xf32>
    %194 = vector.shape_cast %193 : vector<2xf32> to vector<2x1xf32>
    %cst_94 = arith.constant 3.200000e+01 : f32
    %195 = vector.broadcast %cst_94 : f32 to vector<2x1xf32>
    %196 = arith.divf %194, %195 : vector<2x1xf32>
    %197 = vector.broadcast %189 : vector<2x1xf32> to vector<2x32xf32>
    %198 = arith.subf %185, %197 : vector<2x32xf32>
    %cst_95 = arith.constant 9.99999974E-6 : f32
    %199 = vector.broadcast %cst_95 : f32 to vector<2x1xf32>
    %200 = arith.addf %196, %199 : vector<2x1xf32>
    %201 = math.rsqrt %200 : vector<2x1xf32>
    %202 = vector.broadcast %201 : vector<2x1xf32> to vector<2x32xf32>
    %203 = arith.mulf %198, %202 : vector<2x32xf32>
    %204 = vector.broadcast %174 : vector<1x32xf32> to vector<2x32xf32>
    %205 = arith.mulf %203, %204 : vector<2x32xf32>
    %206 = vector.broadcast %175 : vector<1x32xf32> to vector<2x32xf32>
    %207 = arith.addf %205, %206 : vector<2x32xf32>
    %c1_96 = arith.constant 1 : index
    %c0_97 = arith.constant 0 : index
    %c0_98 = arith.constant 0 : index
    %c0_99 = arith.constant 0 : index
    %208 = vector.load %arg5[%c1_96, %c0_97, %c0_98, %c0_99] : memref<3x8x32x32xf32, #tpu.memory_space<vmem>>, vector<1x1x32x32xf32>
    %209 = vector.shape_cast %208 : vector<1x1x32x32xf32> to vector<32x32xf32>
    %cst_100 = arith.constant dense<0.000000e+00> : vector<2x32xf32>
    %210 = tpu.matmul %207, %209, %cst_100 {dimension_numbers = #tpu.dot_dimension_numbers<[1], [0], [0], [1], [0, 0, 1, 1], [], []>} : vector<2x32xf32>, vector<32x32xf32>, vector<2x32xf32> -> vector<2x32xf32>
    %211 = vector.broadcast %176 : vector<1x32xf32> to vector<2x32xf32>
    %212 = arith.addf %210, %211 : vector<2x32xf32>
    %cst_101 = arith.constant 0.000000e+00 : f32
    %213 = vector.broadcast %cst_101 : f32 to vector<2x32xf32>
    %214 = arith.maximumf %212, %213 : vector<2x32xf32>
    %c1_102 = arith.constant 1 : index
    %c0_103 = arith.constant 0 : index
    %c0_104 = arith.constant 0 : index
    %c0_105 = arith.constant 0 : index
    %215 = vector.load %arg6[%c1_102, %c0_103, %c0_104, %c0_105] : memref<3x8x32x32xf32, #tpu.memory_space<vmem>>, vector<1x1x32x32xf32>
    %216 = vector.shape_cast %215 : vector<1x1x32x32xf32> to vector<32x32xf32>
    %cst_106 = arith.constant dense<0.000000e+00> : vector<2x32xf32>
    %217 = tpu.matmul %214, %216, %cst_106 {dimension_numbers = #tpu.dot_dimension_numbers<[1], [0], [0], [1], [0, 0, 1, 1], [], []>} : vector<2x32xf32>, vector<32x32xf32>, vector<2x32xf32> -> vector<2x32xf32>
    %218 = vector.broadcast %177 : vector<1x32xf32> to vector<2x32xf32>
    %219 = arith.addf %217, %218 : vector<2x32xf32>
    %220 = arith.addf %207, %219 : vector<2x32xf32>
    %cst_107 = arith.constant dense<0.000000e+00> : vector<2xf32>
    %221 = vector.multi_reduction <add>, %220, %cst_107 [1] : vector<2x32xf32> to vector<2xf32>
    %222 = vector.shape_cast %221 : vector<2xf32> to vector<2x1xf32>
    %cst_108 = arith.constant 3.200000e+01 : f32
    %223 = vector.broadcast %cst_108 : f32 to vector<2x1xf32>
    %224 = arith.divf %222, %223 : vector<2x1xf32>
    %225 = vector.broadcast %224 : vector<2x1xf32> to vector<2x32xf32>
    %226 = arith.subf %220, %225 : vector<2x32xf32>
    %227 = arith.mulf %226, %226 : vector<2x32xf32>
    %cst_109 = arith.constant dense<0.000000e+00> : vector<2xf32>
    %228 = vector.multi_reduction <add>, %227, %cst_109 [1] : vector<2x32xf32> to vector<2xf32>
    %229 = vector.shape_cast %228 : vector<2xf32> to vector<2x1xf32>
    %cst_110 = arith.constant 3.200000e+01 : f32
    %230 = vector.broadcast %cst_110 : f32 to vector<2x1xf32>
    %231 = arith.divf %229, %230 : vector<2x1xf32>
    %232 = vector.broadcast %224 : vector<2x1xf32> to vector<2x32xf32>
    %233 = arith.subf %220, %232 : vector<2x32xf32>
    %cst_111 = arith.constant 9.99999974E-6 : f32
    %234 = vector.broadcast %cst_111 : f32 to vector<2x1xf32>
    %235 = arith.addf %231, %234 : vector<2x1xf32>
    %236 = math.rsqrt %235 : vector<2x1xf32>
    %237 = vector.broadcast %236 : vector<2x1xf32> to vector<2x32xf32>
    %238 = arith.mulf %233, %237 : vector<2x32xf32>
    %239 = vector.broadcast %178 : vector<1x32xf32> to vector<2x32xf32>
    %240 = arith.mulf %238, %239 : vector<2x32xf32>
    %241 = vector.broadcast %179 : vector<1x32xf32> to vector<2x32xf32>
    %242 = arith.addf %240, %241 : vector<2x32xf32>
    %c1_112 = arith.constant 1 : index
    %c1_113 = arith.constant 1 : index
    %c0_114 = arith.constant 0 : index
    %c0_115 = arith.constant 0 : index
    %243 = vector.load %arg7[%c1_112, %c1_113, %c0_114, %c0_115] : memref<3x8x8x32xf32, #tpu.memory_space<vmem>>, vector<1x1x8x32xf32>
    %244 = vector.shape_cast %243 : vector<1x1x8x32xf32> to vector<8x32xf32>
    %245 = vector.extract_strided_slice %244 {offsets = [0, 0], sizes = [1, 32], strides = [1, 1]} : vector<8x32xf32> to vector<1x32xf32>
    %246 = vector.extract_strided_slice %244 {offsets = [1, 0], sizes = [1, 32], strides = [1, 1]} : vector<8x32xf32> to vector<1x32xf32>
    %247 = vector.extract_strided_slice %244 {offsets = [2, 0], sizes = [1, 32], strides = [1, 1]} : vector<8x32xf32> to vector<1x32xf32>
    %248 = vector.extract_strided_slice %244 {offsets = [3, 0], sizes = [1, 32], strides = [1, 1]} : vector<8x32xf32> to vector<1x32xf32>
    %249 = vector.extract_strided_slice %244 {offsets = [4, 0], sizes = [1, 32], strides = [1, 1]} : vector<8x32xf32> to vector<1x32xf32>
    %250 = vector.extract_strided_slice %244 {offsets = [5, 0], sizes = [1, 32], strides = [1, 1]} : vector<8x32xf32> to vector<1x32xf32>
    %251 = vector.extract_strided_slice %244 {offsets = [6, 0], sizes = [1, 32], strides = [1, 1]} : vector<8x32xf32> to vector<1x32xf32>
    %c1_116 = arith.constant 1 : index
    %c1_117 = arith.constant 1 : index
    %c0_118 = arith.constant 0 : index
    %c0_119 = arith.constant 0 : index
    %252 = vector.load %arg4[%c1_116, %c1_117, %c0_118, %c0_119] : memref<3x8x32x32xf32, #tpu.memory_space<vmem>>, vector<1x1x32x32xf32>
    %253 = vector.shape_cast %252 : vector<1x1x32x32xf32> to vector<32x32xf32>
    %cst_120 = arith.constant dense<0.000000e+00> : vector<2x32xf32>
    %254 = tpu.matmul %242, %253, %cst_120 {dimension_numbers = #tpu.dot_dimension_numbers<[1], [0], [0], [1], [0, 0, 1, 1], [], []>} : vector<2x32xf32>, vector<32x32xf32>, vector<2x32xf32> -> vector<2x32xf32>
    %255 = vector.broadcast %245 : vector<1x32xf32> to vector<2x32xf32>
    %256 = arith.addf %254, %255 : vector<2x32xf32>
    %257 = arith.addf %242, %256 : vector<2x32xf32>
    %cst_121 = arith.constant dense<0.000000e+00> : vector<2xf32>
    %258 = vector.multi_reduction <add>, %257, %cst_121 [1] : vector<2x32xf32> to vector<2xf32>
    %259 = vector.shape_cast %258 : vector<2xf32> to vector<2x1xf32>
    %cst_122 = arith.constant 3.200000e+01 : f32
    %260 = vector.broadcast %cst_122 : f32 to vector<2x1xf32>
    %261 = arith.divf %259, %260 : vector<2x1xf32>
    %262 = vector.broadcast %261 : vector<2x1xf32> to vector<2x32xf32>
    %263 = arith.subf %257, %262 : vector<2x32xf32>
    %264 = arith.mulf %263, %263 : vector<2x32xf32>
    %cst_123 = arith.constant dense<0.000000e+00> : vector<2xf32>
    %265 = vector.multi_reduction <add>, %264, %cst_123 [1] : vector<2x32xf32> to vector<2xf32>
    %266 = vector.shape_cast %265 : vector<2xf32> to vector<2x1xf32>
    %cst_124 = arith.constant 3.200000e+01 : f32
    %267 = vector.broadcast %cst_124 : f32 to vector<2x1xf32>
    %268 = arith.divf %266, %267 : vector<2x1xf32>
    %269 = vector.broadcast %261 : vector<2x1xf32> to vector<2x32xf32>
    %270 = arith.subf %257, %269 : vector<2x32xf32>
    %cst_125 = arith.constant 9.99999974E-6 : f32
    %271 = vector.broadcast %cst_125 : f32 to vector<2x1xf32>
    %272 = arith.addf %268, %271 : vector<2x1xf32>
    %273 = math.rsqrt %272 : vector<2x1xf32>
    %274 = vector.broadcast %273 : vector<2x1xf32> to vector<2x32xf32>
    %275 = arith.mulf %270, %274 : vector<2x32xf32>
    %276 = vector.broadcast %246 : vector<1x32xf32> to vector<2x32xf32>
    %277 = arith.mulf %275, %276 : vector<2x32xf32>
    %278 = vector.broadcast %247 : vector<1x32xf32> to vector<2x32xf32>
    %279 = arith.addf %277, %278 : vector<2x32xf32>
    %c1_126 = arith.constant 1 : index
    %c1_127 = arith.constant 1 : index
    %c0_128 = arith.constant 0 : index
    %c0_129 = arith.constant 0 : index
    %280 = vector.load %arg5[%c1_126, %c1_127, %c0_128, %c0_129] : memref<3x8x32x32xf32, #tpu.memory_space<vmem>>, vector<1x1x32x32xf32>
    %281 = vector.shape_cast %280 : vector<1x1x32x32xf32> to vector<32x32xf32>
    %cst_130 = arith.constant dense<0.000000e+00> : vector<2x32xf32>
    %282 = tpu.matmul %279, %281, %cst_130 {dimension_numbers = #tpu.dot_dimension_numbers<[1], [0], [0], [1], [0, 0, 1, 1], [], []>} : vector<2x32xf32>, vector<32x32xf32>, vector<2x32xf32> -> vector<2x32xf32>
    %283 = vector.broadcast %248 : vector<1x32xf32> to vector<2x32xf32>
    %284 = arith.addf %282, %283 : vector<2x32xf32>
    %cst_131 = arith.constant 0.000000e+00 : f32
    %285 = vector.broadcast %cst_131 : f32 to vector<2x32xf32>
    %286 = arith.maximumf %284, %285 : vector<2x32xf32>
    %c1_132 = arith.constant 1 : index
    %c1_133 = arith.constant 1 : index
    %c0_134 = arith.constant 0 : index
    %c0_135 = arith.constant 0 : index
    %287 = vector.load %arg6[%c1_132, %c1_133, %c0_134, %c0_135] : memref<3x8x32x32xf32, #tpu.memory_space<vmem>>, vector<1x1x32x32xf32>
    %288 = vector.shape_cast %287 : vector<1x1x32x32xf32> to vector<32x32xf32>
    %cst_136 = arith.constant dense<0.000000e+00> : vector<2x32xf32>
    %289 = tpu.matmul %286, %288, %cst_136 {dimension_numbers = #tpu.dot_dimension_numbers<[1], [0], [0], [1], [0, 0, 1, 1], [], []>} : vector<2x32xf32>, vector<32x32xf32>, vector<2x32xf32> -> vector<2x32xf32>
    %290 = vector.broadcast %249 : vector<1x32xf32> to vector<2x32xf32>
    %291 = arith.addf %289, %290 : vector<2x32xf32>
    %292 = arith.addf %279, %291 : vector<2x32xf32>
    %cst_137 = arith.constant dense<0.000000e+00> : vector<2xf32>
    %293 = vector.multi_reduction <add>, %292, %cst_137 [1] : vector<2x32xf32> to vector<2xf32>
    %294 = vector.shape_cast %293 : vector<2xf32> to vector<2x1xf32>
    %cst_138 = arith.constant 3.200000e+01 : f32
    %295 = vector.broadcast %cst_138 : f32 to vector<2x1xf32>
    %296 = arith.divf %294, %295 : vector<2x1xf32>
    %297 = vector.broadcast %296 : vector<2x1xf32> to vector<2x32xf32>
    %298 = arith.subf %292, %297 : vector<2x32xf32>
    %299 = arith.mulf %298, %298 : vector<2x32xf32>
    %cst_139 = arith.constant dense<0.000000e+00> : vector<2xf32>
    %300 = vector.multi_reduction <add>, %299, %cst_139 [1] : vector<2x32xf32> to vector<2xf32>
    %301 = vector.shape_cast %300 : vector<2xf32> to vector<2x1xf32>
    %cst_140 = arith.constant 3.200000e+01 : f32
    %302 = vector.broadcast %cst_140 : f32 to vector<2x1xf32>
    %303 = arith.divf %301, %302 : vector<2x1xf32>
    %304 = vector.broadcast %296 : vector<2x1xf32> to vector<2x32xf32>
    %305 = arith.subf %292, %304 : vector<2x32xf32>
    %cst_141 = arith.constant 9.99999974E-6 : f32
    %306 = vector.broadcast %cst_141 : f32 to vector<2x1xf32>
    %307 = arith.addf %303, %306 : vector<2x1xf32>
    %308 = math.rsqrt %307 : vector<2x1xf32>
    %309 = vector.broadcast %308 : vector<2x1xf32> to vector<2x32xf32>
    %310 = arith.mulf %305, %309 : vector<2x32xf32>
    %311 = vector.broadcast %250 : vector<1x32xf32> to vector<2x32xf32>
    %312 = arith.mulf %310, %311 : vector<2x32xf32>
    %313 = vector.broadcast %251 : vector<1x32xf32> to vector<2x32xf32>
    %314 = arith.addf %312, %313 : vector<2x32xf32>
    %c1_142 = arith.constant 1 : index
    %c2 = arith.constant 2 : index
    %c0_143 = arith.constant 0 : index
    %c0_144 = arith.constant 0 : index
    %315 = vector.load %arg7[%c1_142, %c2, %c0_143, %c0_144] : memref<3x8x8x32xf32, #tpu.memory_space<vmem>>, vector<1x1x8x32xf32>
    %316 = vector.shape_cast %315 : vector<1x1x8x32xf32> to vector<8x32xf32>
    %317 = vector.extract_strided_slice %316 {offsets = [0, 0], sizes = [1, 32], strides = [1, 1]} : vector<8x32xf32> to vector<1x32xf32>
    %318 = vector.extract_strided_slice %316 {offsets = [1, 0], sizes = [1, 32], strides = [1, 1]} : vector<8x32xf32> to vector<1x32xf32>
    %319 = vector.extract_strided_slice %316 {offsets = [2, 0], sizes = [1, 32], strides = [1, 1]} : vector<8x32xf32> to vector<1x32xf32>
    %320 = vector.extract_strided_slice %316 {offsets = [3, 0], sizes = [1, 32], strides = [1, 1]} : vector<8x32xf32> to vector<1x32xf32>
    %321 = vector.extract_strided_slice %316 {offsets = [4, 0], sizes = [1, 32], strides = [1, 1]} : vector<8x32xf32> to vector<1x32xf32>
    %322 = vector.extract_strided_slice %316 {offsets = [5, 0], sizes = [1, 32], strides = [1, 1]} : vector<8x32xf32> to vector<1x32xf32>
    %323 = vector.extract_strided_slice %316 {offsets = [6, 0], sizes = [1, 32], strides = [1, 1]} : vector<8x32xf32> to vector<1x32xf32>
    %c1_145 = arith.constant 1 : index
    %c2_146 = arith.constant 2 : index
    %c0_147 = arith.constant 0 : index
    %c0_148 = arith.constant 0 : index
    %324 = vector.load %arg4[%c1_145, %c2_146, %c0_147, %c0_148] : memref<3x8x32x32xf32, #tpu.memory_space<vmem>>, vector<1x1x32x32xf32>
    %325 = vector.shape_cast %324 : vector<1x1x32x32xf32> to vector<32x32xf32>
    %cst_149 = arith.constant dense<0.000000e+00> : vector<2x32xf32>
    %326 = tpu.matmul %314, %325, %cst_149 {dimension_numbers = #tpu.dot_dimension_numbers<[1], [0], [0], [1], [0, 0, 1, 1], [], []>} : vector<2x32xf32>, vector<32x32xf32>, vector<2x32xf32> -> vector<2x32xf32>
    %327 = vector.broadcast %317 : vector<1x32xf32> to vector<2x32xf32>
    %328 = arith.addf %326, %327 : vector<2x32xf32>
    %329 = arith.addf %314, %328 : vector<2x32xf32>
    %cst_150 = arith.constant dense<0.000000e+00> : vector<2xf32>
    %330 = vector.multi_reduction <add>, %329, %cst_150 [1] : vector<2x32xf32> to vector<2xf32>
    %331 = vector.shape_cast %330 : vector<2xf32> to vector<2x1xf32>
    %cst_151 = arith.constant 3.200000e+01 : f32
    %332 = vector.broadcast %cst_151 : f32 to vector<2x1xf32>
    %333 = arith.divf %331, %332 : vector<2x1xf32>
    %334 = vector.broadcast %333 : vector<2x1xf32> to vector<2x32xf32>
    %335 = arith.subf %329, %334 : vector<2x32xf32>
    %336 = arith.mulf %335, %335 : vector<2x32xf32>
    %cst_152 = arith.constant dense<0.000000e+00> : vector<2xf32>
    %337 = vector.multi_reduction <add>, %336, %cst_152 [1] : vector<2x32xf32> to vector<2xf32>
    %338 = vector.shape_cast %337 : vector<2xf32> to vector<2x1xf32>
    %cst_153 = arith.constant 3.200000e+01 : f32
    %339 = vector.broadcast %cst_153 : f32 to vector<2x1xf32>
    %340 = arith.divf %338, %339 : vector<2x1xf32>
    %341 = vector.broadcast %333 : vector<2x1xf32> to vector<2x32xf32>
    %342 = arith.subf %329, %341 : vector<2x32xf32>
    %cst_154 = arith.constant 9.99999974E-6 : f32
    %343 = vector.broadcast %cst_154 : f32 to vector<2x1xf32>
    %344 = arith.addf %340, %343 : vector<2x1xf32>
    %345 = math.rsqrt %344 : vector<2x1xf32>
    %346 = vector.broadcast %345 : vector<2x1xf32> to vector<2x32xf32>
    %347 = arith.mulf %342, %346 : vector<2x32xf32>
    %348 = vector.broadcast %318 : vector<1x32xf32> to vector<2x32xf32>
    %349 = arith.mulf %347, %348 : vector<2x32xf32>
    %350 = vector.broadcast %319 : vector<1x32xf32> to vector<2x32xf32>
    %351 = arith.addf %349, %350 : vector<2x32xf32>
    %c1_155 = arith.constant 1 : index
    %c2_156 = arith.constant 2 : index
    %c0_157 = arith.constant 0 : index
    %c0_158 = arith.constant 0 : index
    %352 = vector.load %arg5[%c1_155, %c2_156, %c0_157, %c0_158] : memref<3x8x32x32xf32, #tpu.memory_space<vmem>>, vector<1x1x32x32xf32>
    %353 = vector.shape_cast %352 : vector<1x1x32x32xf32> to vector<32x32xf32>
    %cst_159 = arith.constant dense<0.000000e+00> : vector<2x32xf32>
    %354 = tpu.matmul %351, %353, %cst_159 {dimension_numbers = #tpu.dot_dimension_numbers<[1], [0], [0], [1], [0, 0, 1, 1], [], []>} : vector<2x32xf32>, vector<32x32xf32>, vector<2x32xf32> -> vector<2x32xf32>
    %355 = vector.broadcast %320 : vector<1x32xf32> to vector<2x32xf32>
    %356 = arith.addf %354, %355 : vector<2x32xf32>
    %cst_160 = arith.constant 0.000000e+00 : f32
    %357 = vector.broadcast %cst_160 : f32 to vector<2x32xf32>
    %358 = arith.maximumf %356, %357 : vector<2x32xf32>
    %c1_161 = arith.constant 1 : index
    %c2_162 = arith.constant 2 : index
    %c0_163 = arith.constant 0 : index
    %c0_164 = arith.constant 0 : index
    %359 = vector.load %arg6[%c1_161, %c2_162, %c0_163, %c0_164] : memref<3x8x32x32xf32, #tpu.memory_space<vmem>>, vector<1x1x32x32xf32>
    %360 = vector.shape_cast %359 : vector<1x1x32x32xf32> to vector<32x32xf32>
    %cst_165 = arith.constant dense<0.000000e+00> : vector<2x32xf32>
    %361 = tpu.matmul %358, %360, %cst_165 {dimension_numbers = #tpu.dot_dimension_numbers<[1], [0], [0], [1], [0, 0, 1, 1], [], []>} : vector<2x32xf32>, vector<32x32xf32>, vector<2x32xf32> -> vector<2x32xf32>
    %362 = vector.broadcast %321 : vector<1x32xf32> to vector<2x32xf32>
    %363 = arith.addf %361, %362 : vector<2x32xf32>
    %364 = arith.addf %351, %363 : vector<2x32xf32>
    %cst_166 = arith.constant dense<0.000000e+00> : vector<2xf32>
    %365 = vector.multi_reduction <add>, %364, %cst_166 [1] : vector<2x32xf32> to vector<2xf32>
    %366 = vector.shape_cast %365 : vector<2xf32> to vector<2x1xf32>
    %cst_167 = arith.constant 3.200000e+01 : f32
    %367 = vector.broadcast %cst_167 : f32 to vector<2x1xf32>
    %368 = arith.divf %366, %367 : vector<2x1xf32>
    %369 = vector.broadcast %368 : vector<2x1xf32> to vector<2x32xf32>
    %370 = arith.subf %364, %369 : vector<2x32xf32>
    %371 = arith.mulf %370, %370 : vector<2x32xf32>
    %cst_168 = arith.constant dense<0.000000e+00> : vector<2xf32>
    %372 = vector.multi_reduction <add>, %371, %cst_168 [1] : vector<2x32xf32> to vector<2xf32>
    %373 = vector.shape_cast %372 : vector<2xf32> to vector<2x1xf32>
    %cst_169 = arith.constant 3.200000e+01 : f32
    %374 = vector.broadcast %cst_169 : f32 to vector<2x1xf32>
    %375 = arith.divf %373, %374 : vector<2x1xf32>
    %376 = vector.broadcast %368 : vector<2x1xf32> to vector<2x32xf32>
    %377 = arith.subf %364, %376 : vector<2x32xf32>
    %cst_170 = arith.constant 9.99999974E-6 : f32
    %378 = vector.broadcast %cst_170 : f32 to vector<2x1xf32>
    %379 = arith.addf %375, %378 : vector<2x1xf32>
    %380 = math.rsqrt %379 : vector<2x1xf32>
    %381 = vector.broadcast %380 : vector<2x1xf32> to vector<2x32xf32>
    %382 = arith.mulf %377, %381 : vector<2x32xf32>
    %383 = vector.broadcast %322 : vector<1x32xf32> to vector<2x32xf32>
    %384 = arith.mulf %382, %383 : vector<2x32xf32>
    %385 = vector.broadcast %323 : vector<1x32xf32> to vector<2x32xf32>
    %386 = arith.addf %384, %385 : vector<2x32xf32>
    %c1_171 = arith.constant 1 : index
    %c3 = arith.constant 3 : index
    %c0_172 = arith.constant 0 : index
    %c0_173 = arith.constant 0 : index
    %387 = vector.load %arg7[%c1_171, %c3, %c0_172, %c0_173] : memref<3x8x8x32xf32, #tpu.memory_space<vmem>>, vector<1x1x8x32xf32>
    %388 = vector.shape_cast %387 : vector<1x1x8x32xf32> to vector<8x32xf32>
    %389 = vector.extract_strided_slice %388 {offsets = [0, 0], sizes = [1, 32], strides = [1, 1]} : vector<8x32xf32> to vector<1x32xf32>
    %390 = vector.extract_strided_slice %388 {offsets = [1, 0], sizes = [1, 32], strides = [1, 1]} : vector<8x32xf32> to vector<1x32xf32>
    %391 = vector.extract_strided_slice %388 {offsets = [2, 0], sizes = [1, 32], strides = [1, 1]} : vector<8x32xf32> to vector<1x32xf32>
    %392 = vector.extract_strided_slice %388 {offsets = [3, 0], sizes = [1, 32], strides = [1, 1]} : vector<8x32xf32> to vector<1x32xf32>
    %393 = vector.extract_strided_slice %388 {offsets = [4, 0], sizes = [1, 32], strides = [1, 1]} : vector<8x32xf32> to vector<1x32xf32>
    %394 = vector.extract_strided_slice %388 {offsets = [5, 0], sizes = [1, 32], strides = [1, 1]} : vector<8x32xf32> to vector<1x32xf32>
    %395 = vector.extract_strided_slice %388 {offsets = [6, 0], sizes = [1, 32], strides = [1, 1]} : vector<8x32xf32> to vector<1x32xf32>
    %c1_174 = arith.constant 1 : index
    %c3_175 = arith.constant 3 : index
    %c0_176 = arith.constant 0 : index
    %c0_177 = arith.constant 0 : index
    %396 = vector.load %arg4[%c1_174, %c3_175, %c0_176, %c0_177] : memref<3x8x32x32xf32, #tpu.memory_space<vmem>>, vector<1x1x32x32xf32>
    %397 = vector.shape_cast %396 : vector<1x1x32x32xf32> to vector<32x32xf32>
    %cst_178 = arith.constant dense<0.000000e+00> : vector<2x32xf32>
    %398 = tpu.matmul %386, %397, %cst_178 {dimension_numbers = #tpu.dot_dimension_numbers<[1], [0], [0], [1], [0, 0, 1, 1], [], []>} : vector<2x32xf32>, vector<32x32xf32>, vector<2x32xf32> -> vector<2x32xf32>
    %399 = vector.broadcast %389 : vector<1x32xf32> to vector<2x32xf32>
    %400 = arith.addf %398, %399 : vector<2x32xf32>
    %401 = arith.addf %386, %400 : vector<2x32xf32>
    %cst_179 = arith.constant dense<0.000000e+00> : vector<2xf32>
    %402 = vector.multi_reduction <add>, %401, %cst_179 [1] : vector<2x32xf32> to vector<2xf32>
    %403 = vector.shape_cast %402 : vector<2xf32> to vector<2x1xf32>
    %cst_180 = arith.constant 3.200000e+01 : f32
    %404 = vector.broadcast %cst_180 : f32 to vector<2x1xf32>
    %405 = arith.divf %403, %404 : vector<2x1xf32>
    %406 = vector.broadcast %405 : vector<2x1xf32> to vector<2x32xf32>
    %407 = arith.subf %401, %406 : vector<2x32xf32>
    %408 = arith.mulf %407, %407 : vector<2x32xf32>
    %cst_181 = arith.constant dense<0.000000e+00> : vector<2xf32>
    %409 = vector.multi_reduction <add>, %408, %cst_181 [1] : vector<2x32xf32> to vector<2xf32>
    %410 = vector.shape_cast %409 : vector<2xf32> to vector<2x1xf32>
    %cst_182 = arith.constant 3.200000e+01 : f32
    %411 = vector.broadcast %cst_182 : f32 to vector<2x1xf32>
    %412 = arith.divf %410, %411 : vector<2x1xf32>
    %413 = vector.broadcast %405 : vector<2x1xf32> to vector<2x32xf32>
    %414 = arith.subf %401, %413 : vector<2x32xf32>
    %cst_183 = arith.constant 9.99999974E-6 : f32
    %415 = vector.broadcast %cst_183 : f32 to vector<2x1xf32>
    %416 = arith.addf %412, %415 : vector<2x1xf32>
    %417 = math.rsqrt %416 : vector<2x1xf32>
    %418 = vector.broadcast %417 : vector<2x1xf32> to vector<2x32xf32>
    %419 = arith.mulf %414, %418 : vector<2x32xf32>
    %420 = vector.broadcast %390 : vector<1x32xf32> to vector<2x32xf32>
    %421 = arith.mulf %419, %420 : vector<2x32xf32>
    %422 = vector.broadcast %391 : vector<1x32xf32> to vector<2x32xf32>
    %423 = arith.addf %421, %422 : vector<2x32xf32>
    %c1_184 = arith.constant 1 : index
    %c3_185 = arith.constant 3 : index
    %c0_186 = arith.constant 0 : index
    %c0_187 = arith.constant 0 : index
    %424 = vector.load %arg5[%c1_184, %c3_185, %c0_186, %c0_187] : memref<3x8x32x32xf32, #tpu.memory_space<vmem>>, vector<1x1x32x32xf32>
    %425 = vector.shape_cast %424 : vector<1x1x32x32xf32> to vector<32x32xf32>
    %cst_188 = arith.constant dense<0.000000e+00> : vector<2x32xf32>
    %426 = tpu.matmul %423, %425, %cst_188 {dimension_numbers = #tpu.dot_dimension_numbers<[1], [0], [0], [1], [0, 0, 1, 1], [], []>} : vector<2x32xf32>, vector<32x32xf32>, vector<2x32xf32> -> vector<2x32xf32>
    %427 = vector.broadcast %392 : vector<1x32xf32> to vector<2x32xf32>
    %428 = arith.addf %426, %427 : vector<2x32xf32>
    %cst_189 = arith.constant 0.000000e+00 : f32
    %429 = vector.broadcast %cst_189 : f32 to vector<2x32xf32>
    %430 = arith.maximumf %428, %429 : vector<2x32xf32>
    %c1_190 = arith.constant 1 : index
    %c3_191 = arith.constant 3 : index
    %c0_192 = arith.constant 0 : index
    %c0_193 = arith.constant 0 : index
    %431 = vector.load %arg6[%c1_190, %c3_191, %c0_192, %c0_193] : memref<3x8x32x32xf32, #tpu.memory_space<vmem>>, vector<1x1x32x32xf32>
    %432 = vector.shape_cast %431 : vector<1x1x32x32xf32> to vector<32x32xf32>
    %cst_194 = arith.constant dense<0.000000e+00> : vector<2x32xf32>
    %433 = tpu.matmul %430, %432, %cst_194 {dimension_numbers = #tpu.dot_dimension_numbers<[1], [0], [0], [1], [0, 0, 1, 1], [], []>} : vector<2x32xf32>, vector<32x32xf32>, vector<2x32xf32> -> vector<2x32xf32>
    %434 = vector.broadcast %393 : vector<1x32xf32> to vector<2x32xf32>
    %435 = arith.addf %433, %434 : vector<2x32xf32>
    %436 = arith.addf %423, %435 : vector<2x32xf32>
    %cst_195 = arith.constant dense<0.000000e+00> : vector<2xf32>
    %437 = vector.multi_reduction <add>, %436, %cst_195 [1] : vector<2x32xf32> to vector<2xf32>
    %438 = vector.shape_cast %437 : vector<2xf32> to vector<2x1xf32>
    %cst_196 = arith.constant 3.200000e+01 : f32
    %439 = vector.broadcast %cst_196 : f32 to vector<2x1xf32>
    %440 = arith.divf %438, %439 : vector<2x1xf32>
    %441 = vector.broadcast %440 : vector<2x1xf32> to vector<2x32xf32>
    %442 = arith.subf %436, %441 : vector<2x32xf32>
    %443 = arith.mulf %442, %442 : vector<2x32xf32>
    %cst_197 = arith.constant dense<0.000000e+00> : vector<2xf32>
    %444 = vector.multi_reduction <add>, %443, %cst_197 [1] : vector<2x32xf32> to vector<2xf32>
    %445 = vector.shape_cast %444 : vector<2xf32> to vector<2x1xf32>
    %cst_198 = arith.constant 3.200000e+01 : f32
    %446 = vector.broadcast %cst_198 : f32 to vector<2x1xf32>
    %447 = arith.divf %445, %446 : vector<2x1xf32>
    %448 = vector.broadcast %440 : vector<2x1xf32> to vector<2x32xf32>
    %449 = arith.subf %436, %448 : vector<2x32xf32>
    %cst_199 = arith.constant 9.99999974E-6 : f32
    %450 = vector.broadcast %cst_199 : f32 to vector<2x1xf32>
    %451 = arith.addf %447, %450 : vector<2x1xf32>
    %452 = math.rsqrt %451 : vector<2x1xf32>
    %453 = vector.broadcast %452 : vector<2x1xf32> to vector<2x32xf32>
    %454 = arith.mulf %449, %453 : vector<2x32xf32>
    %455 = vector.broadcast %394 : vector<1x32xf32> to vector<2x32xf32>
    %456 = arith.mulf %454, %455 : vector<2x32xf32>
    %457 = vector.broadcast %395 : vector<1x32xf32> to vector<2x32xf32>
    %458 = arith.addf %456, %457 : vector<2x32xf32>
    %c1_200 = arith.constant 1 : index
    %459 = memref.load %arg0[%c1_200] : memref<3xf32, #tpu.memory_space<smem>>
    %c1_201 = arith.constant 1 : index
    %c0_202 = arith.constant 0 : index
    %c0_203 = arith.constant 0 : index
    %460 = vector.load %arg8[%c1_201, %c0_202, %c0_203] : memref<3x32x128xf32, #tpu.memory_space<vmem>>, vector<1x32x128xf32>
    %461 = vector.shape_cast %460 : vector<1x32x128xf32> to vector<32x128xf32>
    %cst_204 = arith.constant dense<0.000000e+00> : vector<2x128xf32>
    %462 = tpu.matmul %458, %461, %cst_204 {dimension_numbers = #tpu.dot_dimension_numbers<[1], [0], [0], [1], [0, 0, 1, 1], [], []>} : vector<2x32xf32>, vector<32x128xf32>, vector<2x128xf32> -> vector<2x128xf32>
    %c1_205 = arith.constant 1 : index
    %c0_206 = arith.constant 0 : index
    %c0_207 = arith.constant 0 : index
    %463 = vector.load %arg9[%c1_205, %c0_206, %c0_207] : memref<3x1x128xf32, #tpu.memory_space<vmem>>, vector<1x1x128xf32>
    %464 = vector.shape_cast %463 : vector<1x1x128xf32> to vector<1x128xf32>
    %465 = vector.broadcast %464 : vector<1x128xf32> to vector<2x128xf32>
    %466 = arith.addf %462, %465 : vector<2x128xf32>
    %467 = vector.broadcast %459 : f32 to vector<2x128xf32>
    %468 = arith.mulf %467, %466 : vector<2x128xf32>
    %469 = arith.addf %163, %468 : vector<2x128xf32>
    %c2_208 = arith.constant 2 : index
    %c0_209 = arith.constant 0 : index
    %c0_210 = arith.constant 0 : index
    %470 = vector.load %arg2[%c2_208, %c0_209, %c0_210] : memref<3x16x32xf32, #tpu.memory_space<vmem>>, vector<1x16x32xf32>
    %471 = vector.shape_cast %470 : vector<1x16x32xf32> to vector<16x32xf32>
    %cst_211 = arith.constant dense<0.000000e+00> : vector<2x32xf32>
    %472 = tpu.matmul %0, %471, %cst_211 {dimension_numbers = #tpu.dot_dimension_numbers<[1], [0], [0], [1], [0, 0, 1, 1], [], []>} : vector<2x16xf32>, vector<16x32xf32>, vector<2x32xf32> -> vector<2x32xf32>
    %c2_212 = arith.constant 2 : index
    %c0_213 = arith.constant 0 : index
    %c0_214 = arith.constant 0 : index
    %473 = vector.load %arg3[%c2_212, %c0_213, %c0_214] : memref<3x1x32xf32, #tpu.memory_space<vmem>>, vector<1x1x32xf32>
    %474 = vector.shape_cast %473 : vector<1x1x32xf32> to vector<1x32xf32>
    %475 = vector.broadcast %474 : vector<1x32xf32> to vector<2x32xf32>
    %476 = arith.addf %472, %475 : vector<2x32xf32>
    %c2_215 = arith.constant 2 : index
    %c0_216 = arith.constant 0 : index
    %c0_217 = arith.constant 0 : index
    %c0_218 = arith.constant 0 : index
    %477 = vector.load %arg7[%c2_215, %c0_216, %c0_217, %c0_218] : memref<3x8x8x32xf32, #tpu.memory_space<vmem>>, vector<1x1x8x32xf32>
    %478 = vector.shape_cast %477 : vector<1x1x8x32xf32> to vector<8x32xf32>
    %479 = vector.extract_strided_slice %478 {offsets = [0, 0], sizes = [1, 32], strides = [1, 1]} : vector<8x32xf32> to vector<1x32xf32>
    %480 = vector.extract_strided_slice %478 {offsets = [1, 0], sizes = [1, 32], strides = [1, 1]} : vector<8x32xf32> to vector<1x32xf32>
    %481 = vector.extract_strided_slice %478 {offsets = [2, 0], sizes = [1, 32], strides = [1, 1]} : vector<8x32xf32> to vector<1x32xf32>
    %482 = vector.extract_strided_slice %478 {offsets = [3, 0], sizes = [1, 32], strides = [1, 1]} : vector<8x32xf32> to vector<1x32xf32>
    %483 = vector.extract_strided_slice %478 {offsets = [4, 0], sizes = [1, 32], strides = [1, 1]} : vector<8x32xf32> to vector<1x32xf32>
    %484 = vector.extract_strided_slice %478 {offsets = [5, 0], sizes = [1, 32], strides = [1, 1]} : vector<8x32xf32> to vector<1x32xf32>
    %485 = vector.extract_strided_slice %478 {offsets = [6, 0], sizes = [1, 32], strides = [1, 1]} : vector<8x32xf32> to vector<1x32xf32>
    %c2_219 = arith.constant 2 : index
    %c0_220 = arith.constant 0 : index
    %c0_221 = arith.constant 0 : index
    %c0_222 = arith.constant 0 : index
    %486 = vector.load %arg4[%c2_219, %c0_220, %c0_221, %c0_222] : memref<3x8x32x32xf32, #tpu.memory_space<vmem>>, vector<1x1x32x32xf32>
    %487 = vector.shape_cast %486 : vector<1x1x32x32xf32> to vector<32x32xf32>
    %cst_223 = arith.constant dense<0.000000e+00> : vector<2x32xf32>
    %488 = tpu.matmul %476, %487, %cst_223 {dimension_numbers = #tpu.dot_dimension_numbers<[1], [0], [0], [1], [0, 0, 1, 1], [], []>} : vector<2x32xf32>, vector<32x32xf32>, vector<2x32xf32> -> vector<2x32xf32>
    %489 = vector.broadcast %479 : vector<1x32xf32> to vector<2x32xf32>
    %490 = arith.addf %488, %489 : vector<2x32xf32>
    %491 = arith.addf %476, %490 : vector<2x32xf32>
    %cst_224 = arith.constant dense<0.000000e+00> : vector<2xf32>
    %492 = vector.multi_reduction <add>, %491, %cst_224 [1] : vector<2x32xf32> to vector<2xf32>
    %493 = vector.shape_cast %492 : vector<2xf32> to vector<2x1xf32>
    %cst_225 = arith.constant 3.200000e+01 : f32
    %494 = vector.broadcast %cst_225 : f32 to vector<2x1xf32>
    %495 = arith.divf %493, %494 : vector<2x1xf32>
    %496 = vector.broadcast %495 : vector<2x1xf32> to vector<2x32xf32>
    %497 = arith.subf %491, %496 : vector<2x32xf32>
    %498 = arith.mulf %497, %497 : vector<2x32xf32>
    %cst_226 = arith.constant dense<0.000000e+00> : vector<2xf32>
    %499 = vector.multi_reduction <add>, %498, %cst_226 [1] : vector<2x32xf32> to vector<2xf32>
    %500 = vector.shape_cast %499 : vector<2xf32> to vector<2x1xf32>
    %cst_227 = arith.constant 3.200000e+01 : f32
    %501 = vector.broadcast %cst_227 : f32 to vector<2x1xf32>
    %502 = arith.divf %500, %501 : vector<2x1xf32>
    %503 = vector.broadcast %495 : vector<2x1xf32> to vector<2x32xf32>
    %504 = arith.subf %491, %503 : vector<2x32xf32>
    %cst_228 = arith.constant 9.99999974E-6 : f32
    %505 = vector.broadcast %cst_228 : f32 to vector<2x1xf32>
    %506 = arith.addf %502, %505 : vector<2x1xf32>
    %507 = math.rsqrt %506 : vector<2x1xf32>
    %508 = vector.broadcast %507 : vector<2x1xf32> to vector<2x32xf32>
    %509 = arith.mulf %504, %508 : vector<2x32xf32>
    %510 = vector.broadcast %480 : vector<1x32xf32> to vector<2x32xf32>
    %511 = arith.mulf %509, %510 : vector<2x32xf32>
    %512 = vector.broadcast %481 : vector<1x32xf32> to vector<2x32xf32>
    %513 = arith.addf %511, %512 : vector<2x32xf32>
    %c2_229 = arith.constant 2 : index
    %c0_230 = arith.constant 0 : index
    %c0_231 = arith.constant 0 : index
    %c0_232 = arith.constant 0 : index
    %514 = vector.load %arg5[%c2_229, %c0_230, %c0_231, %c0_232] : memref<3x8x32x32xf32, #tpu.memory_space<vmem>>, vector<1x1x32x32xf32>
    %515 = vector.shape_cast %514 : vector<1x1x32x32xf32> to vector<32x32xf32>
    %cst_233 = arith.constant dense<0.000000e+00> : vector<2x32xf32>
    %516 = tpu.matmul %513, %515, %cst_233 {dimension_numbers = #tpu.dot_dimension_numbers<[1], [0], [0], [1], [0, 0, 1, 1], [], []>} : vector<2x32xf32>, vector<32x32xf32>, vector<2x32xf32> -> vector<2x32xf32>
    %517 = vector.broadcast %482 : vector<1x32xf32> to vector<2x32xf32>
    %518 = arith.addf %516, %517 : vector<2x32xf32>
    %cst_234 = arith.constant 0.000000e+00 : f32
    %519 = vector.broadcast %cst_234 : f32 to vector<2x32xf32>
    %520 = arith.maximumf %518, %519 : vector<2x32xf32>
    %c2_235 = arith.constant 2 : index
    %c0_236 = arith.constant 0 : index
    %c0_237 = arith.constant 0 : index
    %c0_238 = arith.constant 0 : index
    %521 = vector.load %arg6[%c2_235, %c0_236, %c0_237, %c0_238] : memref<3x8x32x32xf32, #tpu.memory_space<vmem>>, vector<1x1x32x32xf32>
    %522 = vector.shape_cast %521 : vector<1x1x32x32xf32> to vector<32x32xf32>
    %cst_239 = arith.constant dense<0.000000e+00> : vector<2x32xf32>
    %523 = tpu.matmul %520, %522, %cst_239 {dimension_numbers = #tpu.dot_dimension_numbers<[1], [0], [0], [1], [0, 0, 1, 1], [], []>} : vector<2x32xf32>, vector<32x32xf32>, vector<2x32xf32> -> vector<2x32xf32>
    %524 = vector.broadcast %483 : vector<1x32xf32> to vector<2x32xf32>
    %525 = arith.addf %523, %524 : vector<2x32xf32>
    %526 = arith.addf %513, %525 : vector<2x32xf32>
    %cst_240 = arith.constant dense<0.000000e+00> : vector<2xf32>
    %527 = vector.multi_reduction <add>, %526, %cst_240 [1] : vector<2x32xf32> to vector<2xf32>
    %528 = vector.shape_cast %527 : vector<2xf32> to vector<2x1xf32>
    %cst_241 = arith.constant 3.200000e+01 : f32
    %529 = vector.broadcast %cst_241 : f32 to vector<2x1xf32>
    %530 = arith.divf %528, %529 : vector<2x1xf32>
    %531 = vector.broadcast %530 : vector<2x1xf32> to vector<2x32xf32>
    %532 = arith.subf %526, %531 : vector<2x32xf32>
    %533 = arith.mulf %532, %532 : vector<2x32xf32>
    %cst_242 = arith.constant dense<0.000000e+00> : vector<2xf32>
    %534 = vector.multi_reduction <add>, %533, %cst_242 [1] : vector<2x32xf32> to vector<2xf32>
    %535 = vector.shape_cast %534 : vector<2xf32> to vector<2x1xf32>
    %cst_243 = arith.constant 3.200000e+01 : f32
    %536 = vector.broadcast %cst_243 : f32 to vector<2x1xf32>
    %537 = arith.divf %535, %536 : vector<2x1xf32>
    %538 = vector.broadcast %530 : vector<2x1xf32> to vector<2x32xf32>
    %539 = arith.subf %526, %538 : vector<2x32xf32>
    %cst_244 = arith.constant 9.99999974E-6 : f32
    %540 = vector.broadcast %cst_244 : f32 to vector<2x1xf32>
    %541 = arith.addf %537, %540 : vector<2x1xf32>
    %542 = math.rsqrt %541 : vector<2x1xf32>
    %543 = vector.broadcast %542 : vector<2x1xf32> to vector<2x32xf32>
    %544 = arith.mulf %539, %543 : vector<2x32xf32>
    %545 = vector.broadcast %484 : vector<1x32xf32> to vector<2x32xf32>
    %546 = arith.mulf %544, %545 : vector<2x32xf32>
    %547 = vector.broadcast %485 : vector<1x32xf32> to vector<2x32xf32>
    %548 = arith.addf %546, %547 : vector<2x32xf32>
    %c2_245 = arith.constant 2 : index
    %c1_246 = arith.constant 1 : index
    %c0_247 = arith.constant 0 : index
    %c0_248 = arith.constant 0 : index
    %549 = vector.load %arg7[%c2_245, %c1_246, %c0_247, %c0_248] : memref<3x8x8x32xf32, #tpu.memory_space<vmem>>, vector<1x1x8x32xf32>
    %550 = vector.shape_cast %549 : vector<1x1x8x32xf32> to vector<8x32xf32>
    %551 = vector.extract_strided_slice %550 {offsets = [0, 0], sizes = [1, 32], strides = [1, 1]} : vector<8x32xf32> to vector<1x32xf32>
    %552 = vector.extract_strided_slice %550 {offsets = [1, 0], sizes = [1, 32], strides = [1, 1]} : vector<8x32xf32> to vector<1x32xf32>
    %553 = vector.extract_strided_slice %550 {offsets = [2, 0], sizes = [1, 32], strides = [1, 1]} : vector<8x32xf32> to vector<1x32xf32>
    %554 = vector.extract_strided_slice %550 {offsets = [3, 0], sizes = [1, 32], strides = [1, 1]} : vector<8x32xf32> to vector<1x32xf32>
    %555 = vector.extract_strided_slice %550 {offsets = [4, 0], sizes = [1, 32], strides = [1, 1]} : vector<8x32xf32> to vector<1x32xf32>
    %556 = vector.extract_strided_slice %550 {offsets = [5, 0], sizes = [1, 32], strides = [1, 1]} : vector<8x32xf32> to vector<1x32xf32>
    %557 = vector.extract_strided_slice %550 {offsets = [6, 0], sizes = [1, 32], strides = [1, 1]} : vector<8x32xf32> to vector<1x32xf32>
    %c2_249 = arith.constant 2 : index
    %c1_250 = arith.constant 1 : index
    %c0_251 = arith.constant 0 : index
    %c0_252 = arith.constant 0 : index
    %558 = vector.load %arg4[%c2_249, %c1_250, %c0_251, %c0_252] : memref<3x8x32x32xf32, #tpu.memory_space<vmem>>, vector<1x1x32x32xf32>
    %559 = vector.shape_cast %558 : vector<1x1x32x32xf32> to vector<32x32xf32>
    %cst_253 = arith.constant dense<0.000000e+00> : vector<2x32xf32>
    %560 = tpu.matmul %548, %559, %cst_253 {dimension_numbers = #tpu.dot_dimension_numbers<[1], [0], [0], [1], [0, 0, 1, 1], [], []>} : vector<2x32xf32>, vector<32x32xf32>, vector<2x32xf32> -> vector<2x32xf32>
    %561 = vector.broadcast %551 : vector<1x32xf32> to vector<2x32xf32>
    %562 = arith.addf %560, %561 : vector<2x32xf32>
    %563 = arith.addf %548, %562 : vector<2x32xf32>
    %cst_254 = arith.constant dense<0.000000e+00> : vector<2xf32>
    %564 = vector.multi_reduction <add>, %563, %cst_254 [1] : vector<2x32xf32> to vector<2xf32>
    %565 = vector.shape_cast %564 : vector<2xf32> to vector<2x1xf32>
    %cst_255 = arith.constant 3.200000e+01 : f32
    %566 = vector.broadcast %cst_255 : f32 to vector<2x1xf32>
    %567 = arith.divf %565, %566 : vector<2x1xf32>
    %568 = vector.broadcast %567 : vector<2x1xf32> to vector<2x32xf32>
    %569 = arith.subf %563, %568 : vector<2x32xf32>
    %570 = arith.mulf %569, %569 : vector<2x32xf32>
    %cst_256 = arith.constant dense<0.000000e+00> : vector<2xf32>
    %571 = vector.multi_reduction <add>, %570, %cst_256 [1] : vector<2x32xf32> to vector<2xf32>
    %572 = vector.shape_cast %571 : vector<2xf32> to vector<2x1xf32>
    %cst_257 = arith.constant 3.200000e+01 : f32
    %573 = vector.broadcast %cst_257 : f32 to vector<2x1xf32>
    %574 = arith.divf %572, %573 : vector<2x1xf32>
    %575 = vector.broadcast %567 : vector<2x1xf32> to vector<2x32xf32>
    %576 = arith.subf %563, %575 : vector<2x32xf32>
    %cst_258 = arith.constant 9.99999974E-6 : f32
    %577 = vector.broadcast %cst_258 : f32 to vector<2x1xf32>
    %578 = arith.addf %574, %577 : vector<2x1xf32>
    %579 = math.rsqrt %578 : vector<2x1xf32>
    %580 = vector.broadcast %579 : vector<2x1xf32> to vector<2x32xf32>
    %581 = arith.mulf %576, %580 : vector<2x32xf32>
    %582 = vector.broadcast %552 : vector<1x32xf32> to vector<2x32xf32>
    %583 = arith.mulf %581, %582 : vector<2x32xf32>
    %584 = vector.broadcast %553 : vector<1x32xf32> to vector<2x32xf32>
    %585 = arith.addf %583, %584 : vector<2x32xf32>
    %c2_259 = arith.constant 2 : index
    %c1_260 = arith.constant 1 : index
    %c0_261 = arith.constant 0 : index
    %c0_262 = arith.constant 0 : index
    %586 = vector.load %arg5[%c2_259, %c1_260, %c0_261, %c0_262] : memref<3x8x32x32xf32, #tpu.memory_space<vmem>>, vector<1x1x32x32xf32>
    %587 = vector.shape_cast %586 : vector<1x1x32x32xf32> to vector<32x32xf32>
    %cst_263 = arith.constant dense<0.000000e+00> : vector<2x32xf32>
    %588 = tpu.matmul %585, %587, %cst_263 {dimension_numbers = #tpu.dot_dimension_numbers<[1], [0], [0], [1], [0, 0, 1, 1], [], []>} : vector<2x32xf32>, vector<32x32xf32>, vector<2x32xf32> -> vector<2x32xf32>
    %589 = vector.broadcast %554 : vector<1x32xf32> to vector<2x32xf32>
    %590 = arith.addf %588, %589 : vector<2x32xf32>
    %cst_264 = arith.constant 0.000000e+00 : f32
    %591 = vector.broadcast %cst_264 : f32 to vector<2x32xf32>
    %592 = arith.maximumf %590, %591 : vector<2x32xf32>
    %c2_265 = arith.constant 2 : index
    %c1_266 = arith.constant 1 : index
    %c0_267 = arith.constant 0 : index
    %c0_268 = arith.constant 0 : index
    %593 = vector.load %arg6[%c2_265, %c1_266, %c0_267, %c0_268] : memref<3x8x32x32xf32, #tpu.memory_space<vmem>>, vector<1x1x32x32xf32>
    %594 = vector.shape_cast %593 : vector<1x1x32x32xf32> to vector<32x32xf32>
    %cst_269 = arith.constant dense<0.000000e+00> : vector<2x32xf32>
    %595 = tpu.matmul %592, %594, %cst_269 {dimension_numbers = #tpu.dot_dimension_numbers<[1], [0], [0], [1], [0, 0, 1, 1], [], []>} : vector<2x32xf32>, vector<32x32xf32>, vector<2x32xf32> -> vector<2x32xf32>
    %596 = vector.broadcast %555 : vector<1x32xf32> to vector<2x32xf32>
    %597 = arith.addf %595, %596 : vector<2x32xf32>
    %598 = arith.addf %585, %597 : vector<2x32xf32>
    %cst_270 = arith.constant dense<0.000000e+00> : vector<2xf32>
    %599 = vector.multi_reduction <add>, %598, %cst_270 [1] : vector<2x32xf32> to vector<2xf32>
    %600 = vector.shape_cast %599 : vector<2xf32> to vector<2x1xf32>
    %cst_271 = arith.constant 3.200000e+01 : f32
    %601 = vector.broadcast %cst_271 : f32 to vector<2x1xf32>
    %602 = arith.divf %600, %601 : vector<2x1xf32>
    %603 = vector.broadcast %602 : vector<2x1xf32> to vector<2x32xf32>
    %604 = arith.subf %598, %603 : vector<2x32xf32>
    %605 = arith.mulf %604, %604 : vector<2x32xf32>
    %cst_272 = arith.constant dense<0.000000e+00> : vector<2xf32>
    %606 = vector.multi_reduction <add>, %605, %cst_272 [1] : vector<2x32xf32> to vector<2xf32>
    %607 = vector.shape_cast %606 : vector<2xf32> to vector<2x1xf32>
    %cst_273 = arith.constant 3.200000e+01 : f32
    %608 = vector.broadcast %cst_273 : f32 to vector<2x1xf32>
    %609 = arith.divf %607, %608 : vector<2x1xf32>
    %610 = vector.broadcast %602 : vector<2x1xf32> to vector<2x32xf32>
    %611 = arith.subf %598, %610 : vector<2x32xf32>
    %cst_274 = arith.constant 9.99999974E-6 : f32
    %612 = vector.broadcast %cst_274 : f32 to vector<2x1xf32>
    %613 = arith.addf %609, %612 : vector<2x1xf32>
    %614 = math.rsqrt %613 : vector<2x1xf32>
    %615 = vector.broadcast %614 : vector<2x1xf32> to vector<2x32xf32>
    %616 = arith.mulf %611, %615 : vector<2x32xf32>
    %617 = vector.broadcast %556 : vector<1x32xf32> to vector<2x32xf32>
    %618 = arith.mulf %616, %617 : vector<2x32xf32>
    %619 = vector.broadcast %557 : vector<1x32xf32> to vector<2x32xf32>
    %620 = arith.addf %618, %619 : vector<2x32xf32>
    %c2_275 = arith.constant 2 : index
    %c2_276 = arith.constant 2 : index
    %c0_277 = arith.constant 0 : index
    %c0_278 = arith.constant 0 : index
    %621 = vector.load %arg7[%c2_275, %c2_276, %c0_277, %c0_278] : memref<3x8x8x32xf32, #tpu.memory_space<vmem>>, vector<1x1x8x32xf32>
    %622 = vector.shape_cast %621 : vector<1x1x8x32xf32> to vector<8x32xf32>
    %623 = vector.extract_strided_slice %622 {offsets = [0, 0], sizes = [1, 32], strides = [1, 1]} : vector<8x32xf32> to vector<1x32xf32>
    %624 = vector.extract_strided_slice %622 {offsets = [1, 0], sizes = [1, 32], strides = [1, 1]} : vector<8x32xf32> to vector<1x32xf32>
    %625 = vector.extract_strided_slice %622 {offsets = [2, 0], sizes = [1, 32], strides = [1, 1]} : vector<8x32xf32> to vector<1x32xf32>
    %626 = vector.extract_strided_slice %622 {offsets = [3, 0], sizes = [1, 32], strides = [1, 1]} : vector<8x32xf32> to vector<1x32xf32>
    %627 = vector.extract_strided_slice %622 {offsets = [4, 0], sizes = [1, 32], strides = [1, 1]} : vector<8x32xf32> to vector<1x32xf32>
    %628 = vector.extract_strided_slice %622 {offsets = [5, 0], sizes = [1, 32], strides = [1, 1]} : vector<8x32xf32> to vector<1x32xf32>
    %629 = vector.extract_strided_slice %622 {offsets = [6, 0], sizes = [1, 32], strides = [1, 1]} : vector<8x32xf32> to vector<1x32xf32>
    %c2_279 = arith.constant 2 : index
    %c2_280 = arith.constant 2 : index
    %c0_281 = arith.constant 0 : index
    %c0_282 = arith.constant 0 : index
    %630 = vector.load %arg4[%c2_279, %c2_280, %c0_281, %c0_282] : memref<3x8x32x32xf32, #tpu.memory_space<vmem>>, vector<1x1x32x32xf32>
    %631 = vector.shape_cast %630 : vector<1x1x32x32xf32> to vector<32x32xf32>
    %cst_283 = arith.constant dense<0.000000e+00> : vector<2x32xf32>
    %632 = tpu.matmul %620, %631, %cst_283 {dimension_numbers = #tpu.dot_dimension_numbers<[1], [0], [0], [1], [0, 0, 1, 1], [], []>} : vector<2x32xf32>, vector<32x32xf32>, vector<2x32xf32> -> vector<2x32xf32>
    %633 = vector.broadcast %623 : vector<1x32xf32> to vector<2x32xf32>
    %634 = arith.addf %632, %633 : vector<2x32xf32>
    %635 = arith.addf %620, %634 : vector<2x32xf32>
    %cst_284 = arith.constant dense<0.000000e+00> : vector<2xf32>
    %636 = vector.multi_reduction <add>, %635, %cst_284 [1] : vector<2x32xf32> to vector<2xf32>
    %637 = vector.shape_cast %636 : vector<2xf32> to vector<2x1xf32>
    %cst_285 = arith.constant 3.200000e+01 : f32
    %638 = vector.broadcast %cst_285 : f32 to vector<2x1xf32>
    %639 = arith.divf %637, %638 : vector<2x1xf32>
    %640 = vector.broadcast %639 : vector<2x1xf32> to vector<2x32xf32>
    %641 = arith.subf %635, %640 : vector<2x32xf32>
    %642 = arith.mulf %641, %641 : vector<2x32xf32>
    %cst_286 = arith.constant dense<0.000000e+00> : vector<2xf32>
    %643 = vector.multi_reduction <add>, %642, %cst_286 [1] : vector<2x32xf32> to vector<2xf32>
    %644 = vector.shape_cast %643 : vector<2xf32> to vector<2x1xf32>
    %cst_287 = arith.constant 3.200000e+01 : f32
    %645 = vector.broadcast %cst_287 : f32 to vector<2x1xf32>
    %646 = arith.divf %644, %645 : vector<2x1xf32>
    %647 = vector.broadcast %639 : vector<2x1xf32> to vector<2x32xf32>
    %648 = arith.subf %635, %647 : vector<2x32xf32>
    %cst_288 = arith.constant 9.99999974E-6 : f32
    %649 = vector.broadcast %cst_288 : f32 to vector<2x1xf32>
    %650 = arith.addf %646, %649 : vector<2x1xf32>
    %651 = math.rsqrt %650 : vector<2x1xf32>
    %652 = vector.broadcast %651 : vector<2x1xf32> to vector<2x32xf32>
    %653 = arith.mulf %648, %652 : vector<2x32xf32>
    %654 = vector.broadcast %624 : vector<1x32xf32> to vector<2x32xf32>
    %655 = arith.mulf %653, %654 : vector<2x32xf32>
    %656 = vector.broadcast %625 : vector<1x32xf32> to vector<2x32xf32>
    %657 = arith.addf %655, %656 : vector<2x32xf32>
    %c2_289 = arith.constant 2 : index
    %c2_290 = arith.constant 2 : index
    %c0_291 = arith.constant 0 : index
    %c0_292 = arith.constant 0 : index
    %658 = vector.load %arg5[%c2_289, %c2_290, %c0_291, %c0_292] : memref<3x8x32x32xf32, #tpu.memory_space<vmem>>, vector<1x1x32x32xf32>
    %659 = vector.shape_cast %658 : vector<1x1x32x32xf32> to vector<32x32xf32>
    %cst_293 = arith.constant dense<0.000000e+00> : vector<2x32xf32>
    %660 = tpu.matmul %657, %659, %cst_293 {dimension_numbers = #tpu.dot_dimension_numbers<[1], [0], [0], [1], [0, 0, 1, 1], [], []>} : vector<2x32xf32>, vector<32x32xf32>, vector<2x32xf32> -> vector<2x32xf32>
    %661 = vector.broadcast %626 : vector<1x32xf32> to vector<2x32xf32>
    %662 = arith.addf %660, %661 : vector<2x32xf32>
    %cst_294 = arith.constant 0.000000e+00 : f32
    %663 = vector.broadcast %cst_294 : f32 to vector<2x32xf32>
    %664 = arith.maximumf %662, %663 : vector<2x32xf32>
    %c2_295 = arith.constant 2 : index
    %c2_296 = arith.constant 2 : index
    %c0_297 = arith.constant 0 : index
    %c0_298 = arith.constant 0 : index
    %665 = vector.load %arg6[%c2_295, %c2_296, %c0_297, %c0_298] : memref<3x8x32x32xf32, #tpu.memory_space<vmem>>, vector<1x1x32x32xf32>
    %666 = vector.shape_cast %665 : vector<1x1x32x32xf32> to vector<32x32xf32>
    %cst_299 = arith.constant dense<0.000000e+00> : vector<2x32xf32>
    %667 = tpu.matmul %664, %666, %cst_299 {dimension_numbers = #tpu.dot_dimension_numbers<[1], [0], [0], [1], [0, 0, 1, 1], [], []>} : vector<2x32xf32>, vector<32x32xf32>, vector<2x32xf32> -> vector<2x32xf32>
    %668 = vector.broadcast %627 : vector<1x32xf32> to vector<2x32xf32>
    %669 = arith.addf %667, %668 : vector<2x32xf32>
    %670 = arith.addf %657, %669 : vector<2x32xf32>
    %cst_300 = arith.constant dense<0.000000e+00> : vector<2xf32>
    %671 = vector.multi_reduction <add>, %670, %cst_300 [1] : vector<2x32xf32> to vector<2xf32>
    %672 = vector.shape_cast %671 : vector<2xf32> to vector<2x1xf32>
    %cst_301 = arith.constant 3.200000e+01 : f32
    %673 = vector.broadcast %cst_301 : f32 to vector<2x1xf32>
    %674 = arith.divf %672, %673 : vector<2x1xf32>
    %675 = vector.broadcast %674 : vector<2x1xf32> to vector<2x32xf32>
    %676 = arith.subf %670, %675 : vector<2x32xf32>
    %677 = arith.mulf %676, %676 : vector<2x32xf32>
    %cst_302 = arith.constant dense<0.000000e+00> : vector<2xf32>
    %678 = vector.multi_reduction <add>, %677, %cst_302 [1] : vector<2x32xf32> to vector<2xf32>
    %679 = vector.shape_cast %678 : vector<2xf32> to vector<2x1xf32>
    %cst_303 = arith.constant 3.200000e+01 : f32
    %680 = vector.broadcast %cst_303 : f32 to vector<2x1xf32>
    %681 = arith.divf %679, %680 : vector<2x1xf32>
    %682 = vector.broadcast %674 : vector<2x1xf32> to vector<2x32xf32>
    %683 = arith.subf %670, %682 : vector<2x32xf32>
    %cst_304 = arith.constant 9.99999974E-6 : f32
    %684 = vector.broadcast %cst_304 : f32 to vector<2x1xf32>
    %685 = arith.addf %681, %684 : vector<2x1xf32>
    %686 = math.rsqrt %685 : vector<2x1xf32>
    %687 = vector.broadcast %686 : vector<2x1xf32> to vector<2x32xf32>
    %688 = arith.mulf %683, %687 : vector<2x32xf32>
    %689 = vector.broadcast %628 : vector<1x32xf32> to vector<2x32xf32>
    %690 = arith.mulf %688, %689 : vector<2x32xf32>
    %691 = vector.broadcast %629 : vector<1x32xf32> to vector<2x32xf32>
    %692 = arith.addf %690, %691 : vector<2x32xf32>
    %c2_305 = arith.constant 2 : index
    %c3_306 = arith.constant 3 : index
    %c0_307 = arith.constant 0 : index
    %c0_308 = arith.constant 0 : index
    %693 = vector.load %arg7[%c2_305, %c3_306, %c0_307, %c0_308] : memref<3x8x8x32xf32, #tpu.memory_space<vmem>>, vector<1x1x8x32xf32>
    %694 = vector.shape_cast %693 : vector<1x1x8x32xf32> to vector<8x32xf32>
    %695 = vector.extract_strided_slice %694 {offsets = [0, 0], sizes = [1, 32], strides = [1, 1]} : vector<8x32xf32> to vector<1x32xf32>
    %696 = vector.extract_strided_slice %694 {offsets = [1, 0], sizes = [1, 32], strides = [1, 1]} : vector<8x32xf32> to vector<1x32xf32>
    %697 = vector.extract_strided_slice %694 {offsets = [2, 0], sizes = [1, 32], strides = [1, 1]} : vector<8x32xf32> to vector<1x32xf32>
    %698 = vector.extract_strided_slice %694 {offsets = [3, 0], sizes = [1, 32], strides = [1, 1]} : vector<8x32xf32> to vector<1x32xf32>
    %699 = vector.extract_strided_slice %694 {offsets = [4, 0], sizes = [1, 32], strides = [1, 1]} : vector<8x32xf32> to vector<1x32xf32>
    %700 = vector.extract_strided_slice %694 {offsets = [5, 0], sizes = [1, 32], strides = [1, 1]} : vector<8x32xf32> to vector<1x32xf32>
    %701 = vector.extract_strided_slice %694 {offsets = [6, 0], sizes = [1, 32], strides = [1, 1]} : vector<8x32xf32> to vector<1x32xf32>
    %c2_309 = arith.constant 2 : index
    %c3_310 = arith.constant 3 : index
    %c0_311 = arith.constant 0 : index
    %c0_312 = arith.constant 0 : index
    %702 = vector.load %arg4[%c2_309, %c3_310, %c0_311, %c0_312] : memref<3x8x32x32xf32, #tpu.memory_space<vmem>>, vector<1x1x32x32xf32>
    %703 = vector.shape_cast %702 : vector<1x1x32x32xf32> to vector<32x32xf32>
    %cst_313 = arith.constant dense<0.000000e+00> : vector<2x32xf32>
    %704 = tpu.matmul %692, %703, %cst_313 {dimension_numbers = #tpu.dot_dimension_numbers<[1], [0], [0], [1], [0, 0, 1, 1], [], []>} : vector<2x32xf32>, vector<32x32xf32>, vector<2x32xf32> -> vector<2x32xf32>
    %705 = vector.broadcast %695 : vector<1x32xf32> to vector<2x32xf32>
    %706 = arith.addf %704, %705 : vector<2x32xf32>
    %707 = arith.addf %692, %706 : vector<2x32xf32>
    %cst_314 = arith.constant dense<0.000000e+00> : vector<2xf32>
    %708 = vector.multi_reduction <add>, %707, %cst_314 [1] : vector<2x32xf32> to vector<2xf32>
    %709 = vector.shape_cast %708 : vector<2xf32> to vector<2x1xf32>
    %cst_315 = arith.constant 3.200000e+01 : f32
    %710 = vector.broadcast %cst_315 : f32 to vector<2x1xf32>
    %711 = arith.divf %709, %710 : vector<2x1xf32>
    %712 = vector.broadcast %711 : vector<2x1xf32> to vector<2x32xf32>
    %713 = arith.subf %707, %712 : vector<2x32xf32>
    %714 = arith.mulf %713, %713 : vector<2x32xf32>
    %cst_316 = arith.constant dense<0.000000e+00> : vector<2xf32>
    %715 = vector.multi_reduction <add>, %714, %cst_316 [1] : vector<2x32xf32> to vector<2xf32>
    %716 = vector.shape_cast %715 : vector<2xf32> to vector<2x1xf32>
    %cst_317 = arith.constant 3.200000e+01 : f32
    %717 = vector.broadcast %cst_317 : f32 to vector<2x1xf32>
    %718 = arith.divf %716, %717 : vector<2x1xf32>
    %719 = vector.broadcast %711 : vector<2x1xf32> to vector<2x32xf32>
    %720 = arith.subf %707, %719 : vector<2x32xf32>
    %cst_318 = arith.constant 9.99999974E-6 : f32
    %721 = vector.broadcast %cst_318 : f32 to vector<2x1xf32>
    %722 = arith.addf %718, %721 : vector<2x1xf32>
    %723 = math.rsqrt %722 : vector<2x1xf32>
    %724 = vector.broadcast %723 : vector<2x1xf32> to vector<2x32xf32>
    %725 = arith.mulf %720, %724 : vector<2x32xf32>
    %726 = vector.broadcast %696 : vector<1x32xf32> to vector<2x32xf32>
    %727 = arith.mulf %725, %726 : vector<2x32xf32>
    %728 = vector.broadcast %697 : vector<1x32xf32> to vector<2x32xf32>
    %729 = arith.addf %727, %728 : vector<2x32xf32>
    %c2_319 = arith.constant 2 : index
    %c3_320 = arith.constant 3 : index
    %c0_321 = arith.constant 0 : index
    %c0_322 = arith.constant 0 : index
    %730 = vector.load %arg5[%c2_319, %c3_320, %c0_321, %c0_322] : memref<3x8x32x32xf32, #tpu.memory_space<vmem>>, vector<1x1x32x32xf32>
    %731 = vector.shape_cast %730 : vector<1x1x32x32xf32> to vector<32x32xf32>
    %cst_323 = arith.constant dense<0.000000e+00> : vector<2x32xf32>
    %732 = tpu.matmul %729, %731, %cst_323 {dimension_numbers = #tpu.dot_dimension_numbers<[1], [0], [0], [1], [0, 0, 1, 1], [], []>} : vector<2x32xf32>, vector<32x32xf32>, vector<2x32xf32> -> vector<2x32xf32>
    %733 = vector.broadcast %698 : vector<1x32xf32> to vector<2x32xf32>
    %734 = arith.addf %732, %733 : vector<2x32xf32>
    %cst_324 = arith.constant 0.000000e+00 : f32
    %735 = vector.broadcast %cst_324 : f32 to vector<2x32xf32>
    %736 = arith.maximumf %734, %735 : vector<2x32xf32>
    %c2_325 = arith.constant 2 : index
    %c3_326 = arith.constant 3 : index
    %c0_327 = arith.constant 0 : index
    %c0_328 = arith.constant 0 : index
    %737 = vector.load %arg6[%c2_325, %c3_326, %c0_327, %c0_328] : memref<3x8x32x32xf32, #tpu.memory_space<vmem>>, vector<1x1x32x32xf32>
    %738 = vector.shape_cast %737 : vector<1x1x32x32xf32> to vector<32x32xf32>
    %cst_329 = arith.constant dense<0.000000e+00> : vector<2x32xf32>
    %739 = tpu.matmul %736, %738, %cst_329 {dimension_numbers = #tpu.dot_dimension_numbers<[1], [0], [0], [1], [0, 0, 1, 1], [], []>} : vector<2x32xf32>, vector<32x32xf32>, vector<2x32xf32> -> vector<2x32xf32>
    %740 = vector.broadcast %699 : vector<1x32xf32> to vector<2x32xf32>
    %741 = arith.addf %739, %740 : vector<2x32xf32>
    %742 = arith.addf %729, %741 : vector<2x32xf32>
    %cst_330 = arith.constant dense<0.000000e+00> : vector<2xf32>
    %743 = vector.multi_reduction <add>, %742, %cst_330 [1] : vector<2x32xf32> to vector<2xf32>
    %744 = vector.shape_cast %743 : vector<2xf32> to vector<2x1xf32>
    %cst_331 = arith.constant 3.200000e+01 : f32
    %745 = vector.broadcast %cst_331 : f32 to vector<2x1xf32>
    %746 = arith.divf %744, %745 : vector<2x1xf32>
    %747 = vector.broadcast %746 : vector<2x1xf32> to vector<2x32xf32>
    %748 = arith.subf %742, %747 : vector<2x32xf32>
    %749 = arith.mulf %748, %748 : vector<2x32xf32>
    %cst_332 = arith.constant dense<0.000000e+00> : vector<2xf32>
    %750 = vector.multi_reduction <add>, %749, %cst_332 [1] : vector<2x32xf32> to vector<2xf32>
    %751 = vector.shape_cast %750 : vector<2xf32> to vector<2x1xf32>
    %cst_333 = arith.constant 3.200000e+01 : f32
    %752 = vector.broadcast %cst_333 : f32 to vector<2x1xf32>
    %753 = arith.divf %751, %752 : vector<2x1xf32>
    %754 = vector.broadcast %746 : vector<2x1xf32> to vector<2x32xf32>
    %755 = arith.subf %742, %754 : vector<2x32xf32>
    %cst_334 = arith.constant 9.99999974E-6 : f32
    %756 = vector.broadcast %cst_334 : f32 to vector<2x1xf32>
    %757 = arith.addf %753, %756 : vector<2x1xf32>
    %758 = math.rsqrt %757 : vector<2x1xf32>
    %759 = vector.broadcast %758 : vector<2x1xf32> to vector<2x32xf32>
    %760 = arith.mulf %755, %759 : vector<2x32xf32>
    %761 = vector.broadcast %700 : vector<1x32xf32> to vector<2x32xf32>
    %762 = arith.mulf %760, %761 : vector<2x32xf32>
    %763 = vector.broadcast %701 : vector<1x32xf32> to vector<2x32xf32>
    %764 = arith.addf %762, %763 : vector<2x32xf32>
    %c2_335 = arith.constant 2 : index
    %c4 = arith.constant 4 : index
    %c0_336 = arith.constant 0 : index
    %c0_337 = arith.constant 0 : index
    %765 = vector.load %arg7[%c2_335, %c4, %c0_336, %c0_337] : memref<3x8x8x32xf32, #tpu.memory_space<vmem>>, vector<1x1x8x32xf32>
    %766 = vector.shape_cast %765 : vector<1x1x8x32xf32> to vector<8x32xf32>
    %767 = vector.extract_strided_slice %766 {offsets = [0, 0], sizes = [1, 32], strides = [1, 1]} : vector<8x32xf32> to vector<1x32xf32>
    %768 = vector.extract_strided_slice %766 {offsets = [1, 0], sizes = [1, 32], strides = [1, 1]} : vector<8x32xf32> to vector<1x32xf32>
    %769 = vector.extract_strided_slice %766 {offsets = [2, 0], sizes = [1, 32], strides = [1, 1]} : vector<8x32xf32> to vector<1x32xf32>
    %770 = vector.extract_strided_slice %766 {offsets = [3, 0], sizes = [1, 32], strides = [1, 1]} : vector<8x32xf32> to vector<1x32xf32>
    %771 = vector.extract_strided_slice %766 {offsets = [4, 0], sizes = [1, 32], strides = [1, 1]} : vector<8x32xf32> to vector<1x32xf32>
    %772 = vector.extract_strided_slice %766 {offsets = [5, 0], sizes = [1, 32], strides = [1, 1]} : vector<8x32xf32> to vector<1x32xf32>
    %773 = vector.extract_strided_slice %766 {offsets = [6, 0], sizes = [1, 32], strides = [1, 1]} : vector<8x32xf32> to vector<1x32xf32>
    %c2_338 = arith.constant 2 : index
    %c4_339 = arith.constant 4 : index
    %c0_340 = arith.constant 0 : index
    %c0_341 = arith.constant 0 : index
    %774 = vector.load %arg4[%c2_338, %c4_339, %c0_340, %c0_341] : memref<3x8x32x32xf32, #tpu.memory_space<vmem>>, vector<1x1x32x32xf32>
    %775 = vector.shape_cast %774 : vector<1x1x32x32xf32> to vector<32x32xf32>
    %cst_342 = arith.constant dense<0.000000e+00> : vector<2x32xf32>
    %776 = tpu.matmul %764, %775, %cst_342 {dimension_numbers = #tpu.dot_dimension_numbers<[1], [0], [0], [1], [0, 0, 1, 1], [], []>} : vector<2x32xf32>, vector<32x32xf32>, vector<2x32xf32> -> vector<2x32xf32>
    %777 = vector.broadcast %767 : vector<1x32xf32> to vector<2x32xf32>
    %778 = arith.addf %776, %777 : vector<2x32xf32>
    %779 = arith.addf %764, %778 : vector<2x32xf32>
    %cst_343 = arith.constant dense<0.000000e+00> : vector<2xf32>
    %780 = vector.multi_reduction <add>, %779, %cst_343 [1] : vector<2x32xf32> to vector<2xf32>
    %781 = vector.shape_cast %780 : vector<2xf32> to vector<2x1xf32>
    %cst_344 = arith.constant 3.200000e+01 : f32
    %782 = vector.broadcast %cst_344 : f32 to vector<2x1xf32>
    %783 = arith.divf %781, %782 : vector<2x1xf32>
    %784 = vector.broadcast %783 : vector<2x1xf32> to vector<2x32xf32>
    %785 = arith.subf %779, %784 : vector<2x32xf32>
    %786 = arith.mulf %785, %785 : vector<2x32xf32>
    %cst_345 = arith.constant dense<0.000000e+00> : vector<2xf32>
    %787 = vector.multi_reduction <add>, %786, %cst_345 [1] : vector<2x32xf32> to vector<2xf32>
    %788 = vector.shape_cast %787 : vector<2xf32> to vector<2x1xf32>
    %cst_346 = arith.constant 3.200000e+01 : f32
    %789 = vector.broadcast %cst_346 : f32 to vector<2x1xf32>
    %790 = arith.divf %788, %789 : vector<2x1xf32>
    %791 = vector.broadcast %783 : vector<2x1xf32> to vector<2x32xf32>
    %792 = arith.subf %779, %791 : vector<2x32xf32>
    %cst_347 = arith.constant 9.99999974E-6 : f32
    %793 = vector.broadcast %cst_347 : f32 to vector<2x1xf32>
    %794 = arith.addf %790, %793 : vector<2x1xf32>
    %795 = math.rsqrt %794 : vector<2x1xf32>
    %796 = vector.broadcast %795 : vector<2x1xf32> to vector<2x32xf32>
    %797 = arith.mulf %792, %796 : vector<2x32xf32>
    %798 = vector.broadcast %768 : vector<1x32xf32> to vector<2x32xf32>
    %799 = arith.mulf %797, %798 : vector<2x32xf32>
    %800 = vector.broadcast %769 : vector<1x32xf32> to vector<2x32xf32>
    %801 = arith.addf %799, %800 : vector<2x32xf32>
    %c2_348 = arith.constant 2 : index
    %c4_349 = arith.constant 4 : index
    %c0_350 = arith.constant 0 : index
    %c0_351 = arith.constant 0 : index
    %802 = vector.load %arg5[%c2_348, %c4_349, %c0_350, %c0_351] : memref<3x8x32x32xf32, #tpu.memory_space<vmem>>, vector<1x1x32x32xf32>
    %803 = vector.shape_cast %802 : vector<1x1x32x32xf32> to vector<32x32xf32>
    %cst_352 = arith.constant dense<0.000000e+00> : vector<2x32xf32>
    %804 = tpu.matmul %801, %803, %cst_352 {dimension_numbers = #tpu.dot_dimension_numbers<[1], [0], [0], [1], [0, 0, 1, 1], [], []>} : vector<2x32xf32>, vector<32x32xf32>, vector<2x32xf32> -> vector<2x32xf32>
    %805 = vector.broadcast %770 : vector<1x32xf32> to vector<2x32xf32>
    %806 = arith.addf %804, %805 : vector<2x32xf32>
    %cst_353 = arith.constant 0.000000e+00 : f32
    %807 = vector.broadcast %cst_353 : f32 to vector<2x32xf32>
    %808 = arith.maximumf %806, %807 : vector<2x32xf32>
    %c2_354 = arith.constant 2 : index
    %c4_355 = arith.constant 4 : index
    %c0_356 = arith.constant 0 : index
    %c0_357 = arith.constant 0 : index
    %809 = vector.load %arg6[%c2_354, %c4_355, %c0_356, %c0_357] : memref<3x8x32x32xf32, #tpu.memory_space<vmem>>, vector<1x1x32x32xf32>
    %810 = vector.shape_cast %809 : vector<1x1x32x32xf32> to vector<32x32xf32>
    %cst_358 = arith.constant dense<0.000000e+00> : vector<2x32xf32>
    %811 = tpu.matmul %808, %810, %cst_358 {dimension_numbers = #tpu.dot_dimension_numbers<[1], [0], [0], [1], [0, 0, 1, 1], [], []>} : vector<2x32xf32>, vector<32x32xf32>, vector<2x32xf32> -> vector<2x32xf32>
    %812 = vector.broadcast %771 : vector<1x32xf32> to vector<2x32xf32>
    %813 = arith.addf %811, %812 : vector<2x32xf32>
    %814 = arith.addf %801, %813 : vector<2x32xf32>
    %cst_359 = arith.constant dense<0.000000e+00> : vector<2xf32>
    %815 = vector.multi_reduction <add>, %814, %cst_359 [1] : vector<2x32xf32> to vector<2xf32>
    %816 = vector.shape_cast %815 : vector<2xf32> to vector<2x1xf32>
    %cst_360 = arith.constant 3.200000e+01 : f32
    %817 = vector.broadcast %cst_360 : f32 to vector<2x1xf32>
    %818 = arith.divf %816, %817 : vector<2x1xf32>
    %819 = vector.broadcast %818 : vector<2x1xf32> to vector<2x32xf32>
    %820 = arith.subf %814, %819 : vector<2x32xf32>
    %821 = arith.mulf %820, %820 : vector<2x32xf32>
    %cst_361 = arith.constant dense<0.000000e+00> : vector<2xf32>
    %822 = vector.multi_reduction <add>, %821, %cst_361 [1] : vector<2x32xf32> to vector<2xf32>
    %823 = vector.shape_cast %822 : vector<2xf32> to vector<2x1xf32>
    %cst_362 = arith.constant 3.200000e+01 : f32
    %824 = vector.broadcast %cst_362 : f32 to vector<2x1xf32>
    %825 = arith.divf %823, %824 : vector<2x1xf32>
    %826 = vector.broadcast %818 : vector<2x1xf32> to vector<2x32xf32>
    %827 = arith.subf %814, %826 : vector<2x32xf32>
    %cst_363 = arith.constant 9.99999974E-6 : f32
    %828 = vector.broadcast %cst_363 : f32 to vector<2x1xf32>
    %829 = arith.addf %825, %828 : vector<2x1xf32>
    %830 = math.rsqrt %829 : vector<2x1xf32>
    %831 = vector.broadcast %830 : vector<2x1xf32> to vector<2x32xf32>
    %832 = arith.mulf %827, %831 : vector<2x32xf32>
    %833 = vector.broadcast %772 : vector<1x32xf32> to vector<2x32xf32>
    %834 = arith.mulf %832, %833 : vector<2x32xf32>
    %835 = vector.broadcast %773 : vector<1x32xf32> to vector<2x32xf32>
    %836 = arith.addf %834, %835 : vector<2x32xf32>
    %c2_364 = arith.constant 2 : index
    %c5 = arith.constant 5 : index
    %c0_365 = arith.constant 0 : index
    %c0_366 = arith.constant 0 : index
    %837 = vector.load %arg7[%c2_364, %c5, %c0_365, %c0_366] : memref<3x8x8x32xf32, #tpu.memory_space<vmem>>, vector<1x1x8x32xf32>
    %838 = vector.shape_cast %837 : vector<1x1x8x32xf32> to vector<8x32xf32>
    %839 = vector.extract_strided_slice %838 {offsets = [0, 0], sizes = [1, 32], strides = [1, 1]} : vector<8x32xf32> to vector<1x32xf32>
    %840 = vector.extract_strided_slice %838 {offsets = [1, 0], sizes = [1, 32], strides = [1, 1]} : vector<8x32xf32> to vector<1x32xf32>
    %841 = vector.extract_strided_slice %838 {offsets = [2, 0], sizes = [1, 32], strides = [1, 1]} : vector<8x32xf32> to vector<1x32xf32>
    %842 = vector.extract_strided_slice %838 {offsets = [3, 0], sizes = [1, 32], strides = [1, 1]} : vector<8x32xf32> to vector<1x32xf32>
    %843 = vector.extract_strided_slice %838 {offsets = [4, 0], sizes = [1, 32], strides = [1, 1]} : vector<8x32xf32> to vector<1x32xf32>
    %844 = vector.extract_strided_slice %838 {offsets = [5, 0], sizes = [1, 32], strides = [1, 1]} : vector<8x32xf32> to vector<1x32xf32>
    %845 = vector.extract_strided_slice %838 {offsets = [6, 0], sizes = [1, 32], strides = [1, 1]} : vector<8x32xf32> to vector<1x32xf32>
    %c2_367 = arith.constant 2 : index
    %c5_368 = arith.constant 5 : index
    %c0_369 = arith.constant 0 : index
    %c0_370 = arith.constant 0 : index
    %846 = vector.load %arg4[%c2_367, %c5_368, %c0_369, %c0_370] : memref<3x8x32x32xf32, #tpu.memory_space<vmem>>, vector<1x1x32x32xf32>
    %847 = vector.shape_cast %846 : vector<1x1x32x32xf32> to vector<32x32xf32>
    %cst_371 = arith.constant dense<0.000000e+00> : vector<2x32xf32>
    %848 = tpu.matmul %836, %847, %cst_371 {dimension_numbers = #tpu.dot_dimension_numbers<[1], [0], [0], [1], [0, 0, 1, 1], [], []>} : vector<2x32xf32>, vector<32x32xf32>, vector<2x32xf32> -> vector<2x32xf32>
    %849 = vector.broadcast %839 : vector<1x32xf32> to vector<2x32xf32>
    %850 = arith.addf %848, %849 : vector<2x32xf32>
    %851 = arith.addf %836, %850 : vector<2x32xf32>
    %cst_372 = arith.constant dense<0.000000e+00> : vector<2xf32>
    %852 = vector.multi_reduction <add>, %851, %cst_372 [1] : vector<2x32xf32> to vector<2xf32>
    %853 = vector.shape_cast %852 : vector<2xf32> to vector<2x1xf32>
    %cst_373 = arith.constant 3.200000e+01 : f32
    %854 = vector.broadcast %cst_373 : f32 to vector<2x1xf32>
    %855 = arith.divf %853, %854 : vector<2x1xf32>
    %856 = vector.broadcast %855 : vector<2x1xf32> to vector<2x32xf32>
    %857 = arith.subf %851, %856 : vector<2x32xf32>
    %858 = arith.mulf %857, %857 : vector<2x32xf32>
    %cst_374 = arith.constant dense<0.000000e+00> : vector<2xf32>
    %859 = vector.multi_reduction <add>, %858, %cst_374 [1] : vector<2x32xf32> to vector<2xf32>
    %860 = vector.shape_cast %859 : vector<2xf32> to vector<2x1xf32>
    %cst_375 = arith.constant 3.200000e+01 : f32
    %861 = vector.broadcast %cst_375 : f32 to vector<2x1xf32>
    %862 = arith.divf %860, %861 : vector<2x1xf32>
    %863 = vector.broadcast %855 : vector<2x1xf32> to vector<2x32xf32>
    %864 = arith.subf %851, %863 : vector<2x32xf32>
    %cst_376 = arith.constant 9.99999974E-6 : f32
    %865 = vector.broadcast %cst_376 : f32 to vector<2x1xf32>
    %866 = arith.addf %862, %865 : vector<2x1xf32>
    %867 = math.rsqrt %866 : vector<2x1xf32>
    %868 = vector.broadcast %867 : vector<2x1xf32> to vector<2x32xf32>
    %869 = arith.mulf %864, %868 : vector<2x32xf32>
    %870 = vector.broadcast %840 : vector<1x32xf32> to vector<2x32xf32>
    %871 = arith.mulf %869, %870 : vector<2x32xf32>
    %872 = vector.broadcast %841 : vector<1x32xf32> to vector<2x32xf32>
    %873 = arith.addf %871, %872 : vector<2x32xf32>
    %c2_377 = arith.constant 2 : index
    %c5_378 = arith.constant 5 : index
    %c0_379 = arith.constant 0 : index
    %c0_380 = arith.constant 0 : index
    %874 = vector.load %arg5[%c2_377, %c5_378, %c0_379, %c0_380] : memref<3x8x32x32xf32, #tpu.memory_space<vmem>>, vector<1x1x32x32xf32>
    %875 = vector.shape_cast %874 : vector<1x1x32x32xf32> to vector<32x32xf32>
    %cst_381 = arith.constant dense<0.000000e+00> : vector<2x32xf32>
    %876 = tpu.matmul %873, %875, %cst_381 {dimension_numbers = #tpu.dot_dimension_numbers<[1], [0], [0], [1], [0, 0, 1, 1], [], []>} : vector<2x32xf32>, vector<32x32xf32>, vector<2x32xf32> -> vector<2x32xf32>
    %877 = vector.broadcast %842 : vector<1x32xf32> to vector<2x32xf32>
    %878 = arith.addf %876, %877 : vector<2x32xf32>
    %cst_382 = arith.constant 0.000000e+00 : f32
    %879 = vector.broadcast %cst_382 : f32 to vector<2x32xf32>
    %880 = arith.maximumf %878, %879 : vector<2x32xf32>
    %c2_383 = arith.constant 2 : index
    %c5_384 = arith.constant 5 : index
    %c0_385 = arith.constant 0 : index
    %c0_386 = arith.constant 0 : index
    %881 = vector.load %arg6[%c2_383, %c5_384, %c0_385, %c0_386] : memref<3x8x32x32xf32, #tpu.memory_space<vmem>>, vector<1x1x32x32xf32>
    %882 = vector.shape_cast %881 : vector<1x1x32x32xf32> to vector<32x32xf32>
    %cst_387 = arith.constant dense<0.000000e+00> : vector<2x32xf32>
    %883 = tpu.matmul %880, %882, %cst_387 {dimension_numbers = #tpu.dot_dimension_numbers<[1], [0], [0], [1], [0, 0, 1, 1], [], []>} : vector<2x32xf32>, vector<32x32xf32>, vector<2x32xf32> -> vector<2x32xf32>
    %884 = vector.broadcast %843 : vector<1x32xf32> to vector<2x32xf32>
    %885 = arith.addf %883, %884 : vector<2x32xf32>
    %886 = arith.addf %873, %885 : vector<2x32xf32>
    %cst_388 = arith.constant dense<0.000000e+00> : vector<2xf32>
    %887 = vector.multi_reduction <add>, %886, %cst_388 [1] : vector<2x32xf32> to vector<2xf32>
    %888 = vector.shape_cast %887 : vector<2xf32> to vector<2x1xf32>
    %cst_389 = arith.constant 3.200000e+01 : f32
    %889 = vector.broadcast %cst_389 : f32 to vector<2x1xf32>
    %890 = arith.divf %888, %889 : vector<2x1xf32>
    %891 = vector.broadcast %890 : vector<2x1xf32> to vector<2x32xf32>
    %892 = arith.subf %886, %891 : vector<2x32xf32>
    %893 = arith.mulf %892, %892 : vector<2x32xf32>
    %cst_390 = arith.constant dense<0.000000e+00> : vector<2xf32>
    %894 = vector.multi_reduction <add>, %893, %cst_390 [1] : vector<2x32xf32> to vector<2xf32>
    %895 = vector.shape_cast %894 : vector<2xf32> to vector<2x1xf32>
    %cst_391 = arith.constant 3.200000e+01 : f32
    %896 = vector.broadcast %cst_391 : f32 to vector<2x1xf32>
    %897 = arith.divf %895, %896 : vector<2x1xf32>
    %898 = vector.broadcast %890 : vector<2x1xf32> to vector<2x32xf32>
    %899 = arith.subf %886, %898 : vector<2x32xf32>
    %cst_392 = arith.constant 9.99999974E-6 : f32
    %900 = vector.broadcast %cst_392 : f32 to vector<2x1xf32>
    %901 = arith.addf %897, %900 : vector<2x1xf32>
    %902 = math.rsqrt %901 : vector<2x1xf32>
    %903 = vector.broadcast %902 : vector<2x1xf32> to vector<2x32xf32>
    %904 = arith.mulf %899, %903 : vector<2x32xf32>
    %905 = vector.broadcast %844 : vector<1x32xf32> to vector<2x32xf32>
    %906 = arith.mulf %904, %905 : vector<2x32xf32>
    %907 = vector.broadcast %845 : vector<1x32xf32> to vector<2x32xf32>
    %908 = arith.addf %906, %907 : vector<2x32xf32>
    %c2_393 = arith.constant 2 : index
    %c6 = arith.constant 6 : index
    %c0_394 = arith.constant 0 : index
    %c0_395 = arith.constant 0 : index
    %909 = vector.load %arg7[%c2_393, %c6, %c0_394, %c0_395] : memref<3x8x8x32xf32, #tpu.memory_space<vmem>>, vector<1x1x8x32xf32>
    %910 = vector.shape_cast %909 : vector<1x1x8x32xf32> to vector<8x32xf32>
    %911 = vector.extract_strided_slice %910 {offsets = [0, 0], sizes = [1, 32], strides = [1, 1]} : vector<8x32xf32> to vector<1x32xf32>
    %912 = vector.extract_strided_slice %910 {offsets = [1, 0], sizes = [1, 32], strides = [1, 1]} : vector<8x32xf32> to vector<1x32xf32>
    %913 = vector.extract_strided_slice %910 {offsets = [2, 0], sizes = [1, 32], strides = [1, 1]} : vector<8x32xf32> to vector<1x32xf32>
    %914 = vector.extract_strided_slice %910 {offsets = [3, 0], sizes = [1, 32], strides = [1, 1]} : vector<8x32xf32> to vector<1x32xf32>
    %915 = vector.extract_strided_slice %910 {offsets = [4, 0], sizes = [1, 32], strides = [1, 1]} : vector<8x32xf32> to vector<1x32xf32>
    %916 = vector.extract_strided_slice %910 {offsets = [5, 0], sizes = [1, 32], strides = [1, 1]} : vector<8x32xf32> to vector<1x32xf32>
    %917 = vector.extract_strided_slice %910 {offsets = [6, 0], sizes = [1, 32], strides = [1, 1]} : vector<8x32xf32> to vector<1x32xf32>
    %c2_396 = arith.constant 2 : index
    %c6_397 = arith.constant 6 : index
    %c0_398 = arith.constant 0 : index
    %c0_399 = arith.constant 0 : index
    %918 = vector.load %arg4[%c2_396, %c6_397, %c0_398, %c0_399] : memref<3x8x32x32xf32, #tpu.memory_space<vmem>>, vector<1x1x32x32xf32>
    %919 = vector.shape_cast %918 : vector<1x1x32x32xf32> to vector<32x32xf32>
    %cst_400 = arith.constant dense<0.000000e+00> : vector<2x32xf32>
    %920 = tpu.matmul %908, %919, %cst_400 {dimension_numbers = #tpu.dot_dimension_numbers<[1], [0], [0], [1], [0, 0, 1, 1], [], []>} : vector<2x32xf32>, vector<32x32xf32>, vector<2x32xf32> -> vector<2x32xf32>
    %921 = vector.broadcast %911 : vector<1x32xf32> to vector<2x32xf32>
    %922 = arith.addf %920, %921 : vector<2x32xf32>
    %923 = arith.addf %908, %922 : vector<2x32xf32>
    %cst_401 = arith.constant dense<0.000000e+00> : vector<2xf32>
    %924 = vector.multi_reduction <add>, %923, %cst_401 [1] : vector<2x32xf32> to vector<2xf32>
    %925 = vector.shape_cast %924 : vector<2xf32> to vector<2x1xf32>
    %cst_402 = arith.constant 3.200000e+01 : f32
    %926 = vector.broadcast %cst_402 : f32 to vector<2x1xf32>
    %927 = arith.divf %925, %926 : vector<2x1xf32>
    %928 = vector.broadcast %927 : vector<2x1xf32> to vector<2x32xf32>
    %929 = arith.subf %923, %928 : vector<2x32xf32>
    %930 = arith.mulf %929, %929 : vector<2x32xf32>
    %cst_403 = arith.constant dense<0.000000e+00> : vector<2xf32>
    %931 = vector.multi_reduction <add>, %930, %cst_403 [1] : vector<2x32xf32> to vector<2xf32>
    %932 = vector.shape_cast %931 : vector<2xf32> to vector<2x1xf32>
    %cst_404 = arith.constant 3.200000e+01 : f32
    %933 = vector.broadcast %cst_404 : f32 to vector<2x1xf32>
    %934 = arith.divf %932, %933 : vector<2x1xf32>
    %935 = vector.broadcast %927 : vector<2x1xf32> to vector<2x32xf32>
    %936 = arith.subf %923, %935 : vector<2x32xf32>
    %cst_405 = arith.constant 9.99999974E-6 : f32
    %937 = vector.broadcast %cst_405 : f32 to vector<2x1xf32>
    %938 = arith.addf %934, %937 : vector<2x1xf32>
    %939 = math.rsqrt %938 : vector<2x1xf32>
    %940 = vector.broadcast %939 : vector<2x1xf32> to vector<2x32xf32>
    %941 = arith.mulf %936, %940 : vector<2x32xf32>
    %942 = vector.broadcast %912 : vector<1x32xf32> to vector<2x32xf32>
    %943 = arith.mulf %941, %942 : vector<2x32xf32>
    %944 = vector.broadcast %913 : vector<1x32xf32> to vector<2x32xf32>
    %945 = arith.addf %943, %944 : vector<2x32xf32>
    %c2_406 = arith.constant 2 : index
    %c6_407 = arith.constant 6 : index
    %c0_408 = arith.constant 0 : index
    %c0_409 = arith.constant 0 : index
    %946 = vector.load %arg5[%c2_406, %c6_407, %c0_408, %c0_409] : memref<3x8x32x32xf32, #tpu.memory_space<vmem>>, vector<1x1x32x32xf32>
    %947 = vector.shape_cast %946 : vector<1x1x32x32xf32> to vector<32x32xf32>
    %cst_410 = arith.constant dense<0.000000e+00> : vector<2x32xf32>
    %948 = tpu.matmul %945, %947, %cst_410 {dimension_numbers = #tpu.dot_dimension_numbers<[1], [0], [0], [1], [0, 0, 1, 1], [], []>} : vector<2x32xf32>, vector<32x32xf32>, vector<2x32xf32> -> vector<2x32xf32>
    %949 = vector.broadcast %914 : vector<1x32xf32> to vector<2x32xf32>
    %950 = arith.addf %948, %949 : vector<2x32xf32>
    %cst_411 = arith.constant 0.000000e+00 : f32
    %951 = vector.broadcast %cst_411 : f32 to vector<2x32xf32>
    %952 = arith.maximumf %950, %951 : vector<2x32xf32>
    %c2_412 = arith.constant 2 : index
    %c6_413 = arith.constant 6 : index
    %c0_414 = arith.constant 0 : index
    %c0_415 = arith.constant 0 : index
    %953 = vector.load %arg6[%c2_412, %c6_413, %c0_414, %c0_415] : memref<3x8x32x32xf32, #tpu.memory_space<vmem>>, vector<1x1x32x32xf32>
    %954 = vector.shape_cast %953 : vector<1x1x32x32xf32> to vector<32x32xf32>
    %cst_416 = arith.constant dense<0.000000e+00> : vector<2x32xf32>
    %955 = tpu.matmul %952, %954, %cst_416 {dimension_numbers = #tpu.dot_dimension_numbers<[1], [0], [0], [1], [0, 0, 1, 1], [], []>} : vector<2x32xf32>, vector<32x32xf32>, vector<2x32xf32> -> vector<2x32xf32>
    %956 = vector.broadcast %915 : vector<1x32xf32> to vector<2x32xf32>
    %957 = arith.addf %955, %956 : vector<2x32xf32>
    %958 = arith.addf %945, %957 : vector<2x32xf32>
    %cst_417 = arith.constant dense<0.000000e+00> : vector<2xf32>
    %959 = vector.multi_reduction <add>, %958, %cst_417 [1] : vector<2x32xf32> to vector<2xf32>
    %960 = vector.shape_cast %959 : vector<2xf32> to vector<2x1xf32>
    %cst_418 = arith.constant 3.200000e+01 : f32
    %961 = vector.broadcast %cst_418 : f32 to vector<2x1xf32>
    %962 = arith.divf %960, %961 : vector<2x1xf32>
    %963 = vector.broadcast %962 : vector<2x1xf32> to vector<2x32xf32>
    %964 = arith.subf %958, %963 : vector<2x32xf32>
    %965 = arith.mulf %964, %964 : vector<2x32xf32>
    %cst_419 = arith.constant dense<0.000000e+00> : vector<2xf32>
    %966 = vector.multi_reduction <add>, %965, %cst_419 [1] : vector<2x32xf32> to vector<2xf32>
    %967 = vector.shape_cast %966 : vector<2xf32> to vector<2x1xf32>
    %cst_420 = arith.constant 3.200000e+01 : f32
    %968 = vector.broadcast %cst_420 : f32 to vector<2x1xf32>
    %969 = arith.divf %967, %968 : vector<2x1xf32>
    %970 = vector.broadcast %962 : vector<2x1xf32> to vector<2x32xf32>
    %971 = arith.subf %958, %970 : vector<2x32xf32>
    %cst_421 = arith.constant 9.99999974E-6 : f32
    %972 = vector.broadcast %cst_421 : f32 to vector<2x1xf32>
    %973 = arith.addf %969, %972 : vector<2x1xf32>
    %974 = math.rsqrt %973 : vector<2x1xf32>
    %975 = vector.broadcast %974 : vector<2x1xf32> to vector<2x32xf32>
    %976 = arith.mulf %971, %975 : vector<2x32xf32>
    %977 = vector.broadcast %916 : vector<1x32xf32> to vector<2x32xf32>
    %978 = arith.mulf %976, %977 : vector<2x32xf32>
    %979 = vector.broadcast %917 : vector<1x32xf32> to vector<2x32xf32>
    %980 = arith.addf %978, %979 : vector<2x32xf32>
    %c2_422 = arith.constant 2 : index
    %c7 = arith.constant 7 : index
    %c0_423 = arith.constant 0 : index
    %c0_424 = arith.constant 0 : index
    %981 = vector.load %arg7[%c2_422, %c7, %c0_423, %c0_424] : memref<3x8x8x32xf32, #tpu.memory_space<vmem>>, vector<1x1x8x32xf32>
    %982 = vector.shape_cast %981 : vector<1x1x8x32xf32> to vector<8x32xf32>
    %983 = vector.extract_strided_slice %982 {offsets = [0, 0], sizes = [1, 32], strides = [1, 1]} : vector<8x32xf32> to vector<1x32xf32>
    %984 = vector.extract_strided_slice %982 {offsets = [1, 0], sizes = [1, 32], strides = [1, 1]} : vector<8x32xf32> to vector<1x32xf32>
    %985 = vector.extract_strided_slice %982 {offsets = [2, 0], sizes = [1, 32], strides = [1, 1]} : vector<8x32xf32> to vector<1x32xf32>
    %986 = vector.extract_strided_slice %982 {offsets = [3, 0], sizes = [1, 32], strides = [1, 1]} : vector<8x32xf32> to vector<1x32xf32>
    %987 = vector.extract_strided_slice %982 {offsets = [4, 0], sizes = [1, 32], strides = [1, 1]} : vector<8x32xf32> to vector<1x32xf32>
    %988 = vector.extract_strided_slice %982 {offsets = [5, 0], sizes = [1, 32], strides = [1, 1]} : vector<8x32xf32> to vector<1x32xf32>
    %989 = vector.extract_strided_slice %982 {offsets = [6, 0], sizes = [1, 32], strides = [1, 1]} : vector<8x32xf32> to vector<1x32xf32>
    %c2_425 = arith.constant 2 : index
    %c7_426 = arith.constant 7 : index
    %c0_427 = arith.constant 0 : index
    %c0_428 = arith.constant 0 : index
    %990 = vector.load %arg4[%c2_425, %c7_426, %c0_427, %c0_428] : memref<3x8x32x32xf32, #tpu.memory_space<vmem>>, vector<1x1x32x32xf32>
    %991 = vector.shape_cast %990 : vector<1x1x32x32xf32> to vector<32x32xf32>
    %cst_429 = arith.constant dense<0.000000e+00> : vector<2x32xf32>
    %992 = tpu.matmul %980, %991, %cst_429 {dimension_numbers = #tpu.dot_dimension_numbers<[1], [0], [0], [1], [0, 0, 1, 1], [], []>} : vector<2x32xf32>, vector<32x32xf32>, vector<2x32xf32> -> vector<2x32xf32>
    %993 = vector.broadcast %983 : vector<1x32xf32> to vector<2x32xf32>
    %994 = arith.addf %992, %993 : vector<2x32xf32>
    %995 = arith.addf %980, %994 : vector<2x32xf32>
    %cst_430 = arith.constant dense<0.000000e+00> : vector<2xf32>
    %996 = vector.multi_reduction <add>, %995, %cst_430 [1] : vector<2x32xf32> to vector<2xf32>
    %997 = vector.shape_cast %996 : vector<2xf32> to vector<2x1xf32>
    %cst_431 = arith.constant 3.200000e+01 : f32
    %998 = vector.broadcast %cst_431 : f32 to vector<2x1xf32>
    %999 = arith.divf %997, %998 : vector<2x1xf32>
    %1000 = vector.broadcast %999 : vector<2x1xf32> to vector<2x32xf32>
    %1001 = arith.subf %995, %1000 : vector<2x32xf32>
    %1002 = arith.mulf %1001, %1001 : vector<2x32xf32>
    %cst_432 = arith.constant dense<0.000000e+00> : vector<2xf32>
    %1003 = vector.multi_reduction <add>, %1002, %cst_432 [1] : vector<2x32xf32> to vector<2xf32>
    %1004 = vector.shape_cast %1003 : vector<2xf32> to vector<2x1xf32>
    %cst_433 = arith.constant 3.200000e+01 : f32
    %1005 = vector.broadcast %cst_433 : f32 to vector<2x1xf32>
    %1006 = arith.divf %1004, %1005 : vector<2x1xf32>
    %1007 = vector.broadcast %999 : vector<2x1xf32> to vector<2x32xf32>
    %1008 = arith.subf %995, %1007 : vector<2x32xf32>
    %cst_434 = arith.constant 9.99999974E-6 : f32
    %1009 = vector.broadcast %cst_434 : f32 to vector<2x1xf32>
    %1010 = arith.addf %1006, %1009 : vector<2x1xf32>
    %1011 = math.rsqrt %1010 : vector<2x1xf32>
    %1012 = vector.broadcast %1011 : vector<2x1xf32> to vector<2x32xf32>
    %1013 = arith.mulf %1008, %1012 : vector<2x32xf32>
    %1014 = vector.broadcast %984 : vector<1x32xf32> to vector<2x32xf32>
    %1015 = arith.mulf %1013, %1014 : vector<2x32xf32>
    %1016 = vector.broadcast %985 : vector<1x32xf32> to vector<2x32xf32>
    %1017 = arith.addf %1015, %1016 : vector<2x32xf32>
    %c2_435 = arith.constant 2 : index
    %c7_436 = arith.constant 7 : index
    %c0_437 = arith.constant 0 : index
    %c0_438 = arith.constant 0 : index
    %1018 = vector.load %arg5[%c2_435, %c7_436, %c0_437, %c0_438] : memref<3x8x32x32xf32, #tpu.memory_space<vmem>>, vector<1x1x32x32xf32>
    %1019 = vector.shape_cast %1018 : vector<1x1x32x32xf32> to vector<32x32xf32>
    %cst_439 = arith.constant dense<0.000000e+00> : vector<2x32xf32>
    %1020 = tpu.matmul %1017, %1019, %cst_439 {dimension_numbers = #tpu.dot_dimension_numbers<[1], [0], [0], [1], [0, 0, 1, 1], [], []>} : vector<2x32xf32>, vector<32x32xf32>, vector<2x32xf32> -> vector<2x32xf32>
    %1021 = vector.broadcast %986 : vector<1x32xf32> to vector<2x32xf32>
    %1022 = arith.addf %1020, %1021 : vector<2x32xf32>
    %cst_440 = arith.constant 0.000000e+00 : f32
    %1023 = vector.broadcast %cst_440 : f32 to vector<2x32xf32>
    %1024 = arith.maximumf %1022, %1023 : vector<2x32xf32>
    %c2_441 = arith.constant 2 : index
    %c7_442 = arith.constant 7 : index
    %c0_443 = arith.constant 0 : index
    %c0_444 = arith.constant 0 : index
    %1025 = vector.load %arg6[%c2_441, %c7_442, %c0_443, %c0_444] : memref<3x8x32x32xf32, #tpu.memory_space<vmem>>, vector<1x1x32x32xf32>
    %1026 = vector.shape_cast %1025 : vector<1x1x32x32xf32> to vector<32x32xf32>
    %cst_445 = arith.constant dense<0.000000e+00> : vector<2x32xf32>
    %1027 = tpu.matmul %1024, %1026, %cst_445 {dimension_numbers = #tpu.dot_dimension_numbers<[1], [0], [0], [1], [0, 0, 1, 1], [], []>} : vector<2x32xf32>, vector<32x32xf32>, vector<2x32xf32> -> vector<2x32xf32>
    %1028 = vector.broadcast %987 : vector<1x32xf32> to vector<2x32xf32>
    %1029 = arith.addf %1027, %1028 : vector<2x32xf32>
    %1030 = arith.addf %1017, %1029 : vector<2x32xf32>
    %cst_446 = arith.constant dense<0.000000e+00> : vector<2xf32>
    %1031 = vector.multi_reduction <add>, %1030, %cst_446 [1] : vector<2x32xf32> to vector<2xf32>
    %1032 = vector.shape_cast %1031 : vector<2xf32> to vector<2x1xf32>
    %cst_447 = arith.constant 3.200000e+01 : f32
    %1033 = vector.broadcast %cst_447 : f32 to vector<2x1xf32>
    %1034 = arith.divf %1032, %1033 : vector<2x1xf32>
    %1035 = vector.broadcast %1034 : vector<2x1xf32> to vector<2x32xf32>
    %1036 = arith.subf %1030, %1035 : vector<2x32xf32>
    %1037 = arith.mulf %1036, %1036 : vector<2x32xf32>
    %cst_448 = arith.constant dense<0.000000e+00> : vector<2xf32>
    %1038 = vector.multi_reduction <add>, %1037, %cst_448 [1] : vector<2x32xf32> to vector<2xf32>
    %1039 = vector.shape_cast %1038 : vector<2xf32> to vector<2x1xf32>
    %cst_449 = arith.constant 3.200000e+01 : f32
    %1040 = vector.broadcast %cst_449 : f32 to vector<2x1xf32>
    %1041 = arith.divf %1039, %1040 : vector<2x1xf32>
    %1042 = vector.broadcast %1034 : vector<2x1xf32> to vector<2x32xf32>
    %1043 = arith.subf %1030, %1042 : vector<2x32xf32>
    %cst_450 = arith.constant 9.99999974E-6 : f32
    %1044 = vector.broadcast %cst_450 : f32 to vector<2x1xf32>
    %1045 = arith.addf %1041, %1044 : vector<2x1xf32>
    %1046 = math.rsqrt %1045 : vector<2x1xf32>
    %1047 = vector.broadcast %1046 : vector<2x1xf32> to vector<2x32xf32>
    %1048 = arith.mulf %1043, %1047 : vector<2x32xf32>
    %1049 = vector.broadcast %988 : vector<1x32xf32> to vector<2x32xf32>
    %1050 = arith.mulf %1048, %1049 : vector<2x32xf32>
    %1051 = vector.broadcast %989 : vector<1x32xf32> to vector<2x32xf32>
    %1052 = arith.addf %1050, %1051 : vector<2x32xf32>
    %c2_451 = arith.constant 2 : index
    %1053 = memref.load %arg0[%c2_451] : memref<3xf32, #tpu.memory_space<smem>>
    %c2_452 = arith.constant 2 : index
    %c0_453 = arith.constant 0 : index
    %c0_454 = arith.constant 0 : index
    %1054 = vector.load %arg8[%c2_452, %c0_453, %c0_454] : memref<3x32x128xf32, #tpu.memory_space<vmem>>, vector<1x32x128xf32>
    %1055 = vector.shape_cast %1054 : vector<1x32x128xf32> to vector<32x128xf32>
    %cst_455 = arith.constant dense<0.000000e+00> : vector<2x128xf32>
    %1056 = tpu.matmul %1052, %1055, %cst_455 {dimension_numbers = #tpu.dot_dimension_numbers<[1], [0], [0], [1], [0, 0, 1, 1], [], []>} : vector<2x32xf32>, vector<32x128xf32>, vector<2x128xf32> -> vector<2x128xf32>
    %c2_456 = arith.constant 2 : index
    %c0_457 = arith.constant 0 : index
    %c0_458 = arith.constant 0 : index
    %1057 = vector.load %arg9[%c2_456, %c0_457, %c0_458] : memref<3x1x128xf32, #tpu.memory_space<vmem>>, vector<1x1x128xf32>
    %1058 = vector.shape_cast %1057 : vector<1x1x128xf32> to vector<1x128xf32>
    %1059 = vector.broadcast %1058 : vector<1x128xf32> to vector<2x128xf32>
    %1060 = arith.addf %1056, %1059 : vector<2x128xf32>
    %1061 = vector.broadcast %1053 : f32 to vector<2x128xf32>
    %1062 = arith.mulf %1061, %1060 : vector<2x128xf32>
    %1063 = arith.addf %469, %1062 : vector<2x128xf32>
    %c0_459 = arith.constant 0 : index
    %c0_460 = arith.constant 0 : index
    %1064 = vector.load %arg10[%c0_459, %c0_460] : memref<2x128xf32, #tpu.memory_space<vmem>>, vector<2x128xf32>
    tpu.vector_store %arg10[%c0_459, %c0_460], %1063 {strides = array<i32>} : memref<2x128xf32, #tpu.memory_space<vmem>>, vector<2x128xf32>,
    return
  }
}

</mosaic_0001>

<bundles_post_ra>
// kernel: ensemble_forward.1
= control target key start
LH: loop header
LB: loop body
LE: loop exit
PB: predicated region body
PF: predicated region fallthrough
CT: control target
= control target key end

     0   :  { %15 = vsyncpa [#allocation5], 0  ;;  %s6706_s0 = inlined_call_operand.vmem [shape: f32[3], index: 0, kind: input, shape index: {}]   ;;  %s6707_s1 = inlined_call_operand.hbm [shape: f32[2,16], index: 1, kind: input, shape index: {}]   ;;  %s6708_s2 = inlined_call_operand.hbm [shape: f32[3,16,32], index: 2, kind: input, shape index: {}]   ;;  %s6709_s3 = inlined_call_operand.hbm [shape: f32[3,1,32], index: 3, kind: input, shape index: {}]   ;;  %s6710_s4 = inlined_call_operand.hbm [shape: f32[3,8,32,32], index: 4, kind: input, shape index: {}]   ;;  %s6711_s5 = inlined_call_operand.hbm [shape: f32[3,8,32,32], index: 5, kind: input, shape index: {}]   ;;  %s6712_s6 = inlined_call_operand.hbm [shape: f32[3,8,32,32], index: 6, kind: input, shape index: {}]   ;;  %s6713_s7 = inlined_call_operand.hbm [shape: f32[3,8,8,32], index: 7, kind: input, shape index: {}]   ;;  %s6714_s8 = inlined_call_operand.hbm [shape: f32[3,32,128], index: 8, kind: input, shape index: {}]   ;;  %s6715_s9 = inlined_call_operand.vmem [shape: f32[3,1,128], index: 9, kind: input, shape index: {}]   ;;  %s6716_s10 = inlined_call_operand.hbm [shape: f32[2,128], index: 10, kind: output, shape index: {}]  }
   0x1   :  { %16 = vsyncpa [#allocation3], 0 }
   0x2   :  { %17 = vsyncpa [#allocation8], 0 }
   0x3   :  { %18 = vsyncpa [#allocation11], 0 }
   0x4   :  { %19 = vsyncpa [#allocation14], 0 }
   0x5   :  { %20 = vsyncpa [#allocation17], 0 }
   0x6   :  { %21 = vsyncpa [#allocation4], 0  ;;  %s5935_s13 = smov [#allocation7]  }
   0x7   :  { %s47_s14 = sshll.u32 %s5935_s13, 4  ;;  %s48_s14 = int_to_ptr.vmem [resolvable:$true] %s47_s14 }
   0x8   :  { %s5737_s15 = scalar_lea.vmem %s48_s14, 768  ;;  %p5742_p1 = scmp.lt.s32.totalorder %s48_s14, %s48_s14 }
   0x9   :  { %p5738_p0 = scmp.ne.s32.totalorder %s48_s14, %s5737_s15  ;;  %p5743_p2 = scmp.lt.s32.totalorder %s5737_s15, %s5737_s15 }
   0xb   :  { %p5744_p3 = por %p5743_p2, %p5742_p1 }
   0xd   :  { %p5745_p4 = pnand %p5744_p3, %p5738_p0 }
   0xf   :  { %5748 = shalt.err (!%p5745_p4)
}
  0x10   :  { %s5936_s16 = smov 128   ;;  %s5937_s17 = smov 8  }
  0x11   :  { %53 = dma.hbm_to_vmem [thread:$0]  %s6708_s2, 768, %s48_s14, [#allocation8], %s5936_s16, %s5936_s16, %s5937_s17  }
  0x12   :  { %s5938_s20 = smov [#allocation10]   ;;  %s5939_s22 = smov [#allocation13]  }
  0x13   :  { %s71_s21 = sshll.u32 %s5938_s20, 4  ;;  %s95_s23 = sshll.u32 %s5939_s22, 4  ;;  %s72_s21 = int_to_ptr.vmem [resolvable:$true] %s71_s21  ;;  %s96_s23 = int_to_ptr.vmem [resolvable:$true] %s95_s23 }
  0x14   :  { %s5757_s24 = scalar_lea.vmem %s72_s21, 12288  ;;  %p5762_p6 = scmp.lt.s32.totalorder %s72_s21, %s72_s21 }
  0x15   :  { %p5758_p5 = scmp.ne.s32.totalorder %s72_s21, %s5757_s24  ;;  %p5763_p7 = scmp.lt.s32.totalorder %s5757_s24, %s5757_s24 }
  0x17   :  { %p5764_p8 = por %p5763_p7, %p5762_p6 }
  0x19   :  { %p5765_p9 = pnand %p5764_p8, %p5758_p5 }
  0x1b   :  { %5768 = shalt.err (!%p5765_p9)
}
  0x1c   :  { %77 = dma.hbm_to_vmem [thread:$0]  %s6710_s4, 12288, %s72_s21, [#allocation11], %s5936_s16, %s5936_s16, %s5937_s17  }
  0x1d   :  { %s28_s28 = sshll.u32 %s6706_s0, 4  ;;  %s5777_s29 = scalar_lea.vmem %s96_s23, 12288  ;;  %s29_s28 = int_to_ptr.vmem [resolvable:$true] %s28_s28 }
  0x1e   :  { %p5778_p10 = scmp.ne.s32.totalorder %s96_s23, %s5777_s29  ;;  %p5782_p11 = scmp.lt.s32.totalorder %s96_s23, %s96_s23 }
  0x1f   :  { %p5783_p12 = scmp.lt.s32.totalorder %s5777_s29, %s5777_s29 }
  0x21   :  { %p5784_p13 = por %p5783_p12, %p5782_p11 }
  0x23   :  { %p5785_p0 = pnand %p5784_p13, %p5778_p10 }
  0x25   :  { %5788 = shalt.err (!%p5785_p0)
}
  0x26   :  { %101 = dma.hbm_to_vmem [thread:$0]  %s6712_s6, 12288, %s96_s23, [#allocation14], %s5936_s16, %s5936_s16, %s5937_s17  }
  0x27   :  { %s5789_s4 = scalar_lea.vmem %s29_s28, 16  ;;  %p5794_p2 = scmp.lt.s32.totalorder %s29_s28, %s29_s28 }
  0x28   :  { %p5790_p1 = scmp.ne.s32.totalorder %s29_s28, %s5789_s4  ;;  %p5795_p3 = scmp.lt.s32.totalorder %s5789_s4, %s5789_s4 }
  0x2a   :  { %p5796_p4 = por %p5795_p3, %p5794_p2 }
  0x2c   :  { %p5797_p5 = pnand %p5796_p4, %p5790_p1 }
  0x2e   :  { %5800 = shalt.err (!%p5797_p5)
}
  0x2f   :  { %s5940_s0 = smov [#allocation2]   ;;  %s5941_s12 = smov [#allocation6]  }
  0x30   :  { %31 = dma.vmem_to_smem %s29_s28, 16, %s5940_s0, [#allocation5]  }
  0x31   :  { %s38_s13 = sshll.u32 %s5941_s12, 4  ;;  %s5942_s14 = smov [#allocation9]   ;;  %s39_s13 = int_to_ptr.vmem [resolvable:$true] %s38_s13 }
  0x32   :  { %s59_s15 = sshll.u32 %s5942_s14, 4  ;;  %s5809_s18 = scalar_lea.vmem %s39_s13, 32  ;;  %s60_s15 = int_to_ptr.vmem [resolvable:$true] %s59_s15 }
  0x33   :  { %p5810_p6 = scmp.ne.s32.totalorder %s39_s13, %s5809_s18  ;;  %p5814_p7 = scmp.lt.s32.totalorder %s39_s13, %s39_s13 }
  0x34   :  { %p5815_p8 = scmp.lt.s32.totalorder %s5809_s18, %s5809_s18 }
  0x36   :  { %p5816_p9 = por %p5815_p8, %p5814_p7 }
  0x38   :  { %p5817_p10 = pnand %p5816_p9, %p5810_p6 }
  0x3a   :  { %5820 = shalt.err (!%p5817_p10)
}
  0x3b   :  { %41 = dma.hbm_to_vmem [thread:$0]  %s6707_s1, 32, %s39_s13, [#allocation3]  }
  0x3c   :  { %s5829_s20 = scalar_lea.vmem %s60_s15, 48  ;;  %s5833_s21 = scalar_lea.vmem %s60_s15, 64 }
  0x3d   :  { %p5830_p11 = scmp.ne.s32.totalorder %s60_s15, %s5829_s20  ;;  %p5834_p12 = scmp.lt.s32.totalorder %s60_s15, %s60_s15 }
  0x3e   :  { %p5835_p13 = scmp.lt.s32.totalorder %s5833_s21, %s5829_s20 }
  0x40   :  { %p5836_p0 = por %p5835_p13, %p5834_p12 }
  0x42   :  { %p5837_p1 = pnand %p5836_p0, %p5830_p11 }
  0x44   :  { %5840 = shalt.err (!%p5837_p1)
}
  0x45   :  { %s5943_s22 = smov 16   ;;  %s5944_s23 = smov 1  }
  0x46   :  { %65 = dma.hbm_to_vmem [thread:$0]  %s6709_s3, 48, %s60_s15, [#allocation8], %s5943_s22, %s5943_s22, %s5944_s23  }
  0x47   :  { %s5945_s26 = smov [#allocation12]   ;;  %s5946_s27 = smov [#allocation15]  }
  0x48   :  { %s83_s2 = sshll.u32 %s5945_s26, 4  ;;  %s107_s28 = sshll.u32 %s5946_s27, 4  ;;  %s84_s2 = int_to_ptr.vmem [resolvable:$true] %s83_s2  ;;  %s108_s28 = int_to_ptr.vmem [resolvable:$true] %s107_s28 }
  0x49   :  { %s5849_s1 = scalar_lea.vmem %s84_s2, 12288  ;;  %p5854_p3 = scmp.lt.s32.totalorder %s84_s2, %s84_s2 }
  0x4a   :  { %p5850_p2 = scmp.ne.s32.totalorder %s84_s2, %s5849_s1  ;;  %p5855_p4 = scmp.lt.s32.totalorder %s5849_s1, %s5849_s1 }
  0x4c   :  { %p5856_p5 = por %p5855_p4, %p5854_p3 }
  0x4e   :  { %p5857_p6 = pnand %p5856_p5, %p5850_p2 }
  0x50   :  { %5860 = shalt.err (!%p5857_p6)
}
  0x51   :  { %89 = dma.hbm_to_vmem [thread:$0]  %s6711_s5, 12288, %s84_s2, [#allocation11], %s5936_s16, %s5936_s16, %s5937_s17  }
  0x52   :  { %s5869_s3 = scalar_lea.vmem %s108_s28, 3072  ;;  %p5874_p8 = scmp.lt.s32.totalorder %s108_s28, %s108_s28 }
  0x53   :  { %p5870_p7 = scmp.ne.s32.totalorder %s108_s28, %s5869_s3  ;;  %p5875_p9 = scmp.lt.s32.totalorder %s5869_s3, %s5869_s3 }
  0x55   :  { %p5876_p10 = por %p5875_p9, %p5874_p8 }
  0x57   :  { %p5877_p11 = pnand %p5876_p10, %p5870_p7 }
  0x59   :  { %5880 = shalt.err (!%p5877_p11)
}
  0x5a   :  { %113 = dma.hbm_to_vmem [thread:$0]  %s6713_s7, 3072, %s108_s28, [#allocation14], %s5936_s16, %s5936_s16, %s5937_s17  }
  0x5b   :  { %s5947_s0 = smov [#allocation16]  }
  0x5c   :  { %s119_s12 = sshll.u32 %s5947_s0, 4  ;;  %s120_s12 = int_to_ptr.vmem [resolvable:$true] %s119_s12 }
  0x5d   :  { %s5889_s13 = scalar_lea.vmem %s120_s12, 1536  ;;  %p5894_p13 = scmp.lt.s32.totalorder %s120_s12, %s120_s12 }
  0x5e   :  { %p5890_p12 = scmp.ne.s32.totalorder %s120_s12, %s5889_s13  ;;  %p5895_p0 = scmp.lt.s32.totalorder %s5889_s13, %s5889_s13 }
  0x60   :  { %p5896_p1 = por %p5895_p0, %p5894_p13 }
  0x62   :  { %p5897_p2 = pnand %p5896_p1, %p5890_p12 }
  0x64   :  { %5900 = shalt.err (!%p5897_p2)
}
  0x65   :  { %125 = dma.hbm_to_vmem [thread:$0]  %s6714_s8, 1536, %s120_s12, [#allocation17], %s5936_s16, %s5936_s16, %s5937_s17  }
  0x66   :  { %5921 = dma.done.wait [#allocation5], 16  }
  0x67   :  { %5922 = vsyncadd [#allocation5], 4294967280 }
  0x68   :  { %5923 = dma.done.wait [#allocation3], 32  }
  0x69   :  { %5924 = vsyncadd [#allocation3], 4294967264 }
  0x6a   :  { %5925 = dma.done.wait [#allocation8], 816  }
  0x6b   :  { %5926 = vsyncadd [#allocation8], 4294966480 }
  0x6c   :  { %5927 = dma.done.wait [#allocation11], 24576  }
  0x6d   :  { %5928 = vsyncadd [#allocation11], 4294942720 }
  0x6e   :  { %5929 = dma.done.wait [#allocation14], 15360  }
  0x6f   :  { %5930 = vsyncadd [#allocation14], 4294951936 }
  0x70   :  { %5931 = dma.done.wait [#allocation17], 1536  }
  0x71   :  { %5932 = vsyncadd [#allocation17], 4294965760 }
  0x72   :  { %155 = sfence }
  0x73   :  { %v158_v0 = vld [vmem:[#allocation7 + $0x8] sm:$0xff]  ;;  %v5948_v1 = vmov 0.0   ;;  %v157_v2 = vld [vmem:[#allocation7] sm:$0xff]  ;;  %vm5949_vm0 = vmmov 0   ;;  %v6054_v4 = vld [vmem:[#allocation6] sm:$0x3]  ;;  %v245_v12 = vlaneseq }
  0x74   :  { %5140 = vmatprep.subr.mxu0 %v5948_v1  ;;  %5144 = vmatprep.mubr.msk.f32.mxu0 %vm5949_vm0, %v5948_v1  ;;  %v244_v3 = vld [vmem:[#allocation10 + $0x18] sm:$0xff]  ;;  %vm166_vm1 = vcmask 130048   ;;  %v243_v5 = vld [vmem:[#allocation10 + $0x10] sm:$0xff]  ;;  %v242_v6 = vld [vmem:[#allocation10 + $0x8] sm:$0xff]  ;;  %vm249_vm2 = vcmask 261120   ;;  %vm324_vm3 = vcmask 254976  }
  0x75   :  { %5141 = vmatpush3.msra.mxu0 %v158_v0  ;;  %5147 = vmatprep.subr.mxu1 %v5948_v1  ;;  %v241_v7 = vld [vmem:[#allocation10] sm:$0xff]  ;;  %v4848_v8 = vld [vmem:[#allocation9] ss:$0 sm:$0xff]  ;;  %v6072_v13 = vshrl.u32 %v245_v12, 7  ;;  %v351_v28 = vld [vmem:[#allocation12 + $0x10] sm:$0xff]  ;;  %s833_s7 = sld [smem:[#allocation2]] }
  0x76   :  { %5142 = vmatprep.subr.mxu0 %v5948_v1  ;;  %5148 = vmatpush3.msra.mxu1 %v244_v3  ;;  %v6077_v15 = vld [vmem:[#allocation15] sm:$0xff]  ;;  %v352_v27 = vld [vmem:[#allocation12 + $0x18] sm:$0xff]  ;;  %v350_v29 = vld [vmem:[#allocation12 + $0x8] sm:$0xff]  ;;  %s4872_s8 = sld [smem:[#allocation2 + $0x1]]  ;;  %s5950_s21 = smov [#allocation18]  }
  0x77   :  { %5143 = vmatpush3.msra.mxu0 %v157_v2  ;;  %5149 = vmatprep.subr.mxu1 %v5948_v1  ;;  %v6075_v14 = vsub.s32 0, %v6072_v13  ;;  %v349_v30 = vld [vmem:[#allocation12] sm:$0xff]  ;;  %v434_v31 = vld [vmem:[#allocation13 + $0x18] sm:$0xff]  ;;  %v6089_v35 = vsub.s32 1, %v6072_v13  ;;  %v6092_v36 = vsub.s32 2, %v6072_v13  ;;  %v433_v43 = vld [vmem:[#allocation13 + $0x10] sm:$0xff] }
  0x78   :  { %5145 = vmatmul.mubr.msk.f32.vlgmr.msra.gmra.mxu0 %vm166_vm1, %v6054_v4  ;;  %5150 = vmatpush3.msra.mxu1 %v243_v5  ;;  %v432_v44 = vld [vmem:[#allocation13 + $0x8] sm:$0xff]  ;;  %v431_v45 = vld [vmem:[#allocation13] sm:$0xff]  ;;  %v6105_v46 = vsub.s32 3, %v6072_v13  ;;  %v6113_v52 = vsub.s32 4, %v6072_v13  ;;  %v542_v0 = vld [vmem:[#allocation10 + $0x38] sm:$0xff]  ;;  %s4902_s6 = sld [smem:[#allocation2 + $0x2]] }
  0x79   :  { %5151 = vmatprep.subr.mxu1 %v5948_v1  ;;  %5155 = vmatprep.mubr.msk.f32.mxu1 %vm5949_vm0, %v5948_v1  ;;  %v248_v16 = vrot.slane %v6077_v15, %v6075_v14  ;;  %v342_v37 = vrot.slane %v6077_v15, %v6089_v35  ;;  %v347_v40 = vrot.slane %v6077_v15, %v6092_v36  ;;  %v541_v2 = vld [vmem:[#allocation10 + $0x30] sm:$0xff]  ;;  %v540_v3 = vld [vmem:[#allocation10 + $0x28] sm:$0xff]  ;;  %v539_v5 = vld [vmem:[#allocation10 + $0x20] sm:$0xff]  ;;  %s4834_s22 = sshll.u32 %s5950_s21, 4  ;;  %s4835_s22 = int_to_ptr.vmem [resolvable:$true] %s4834_s22 }
  0x7a   :  { %5158 = vmatprep.subr.mxu0 %v5948_v1  ;;  %5166 = vmatprep.mubr.msk.f32.mxu0 %vm5949_vm0, %v5948_v1  ;;  %v356_v47 = vrot.slane %v6077_v15, %v6105_v46  ;;  %v438_v53 = vrot.slane %v6077_v15, %v6113_v52  ;;  %s5901_s23 = scalar_lea.vmem %s4835_s22, 32  ;;  %p5906_p4 = scmp.lt.s32.totalorder %s4835_s22, %s4835_s22 }
  0x7b   :  { %5152 = vmatpush3.msra.mxu1 %v242_v6  ;;  %5159 = vmatpush3.msra.mxu0 %v352_v27  ;;  %p5902_p3 = scmp.ne.s32.totalorder %s4835_s22, %s5901_s23  ;;  %p5907_p5 = scmp.lt.s32.totalorder %s5901_s23, %s5901_s23 }
  0x7c   :  { %5153 = vmatprep.subr.mxu1 %v5948_v1  ;;  %5160 = vmatprep.subr.mxu0 %v5948_v1 }
  0x7d   :  { %5154 = vmatpush3.msra.mxu1 %v241_v7  ;;  %5161 = vmatpush3.msra.mxu0 %v351_v28  ;;  %p5908_p6 = por %p5907_p5, %p5906_p4 }
  0x7e   :  { %5169 = vmatprep.subr.mxu1 %v5948_v1  ;;  %5162 = vmatprep.subr.mxu0 %v5948_v1 }
  0x7f   :  { %5163 = vmatpush3.msra.mxu0 %v350_v29  ;;  %p5909_p7 = pnand %p5908_p6, %p5902_p3 }
  0x80   :  { %5164 = vmatprep.subr.mxu0 %v5948_v1 }
  0x81   :  { %5165 = vmatpush3.msra.mxu0 %v349_v30  ;;  %v648_v30 = vld [vmem:[#allocation12 + $0x38] sm:$0xff] }
  0x82   :  { %5180 = vmatprep.subr.mxu0 %v5948_v1 }
 0x138   :  { %v236_v9 = vpop.f32.mrf.mxu0 }
 0x139   :  { %v237_v10 = vadd.f32 %v4848_v8, %v236_v9  ;;  %v6124_v9 = vsub.s32 5, %v6072_v13 }
 0x13a   :  { %v5146_v11 = vpop.f32.mrf.mxu0 }
 0x13b   :  { %5156 = vmatmul.mubr.msk.f32.vlgmr.msra.gmra.mxu1 %vm249_vm2, %v237_v10  ;;  %v529_v11 = vrot.slane %v6077_v15, %v6124_v9 }
 0x13c   :  { %5177 = vmatprep.mubr.msk.f32.mxu1 %vm5949_vm0, %v5948_v1  ;;  %5170 = vmatpush3.msra.mxu1 %v434_v31  ;;  %v647_v31 = vld [vmem:[#allocation12 + $0x30] sm:$0xff] }
 0x13d   :  { %5171 = vmatprep.subr.mxu1 %v5948_v1 }
 0x13e   :  { %5172 = vmatpush3.msra.mxu1 %v433_v43 }
 0x13f   :  { %5173 = vmatprep.subr.mxu1 %v5948_v1 }
 0x140   :  { %5174 = vmatpush3.msra.mxu1 %v432_v44 }
 0x141   :  { %5175 = vmatprep.subr.mxu1 %v5948_v1 }
 0x142   :  { %5176 = vmatpush3.msra.mxu1 %v431_v45 }
 0x143   :  { %5191 = vmatprep.subr.mxu1 %v5948_v1 }
 0x1fb   :  { %v319_v17 = vpop.f32.mrf.mxu1 }
 0x1fc   :  { %v320_v18 = vadd.f32 %v319_v17, %v248_v16 }
 0x1fd   :  { %v5157_v19 = vpop.f32.mrf.mxu1 }
 0x1fe   :  { %v323_v20 = vadd.f32 %v320_v18, %v237_v10  ;;  %v6127_v10 = vsub.s32 6, %v6072_v13 }
 0x200   :  { %v325_v21 = vsel %vm324_vm3, %v323_v20, 0.0  ;;  %v534_v17 = vrot.slane %v6077_v15, %v6127_v10 }
 0x201   :  { %326 = vadd.xlane.f32.xlu0 %v325_v21 }
 0x28a   :  { %v327_v22 = vpop.xlane.xlu0 %326 }
 0x28b   :  { %v329_v23 = vmul.f32 0.03125, %v327_v22 }
 0x28d   :  { %v330_v24 = vsub.f32 %v323_v20, %v329_v23  ;;  %v6136_v20 = vld [vmem:[#allocation15 + $0x8] sm:$0xff] }
 0x28e   :  { %v546_v13 = vrot.slane %v6136_v20, %v6075_v14  ;;  %v642_v44 = vrot.slane %v6136_v20, %v6092_v36 }
 0x28f   :  { %v331_v25 = vmul.f32 %v330_v24, %v330_v24 }
 0x291   :  { %v332_v26 = vsel %vm324_vm3, %v331_v25, 0.0 }
 0x292   :  { %333 = vadd.xlane.f32.xlu0 %v332_v26 }
 0x31b   :  { %v334_v32 = vpop.xlane.xlu0 %333 }
 0x31c   :  { %v335_v33 = vmul.f32 0.03125, %v334_v32  ;;  %v646_v32 = vld [vmem:[#allocation12 + $0x28] sm:$0xff] }
 0x31e   :  { %v336_v34 = vadd.f32 1e-05, %v335_v33  ;;  %v645_v33 = vld [vmem:[#allocation12 + $0x20] sm:$0xff] }
 0x320   :  { %5672 = vrsqrt.f32 %v336_v34  ;;  %v731_v34 = vld [vmem:[#allocation13 + $0x38] sm:$0xff] }
 0x32d   :  { %v5673_v38 = vpop.eup %5672 }
 0x32e   :  { %v338_v39 = vmul.f32 %v5673_v38, %v330_v24 }
 0x330   :  { %v343_v41 = vmul.f32 %v342_v37, %v338_v39  ;;  %v730_v37 = vld [vmem:[#allocation13 + $0x30] sm:$0xff] }
 0x332   :  { %v348_v42 = vadd.f32 %v347_v40, %v343_v41  ;;  %v637_v41 = vrot.slane %v6136_v20, %v6089_v35 }
 0x334   :  { %5167 = vmatmul.mubr.msk.f32.vlgmr.msra.gmra.mxu0 %vm249_vm2, %v348_v42 }
 0x335   :  { %5188 = vmatprep.mubr.msk.f32.mxu0 %vm5949_vm0, %v5948_v1  ;;  %5181 = vmatpush3.msra.mxu0 %v542_v0 }
 0x336   :  { %5182 = vmatprep.subr.mxu0 %v5948_v1 }
 0x337   :  { %5183 = vmatpush3.msra.mxu0 %v541_v2  ;;  %v4858_v2 = vld [vmem:[#allocation9 + $0x1] ss:$0 sm:$0xff] }
 0x338   :  { %5184 = vmatprep.subr.mxu0 %v5948_v1 }
 0x339   :  { %5185 = vmatpush3.msra.mxu0 %v540_v3 }
 0x33a   :  { %5186 = vmatprep.subr.mxu0 %v5948_v1 }
 0x33b   :  { %5187 = vmatpush3.msra.mxu0 %v539_v5 }
 0x33c   :  { %5202 = vmatprep.subr.mxu0 %v5948_v1 }
 0x3f4   :  { %v426_v48 = vpop.f32.mrf.mxu0 }
 0x3f5   :  { %v427_v49 = vadd.f32 %v426_v48, %v356_v47  ;;  %v729_v48 = vld [vmem:[#allocation13 + $0x28] sm:$0xff] }
 0x3f6   :  { %v5168_v50 = vpop.f32.mrf.mxu0 }
 0x3f7   :  { %v430_v51 = vmax.f32 %v427_v49, 0.0  ;;  %v728_v49 = vld [vmem:[#allocation13 + $0x20] sm:$0xff]  ;;  %v652_v50 = vrot.slane %v6136_v20, %v6105_v46 }
 0x3f9   :  { %5178 = vmatmul.mubr.msk.f32.vlgmr.msra.gmra.mxu1 %vm249_vm2, %v430_v51 }
 0x3fa   :  { %5199 = vmatprep.mubr.msk.f32.mxu1 %vm5949_vm0, %v5948_v1  ;;  %5192 = vmatpush3.msra.mxu1 %v648_v30 }
 0x3fb   :  { %5193 = vmatprep.subr.mxu1 %v5948_v1 }
 0x3fc   :  { %5194 = vmatpush3.msra.mxu1 %v647_v31 }
 0x3fd   :  { %5195 = vmatprep.subr.mxu1 %v5948_v1 }
 0x3fe   :  { %5196 = vmatpush3.msra.mxu1 %v646_v32  ;;  %v826_v32 = vrot.slane %v6136_v20, %v6124_v9 }
 0x3ff   :  { %5197 = vmatprep.subr.mxu1 %v5948_v1 }
 0x400   :  { %5198 = vmatpush3.msra.mxu1 %v645_v33 }
 0x401   :  { %5213 = vmatprep.subr.mxu1 %v5948_v1 }
 0x4b9   :  { %v508_v54 = vpop.f32.mrf.mxu1 }
 0x4ba   :  { %v509_v55 = vadd.f32 %v508_v54, %v438_v53 }
 0x4bb   :  { %v5179_v56 = vpop.f32.mrf.mxu1 }
 0x4bc   :  { %v512_v57 = vadd.f32 %v509_v55, %v348_v42  ;;  %v923_v56 = vld [vmem:[#allocation7 + $0x18] sm:$0xff] }
 0x4be   :  { %v513_v58 = vsel %vm324_vm3, %v512_v57, 0.0 }
 0x4bf   :  { %514 = vadd.xlane.f32.xlu1 %v513_v58  ;;  %v1008_v58 = vld [vmem:[#allocation10 + $0x118] sm:$0xff] }
 0x548   :  { %v515_v59 = vpop.xlane.xlu1 %514 }
 0x549   :  { %v516_v60 = vmul.f32 0.03125, %v515_v59  ;;  %v1007_v59 = vld [vmem:[#allocation10 + $0x110] sm:$0xff] }
 0x54b   :  { %v517_v61 = vsub.f32 %v512_v57, %v516_v60  ;;  %v922_v57 = vld [vmem:[#allocation7 + $0x10] sm:$0xff]  ;;  %v1006_v60 = vld [vmem:[#allocation10 + $0x108] sm:$0xff] }
 0x54d   :  { %v518_v62 = vmul.f32 %v517_v61, %v517_v61 }
 0x54f   :  { %v519_v63 = vsel %vm324_vm3, %v518_v62, 0.0 }
 0x550   :  { %520 = vadd.xlane.f32.xlu1 %v519_v63 }
 0x5d9   :  { %v521_v6 = vpop.xlane.xlu1 %520 }
 0x5da   :  { %v522_v7 = vmul.f32 0.03125, %v521_v6 }
 0x5dc   :  { %v523_v8 = vadd.f32 1e-05, %v522_v7 }
 0x5de   :  { %5674 = vrsqrt.f32 %v523_v8 }
 0x5eb   :  { %v5675_v12 = vpop.eup %5674 }
 0x5ec   :  { %v525_v16 = vmul.f32 %v5675_v12, %v517_v61  ;;  %v1005_v61 = vld [vmem:[#allocation10 + $0x100] sm:$0xff] }
 0x5ee   :  { %v530_v18 = vmul.f32 %v529_v11, %v525_v16 }
 0x5f0   :  { %v535_v19 = vadd.f32 %v534_v17, %v530_v18 }
 0x5f2   :  { %5189 = vmatmul.mubr.msk.f32.vlgmr.msra.gmra.mxu0 %vm249_vm2, %v535_v19 }
 0x5f3   :  { %5210 = vmatprep.mubr.msk.f32.mxu0 %vm5949_vm0, %v5948_v1  ;;  %5203 = vmatpush3.msra.mxu0 %v731_v34 }
 0x5f4   :  { %5204 = vmatprep.subr.mxu0 %v5948_v1 }
 0x5f5   :  { %5205 = vmatpush3.msra.mxu0 %v730_v37  ;;  %v831_v37 = vrot.slane %v6136_v20, %v6127_v10 }
 0x5f6   :  { %5206 = vmatprep.subr.mxu0 %v5948_v1 }
 0x5f7   :  { %5207 = vmatpush3.msra.mxu0 %v729_v48  ;;  %v1111_v48 = vld [vmem:[#allocation12 + $0x100] sm:$0xff] }
 0x5f8   :  { %5208 = vmatprep.subr.mxu0 %v5948_v1 }
 0x5f9   :  { %5209 = vmatpush3.msra.mxu0 %v728_v49  ;;  %v1197_v49 = vld [vmem:[#allocation13 + $0x118] sm:$0xff] }
 0x5fa   :  { %5224 = vmatprep.subr.mxu0 %v5948_v1 }
 0x6b2   :  { %v616_v21 = vpop.f32.mrf.mxu0 }
 0x6b3   :  { %v617_v22 = vadd.f32 %v616_v21, %v546_v13  ;;  %v836_v13 = vld [vmem:[#allocation16 + $0x10] sm:$0xff]  ;;  %v835_v21 = vld [vmem:[#allocation16 + $0x8] sm:$0xff] }
 0x6b4   :  { %v5190_v23 = vpop.f32.mrf.mxu0 }
 0x6b5   :  { %v620_v24 = vadd.f32 %v617_v22, %v535_v19  ;;  %v837_v19 = vld [vmem:[#allocation16 + $0x18] sm:$0xff]  ;;  %v834_v22 = vld [vmem:[#allocation16] sm:$0xff] }
 0x6b6   :  { %v6183_v23 = vld [vmem:[#allocation15 + $0x40] sm:$0xff] }
 0x6b7   :  { %v621_v25 = vsel %vm324_vm3, %v620_v24, 0.0 }
 0x6b8   :  { %622 = vadd.xlane.f32.xlu0 %v621_v25 }
 0x741   :  { %v623_v15 = vpop.xlane.xlu0 %622 }
 0x742   :  { %v624_v26 = vmul.f32 0.03125, %v623_v15 }
 0x744   :  { %v625_v27 = vsub.f32 %v620_v24, %v624_v26  ;;  %v1012_v24 = vrot.slane %v6183_v23, %v6075_v14 }
 0x746   :  { %v626_v28 = vmul.f32 %v625_v27, %v625_v27 }
 0x748   :  { %v627_v29 = vsel %vm324_vm3, %v626_v28, 0.0 }
 0x749   :  { %628 = vadd.xlane.f32.xlu1 %v627_v29 }
 0x7d2   :  { %v629_v38 = vpop.xlane.xlu1 %628 }
 0x7d3   :  { %v630_v39 = vmul.f32 0.03125, %v629_v38 }
 0x7d5   :  { %v631_v40 = vadd.f32 1e-05, %v630_v39 }
 0x7d7   :  { %5676 = vrsqrt.f32 %v631_v40 }
 0x7e4   :  { %v5677_v42 = vpop.eup %5676 }
 0x7e5   :  { %v633_v43 = vmul.f32 %v5677_v42, %v625_v27 }
 0x7e7   :  { %v638_v45 = vmul.f32 %v637_v41, %v633_v43 }
 0x7e9   :  { %v643_v47 = vadd.f32 %v642_v44, %v638_v45  ;;  %v1114_v45 = vld [vmem:[#allocation12 + $0x118] sm:$0xff] }
 0x7eb   :  { %5200 = vmatmul.mubr.msk.f32.vlgmr.msra.gmra.mxu1 %vm249_vm2, %v643_v47 }
 0x7ec   :  { %5221 = vmatprep.mubr.msk.f32.mxu1 %vm5949_vm0, %v5948_v1  ;;  %5214 = vmatpush3.msra.mxu1 %v837_v19 }
 0x7ed   :  { %5215 = vmatprep.subr.mxu1 %v5948_v1 }
 0x7ee   :  { %5216 = vmatpush3.msra.mxu1 %v836_v13 }
 0x7ef   :  { %5217 = vmatprep.subr.mxu1 %v5948_v1 }
 0x7f0   :  { %5218 = vmatpush3.msra.mxu1 %v835_v21 }
 0x7f1   :  { %5219 = vmatprep.subr.mxu1 %v5948_v1 }
 0x7f2   :  { %5220 = vmatpush3.msra.mxu1 %v834_v22 }
 0x7f3   :  { %5242 = vmatprep.subr.mxu1 %v5948_v1 }
 0x8ab   :  { %v722_v51 = vpop.f32.mrf.mxu1 }
 0x8ac   :  { %v723_v53 = vadd.f32 %v722_v51, %v652_v50 }
 0x8ad   :  { %v5201_v54 = vpop.f32.mrf.mxu1 }
 0x8ae   :  { %v726_v55 = vmax.f32 %v723_v53, 0.0  ;;  %v1103_v54 = vrot.slane %v6183_v23, %v6089_v35 }
 0x8b0   :  { %5211 = vmatmul.mubr.msk.f32.vlgmr.msra.gmra.mxu0 %vm249_vm2, %v726_v55 }
 0x8b1   :  { %5225 = vmatpush3.msra.mxu0 %v923_v56  ;;  %5228 = vmatprep.mubr.msk.f32.mxu0 %vm5949_vm0, %v5948_v1 }
 0x8b2   :  { %5226 = vmatprep.subr.mxu0 %v5948_v1 }
 0x8b3   :  { %5227 = vmatpush3.msra.mxu0 %v922_v57 }
 0x8b4   :  { %5229 = vmatmul.mubr.msk.f32.vlgmr.msra.gmra.mxu0 %vm166_vm1, %v6054_v4  ;;  %5231 = vmatprep.subr.mxu0 %v5948_v1  ;;  %v735_v4 = vrot.slane %v6136_v20, %v6113_v52  ;;  %v1112_v20 = vld [vmem:[#allocation12 + $0x108] sm:$0xff] }
 0x8b5   :  { %5239 = vmatprep.mubr.msk.f32.mxu0 %vm5949_vm0, %v5948_v1  ;;  %5232 = vmatpush3.msra.mxu0 %v1008_v58  ;;  %v1108_v58 = vrot.slane %v6183_v23, %v6092_v36 }
 0x8b6   :  { %5233 = vmatprep.subr.mxu0 %v5948_v1 }
 0x8b7   :  { %5234 = vmatpush3.msra.mxu0 %v1007_v59 }
 0x8b8   :  { %5235 = vmatprep.subr.mxu0 %v5948_v1 }
 0x8b9   :  { %5236 = vmatpush3.msra.mxu0 %v1006_v60 }
 0x8ba   :  { %5237 = vmatprep.subr.mxu0 %v5948_v1 }
 0x8bb   :  { %5238 = vmatpush3.msra.mxu0 %v1005_v61 }
 0x8bc   :  { %5253 = vmatprep.subr.mxu0 %v5948_v1 }
 0x970   :  { %v805_v62 = vpop.f32.mrf.mxu0 }
 0x971   :  { %v806_v63 = vadd.f32 %v805_v62, %v735_v4  ;;  %v1196_v4 = vld [vmem:[#allocation13 + $0x110] sm:$0xff]  ;;  %v1195_v62 = vld [vmem:[#allocation13 + $0x108] sm:$0xff] }
 0x972   :  { %v5212_v0 = vpop.f32.mrf.mxu0 }
 0x973   :  { %v809_v3 = vadd.f32 %v806_v63, %v643_v47  ;;  %v1113_v47 = vld [vmem:[#allocation12 + $0x110] sm:$0xff]  ;;  %v1194_v63 = vld [vmem:[#allocation13 + $0x100] sm:$0xff]  ;;  %v1118_v0 = vrot.slane %v6183_v23, %v6105_v46 }
 0x974   :  { %v998_v5 = vpop.f32.mrf.mxu0 }
 0x975   :  { %v999_v6 = vadd.f32 %v4858_v2, %v998_v5  ;;  %v810_v7 = vsel %vm324_vm3, %v809_v3, 0.0 }
 0x976   :  { %811 = vadd.xlane.f32.xlu0 %v810_v7  ;;  %v5230_v8 = vpop.f32.mrf.mxu0  ;;  %v1201_v7 = vrot.slane %v6183_v23, %v6113_v52 }
 0x977   :  { %5240 = vmatmul.mubr.msk.f32.vlgmr.msra.gmra.mxu0 %vm249_vm2, %v999_v6 }
 0x978   :  { %5261 = vmatprep.mubr.msk.f32.mxu0 %vm5949_vm0, %v5948_v1  ;;  %5254 = vmatpush3.msra.mxu0 %v1197_v49  ;;  %v1411_v49 = vld [vmem:[#allocation12 + $0x138] sm:$0xff] }
 0x979   :  { %5255 = vmatprep.subr.mxu0 %v5948_v1 }
 0x97a   :  { %5256 = vmatpush3.msra.mxu0 %v1196_v4 }
 0x97b   :  { %5257 = vmatprep.subr.mxu0 %v5948_v1 }
 0x97c   :  { %5258 = vmatpush3.msra.mxu0 %v1195_v62 }
 0x97d   :  { %5259 = vmatprep.subr.mxu0 %v5948_v1 }
 0x97e   :  { %5260 = vmatpush3.msra.mxu0 %v1194_v63 }
 0x97f   :  { %5275 = vmatprep.subr.mxu0 %v5948_v1 }
 0x9ff   :  { %v812_v11 = vpop.xlane.xlu0 %811 }
 0xa00   :  { %v813_v12 = vmul.f32 0.03125, %v812_v11 }
 0xa02   :  { %v814_v16 = vsub.f32 %v809_v3, %v813_v12 }
 0xa04   :  { %v815_v17 = vmul.f32 %v814_v16, %v814_v16 }
 0xa06   :  { %v816_v18 = vsel %vm324_vm3, %v815_v17, 0.0 }
 0xa07   :  { %817 = vadd.xlane.f32.xlu0 %v816_v18 }
 0xa37   :  { %v1082_v25 = vpop.f32.mrf.mxu0 }
 0xa38   :  { %v1083_v15 = vadd.f32 %v1082_v25, %v1012_v24  ;;  %v1305_v24 = vld [vmem:[#allocation10 + $0x138] sm:$0xff]  ;;  %v1304_v25 = vld [vmem:[#allocation10 + $0x130] sm:$0xff] }
 0xa39   :  { %v5241_v26 = vpop.f32.mrf.mxu0 }
 0xa3a   :  { %v1086_v27 = vadd.f32 %v1083_v15, %v999_v6  ;;  %v1303_v15 = vld [vmem:[#allocation10 + $0x128] sm:$0xff]  ;;  %v1302_v26 = vld [vmem:[#allocation10 + $0x120] sm:$0xff] }
 0xa3c   :  { %v1087_v28 = vsel %vm324_vm3, %v1086_v27, 0.0 }
 0xa3d   :  { %1088 = vadd.xlane.f32.xlu1 %v1087_v28 }
 0xa90   :  { %v818_v29 = vpop.xlane.xlu0 %817 }
 0xa91   :  { %v819_v30 = vmul.f32 0.03125, %v818_v29 }
 0xa93   :  { %v820_v31 = vadd.f32 1e-05, %v819_v30  ;;  %v1292_v30 = vrot.slane %v6183_v23, %v6124_v9 }
 0xa95   :  { %5678 = vrsqrt.f32 %v820_v31 }
 0xaa2   :  { %v5679_v33 = vpop.eup %5678 }
 0xaa3   :  { %v822_v34 = vmul.f32 %v5679_v33, %v814_v16  ;;  %v1297_v33 = vrot.slane %v6183_v23, %v6127_v10 }
 0xaa5   :  { %v827_v38 = vmul.f32 %v826_v32, %v822_v34 }
 0xaa7   :  { %v832_v39 = vadd.f32 %v831_v37, %v827_v38  ;;  %v6233_v38 = vld [vmem:[#allocation15 + $0x48] sm:$0xff] }
 0xaa8   :  { %v1405_v4 = vrot.slane %v6233_v38, %v6092_v36 }
 0xaa9   :  { %5222 = vmatmul.mubr.msk.f32.vlgmr.msra.gmra.mxu1 %vm249_vm2, %v832_v39  ;;  %v1309_v39 = vrot.slane %v6233_v38, %v6075_v14 }
 0xaaa   :  { %5250 = vmatprep.mubr.msk.f32.mxu1 %vm5949_vm0, %v5948_v1  ;;  %5243 = vmatpush3.msra.mxu1 %v1114_v45 }
 0xaab   :  { %5244 = vmatprep.subr.mxu1 %v5948_v1 }
 0xaac   :  { %5245 = vmatpush3.msra.mxu1 %v1113_v47 }
 0xaad   :  { %5246 = vmatprep.subr.mxu1 %v5948_v1 }
 0xaae   :  { %5247 = vmatpush3.msra.mxu1 %v1112_v20 }
 0xaaf   :  { %5248 = vmatprep.subr.mxu1 %v5948_v1 }
 0xab0   :  { %5249 = vmatpush3.msra.mxu1 %v1111_v48 }
 0xab1   :  { %5264 = vmatprep.subr.mxu1 %v5948_v1 }
 0xac6   :  { %v1089_v40 = vpop.xlane.xlu1 %1088 }
 0xac7   :  { %v1090_v41 = vmul.f32 0.03125, %v1089_v40 }
 0xac9   :  { %v1091_v42 = vsub.f32 %v1086_v27, %v1090_v41 }
 0xacb   :  { %v1092_v43 = vmul.f32 %v1091_v42, %v1091_v42 }
 0xacd   :  { %v1093_v44 = vsel %vm324_vm3, %v1092_v43, 0.0 }
 0xace   :  { %1094 = vadd.xlane.f32.xlu1 %v1093_v44 }
 0xb57   :  { %v1095_v50 = vpop.xlane.xlu1 %1094 }
 0xb58   :  { %v1096_v51 = vmul.f32 0.03125, %v1095_v50  ;;  %v1410_v50 = vld [vmem:[#allocation12 + $0x130] sm:$0xff] }
 0xb5a   :  { %v1097_v53 = vadd.f32 1e-05, %v1096_v51  ;;  %v1409_v51 = vld [vmem:[#allocation12 + $0x128] sm:$0xff] }
 0xb5c   :  { %5680 = vrsqrt.f32 %v1097_v53  ;;  %v1408_v53 = vld [vmem:[#allocation12 + $0x120] sm:$0xff] }
 0xb69   :  { %v5681_v55 = vpop.eup %5680  ;;  %v6203_v56 = vpop.f32.mrf.mxu1 }
 0xb6a   :  { %v1099_v57 = vmul.f32 %v5681_v55, %v1091_v42 }
 0xb6b   :  { %v5223_v59 = vpop.f32.mrf.mxu1 }
 0xb6c   :  { %v1104_v60 = vmul.f32 %v1103_v54, %v1099_v57  ;;  %v1494_v54 = vld [vmem:[#allocation13 + $0x138] sm:$0xff]  ;;  %v1400_v59 = vrot.slane %v6233_v38, %v6089_v35 }
 0xb6e   :  { %v1109_v61 = vadd.f32 %v1108_v58, %v1104_v60 }
 0xb70   :  { %5251 = vmatmul.mubr.msk.f32.vlgmr.msra.gmra.mxu1 %vm249_vm2, %v1109_v61 }
 0xb71   :  { %5272 = vmatprep.mubr.msk.f32.mxu1 %vm5949_vm0, %v5948_v1  ;;  %5265 = vmatpush3.msra.mxu1 %v1305_v24 }
 0xb72   :  { %5266 = vmatprep.subr.mxu1 %v5948_v1 }
 0xb73   :  { %5267 = vmatpush3.msra.mxu1 %v1304_v25 }
 0xb74   :  { %5268 = vmatprep.subr.mxu1 %v5948_v1 }
 0xb75   :  { %5269 = vmatpush3.msra.mxu1 %v1303_v15 }
 0xb76   :  { %5270 = vmatprep.subr.mxu1 %v5948_v1 }
 0xb77   :  { %5271 = vmatpush3.msra.mxu1 %v1302_v26  ;;  %v1602_v26 = vld [vmem:[#allocation10 + $0x158] sm:$0xff] }
 0xb78   :  { %5286 = vmatprep.subr.mxu1 %v5948_v1 }
 0xc30   :  { %v1188_v2 = vpop.f32.mrf.mxu1 }
 0xc31   :  { %v1189_v3 = vadd.f32 %v1188_v2, %v1118_v0  ;;  %v1493_v0 = vld [vmem:[#allocation13 + $0x130] sm:$0xff]  ;;  %v1492_v2 = vld [vmem:[#allocation13 + $0x128] sm:$0xff] }
 0xc32   :  { %v5252_v5 = vpop.f32.mrf.mxu1 }
 0xc33   :  { %v1192_v6 = vmax.f32 %v1189_v3, 0.0  ;;  %v1491_v3 = vld [vmem:[#allocation13 + $0x120] sm:$0xff]  ;;  %v1415_v5 = vrot.slane %v6233_v38, %v6105_v46 }
 0xc35   :  { %5262 = vmatmul.mubr.msk.f32.vlgmr.msra.gmra.mxu0 %vm249_vm2, %v1192_v6 }
 0xc36   :  { %5283 = vmatprep.mubr.msk.f32.mxu0 %vm5949_vm0, %v5948_v1  ;;  %5276 = vmatpush3.msra.mxu0 %v1411_v49 }
 0xc37   :  { %5277 = vmatprep.subr.mxu0 %v5948_v1 }
 0xc38   :  { %5278 = vmatpush3.msra.mxu0 %v1410_v50 }
 0xc39   :  { %5279 = vmatprep.subr.mxu0 %v5948_v1 }
 0xc3a   :  { %5280 = vmatpush3.msra.mxu0 %v1409_v51 }
 0xc3b   :  { %5281 = vmatprep.subr.mxu0 %v5948_v1 }
 0xc3c   :  { %5282 = vmatpush3.msra.mxu0 %v1408_v53  ;;  %v1708_v53 = vld [vmem:[#allocation12 + $0x158] sm:$0xff] }
 0xc3d   :  { %5297 = vmatprep.subr.mxu0 %v5948_v1 }
 0xcf5   :  { %v1271_v8 = vpop.f32.mrf.mxu0 }
 0xcf6   :  { %v1272_v11 = vadd.f32 %v1271_v8, %v1201_v7 }
 0xcf7   :  { %v5263_v12 = vpop.f32.mrf.mxu0 }
 0xcf8   :  { %v1275_v16 = vadd.f32 %v1272_v11, %v1109_v61  ;;  %v1498_v12 = vrot.slane %v6233_v38, %v6113_v52 }
 0xcfa   :  { %v1276_v17 = vsel %vm324_vm3, %v1275_v16, 0.0 }
 0xcfb   :  { %1277 = vadd.xlane.f32.xlu0 %v1276_v17 }
 0xd84   :  { %v1278_v18 = vpop.xlane.xlu0 %1277 }
 0xd85   :  { %v1279_v19 = vmul.f32 0.03125, %v1278_v18 }
 0xd87   :  { %v1280_v13 = vsub.f32 %v1275_v16, %v1279_v19 }
 0xd89   :  { %v1281_v21 = vmul.f32 %v1280_v13, %v1280_v13 }
 0xd8b   :  { %v1282_v22 = vsel %vm324_vm3, %v1281_v21, 0.0 }
 0xd8c   :  { %1283 = vadd.xlane.f32.xlu1 %v1282_v22 }
 0xe15   :  { %v1284_v27 = vpop.xlane.xlu1 %1283 }
 0xe16   :  { %v1285_v28 = vmul.f32 0.03125, %v1284_v27  ;;  %v1601_v27 = vld [vmem:[#allocation10 + $0x150] sm:$0xff] }
 0xe18   :  { %v1286_v29 = vadd.f32 1e-05, %v1285_v28  ;;  %v1600_v28 = vld [vmem:[#allocation10 + $0x148] sm:$0xff] }
 0xe1a   :  { %5682 = vrsqrt.f32 %v1286_v29  ;;  %v1599_v29 = vld [vmem:[#allocation10 + $0x140] sm:$0xff] }
 0xe27   :  { %v5683_v31 = vpop.eup %5682 }
 0xe28   :  { %v1288_v32 = vmul.f32 %v5683_v31, %v1280_v13 }
 0xe2a   :  { %v1293_v34 = vmul.f32 %v1292_v30, %v1288_v32 }
 0xe2c   :  { %v1298_v37 = vadd.f32 %v1297_v33, %v1293_v34  ;;  %v1589_v33 = vrot.slane %v6233_v38, %v6124_v9 }
 0xe2e   :  { %5273 = vmatmul.mubr.msk.f32.vlgmr.msra.gmra.mxu1 %vm249_vm2, %v1298_v37 }
 0xe2f   :  { %5294 = vmatprep.mubr.msk.f32.mxu1 %vm5949_vm0, %v5948_v1  ;;  %5287 = vmatpush3.msra.mxu1 %v1494_v54  ;;  %v1707_v54 = vld [vmem:[#allocation12 + $0x150] sm:$0xff] }
 0xe30   :  { %5288 = vmatprep.subr.mxu1 %v5948_v1 }
 0xe31   :  { %5289 = vmatpush3.msra.mxu1 %v1493_v0 }
 0xe32   :  { %5290 = vmatprep.subr.mxu1 %v5948_v1 }
 0xe33   :  { %5291 = vmatpush3.msra.mxu1 %v1492_v2 }
 0xe34   :  { %5292 = vmatprep.subr.mxu1 %v5948_v1 }
 0xe35   :  { %5293 = vmatpush3.msra.mxu1 %v1491_v3 }
 0xe36   :  { %5308 = vmatprep.subr.mxu1 %v5948_v1 }
 0xeee   :  { %v1379_v40 = vpop.f32.mrf.mxu1 }
 0xeef   :  { %v1380_v41 = vadd.f32 %v1379_v40, %v1309_v39  ;;  %v1594_v39 = vrot.slane %v6233_v38, %v6127_v10 }
 0xef0   :  { %v5274_v42 = vpop.f32.mrf.mxu1 }
 0xef1   :  { %v1383_v43 = vadd.f32 %v1380_v41, %v1298_v37  ;;  %v6274_v42 = vld [vmem:[#allocation15 + $0x50] sm:$0xff] }
 0xef2   :  { %v1702_v0 = vrot.slane %v6274_v42, %v6092_v36 }
 0xef3   :  { %v1384_v44 = vsel %vm324_vm3, %v1383_v43, 0.0 }
 0xef4   :  { %1385 = vadd.xlane.f32.xlu0 %v1384_v44 }
 0xf7d   :  { %v1386_v23 = vpop.xlane.xlu0 %1385 }
 0xf7e   :  { %v1387_v45 = vmul.f32 0.03125, %v1386_v23 }
 0xf80   :  { %v1388_v47 = vsub.f32 %v1383_v43, %v1387_v45  ;;  %v1606_v43 = vrot.slane %v6274_v42, %v6075_v14 }
 0xf82   :  { %v1389_v20 = vmul.f32 %v1388_v47, %v1388_v47 }
 0xf84   :  { %v1390_v48 = vsel %vm324_vm3, %v1389_v20, 0.0 }
 0xf85   :  { %1391 = vadd.xlane.f32.xlu1 %v1390_v48 }
0x100e   :  { %v1392_v55 = vpop.xlane.xlu1 %1391 }
0x100f   :  { %v1393_v57 = vmul.f32 0.03125, %v1392_v55  ;;  %v1706_v55 = vld [vmem:[#allocation12 + $0x148] sm:$0xff] }
0x1011   :  { %v1394_v58 = vadd.f32 1e-05, %v1393_v57  ;;  %v1705_v57 = vld [vmem:[#allocation12 + $0x140] sm:$0xff] }
0x1013   :  { %5684 = vrsqrt.f32 %v1394_v58  ;;  %v1791_v58 = vld [vmem:[#allocation13 + $0x158] sm:$0xff] }
0x1020   :  { %v5685_v60 = vpop.eup %5684 }
0x1021   :  { %v1396_v61 = vmul.f32 %v5685_v60, %v1388_v47 }
0x1023   :  { %v1401_v62 = vmul.f32 %v1400_v59, %v1396_v61 }
0x1025   :  { %v1406_v63 = vadd.f32 %v1405_v4, %v1401_v62  ;;  %v1697_v4 = vrot.slane %v6274_v42, %v6089_v35 }
0x1027   :  { %5284 = vmatmul.mubr.msk.f32.vlgmr.msra.gmra.mxu0 %vm249_vm2, %v1406_v63 }
0x1028   :  { %5305 = vmatprep.mubr.msk.f32.mxu0 %vm5949_vm0, %v5948_v1  ;;  %5298 = vmatpush3.msra.mxu0 %v1602_v26 }
0x1029   :  { %5299 = vmatprep.subr.mxu0 %v5948_v1 }
0x102a   :  { %5300 = vmatpush3.msra.mxu0 %v1601_v27 }
0x102b   :  { %5301 = vmatprep.subr.mxu0 %v5948_v1 }
0x102c   :  { %5302 = vmatpush3.msra.mxu0 %v1600_v28 }
0x102d   :  { %5303 = vmatprep.subr.mxu0 %v5948_v1 }
0x102e   :  { %5304 = vmatpush3.msra.mxu0 %v1599_v29  ;;  %v1899_v29 = vld [vmem:[#allocation10 + $0x178] sm:$0xff] }
0x102f   :  { %5319 = vmatprep.subr.mxu0 %v5948_v1 }
0x10e7   :  { %v1485_v6 = vpop.f32.mrf.mxu0 }
0x10e8   :  { %v1486_v7 = vadd.f32 %v1485_v6, %v1415_v5  ;;  %v1790_v5 = vld [vmem:[#allocation13 + $0x150] sm:$0xff]  ;;  %v1789_v6 = vld [vmem:[#allocation13 + $0x148] sm:$0xff] }
0x10e9   :  { %v5285_v8 = vpop.f32.mrf.mxu0 }
0x10ea   :  { %v1489_v11 = vmax.f32 %v1486_v7, 0.0  ;;  %v1788_v7 = vld [vmem:[#allocation13 + $0x140] sm:$0xff]  ;;  %v1712_v8 = vrot.slane %v6274_v42, %v6105_v46 }
0x10ec   :  { %5295 = vmatmul.mubr.msk.f32.vlgmr.msra.gmra.mxu1 %vm249_vm2, %v1489_v11 }
0x10ed   :  { %5316 = vmatprep.mubr.msk.f32.mxu1 %vm5949_vm0, %v5948_v1  ;;  %5309 = vmatpush3.msra.mxu1 %v1708_v53 }
0x10ee   :  { %5310 = vmatprep.subr.mxu1 %v5948_v1 }
0x10ef   :  { %5311 = vmatpush3.msra.mxu1 %v1707_v54 }
0x10f0   :  { %5312 = vmatprep.subr.mxu1 %v5948_v1 }
0x10f1   :  { %5313 = vmatpush3.msra.mxu1 %v1706_v55 }
0x10f2   :  { %5314 = vmatprep.subr.mxu1 %v5948_v1 }
0x10f3   :  { %5315 = vmatpush3.msra.mxu1 %v1705_v57  ;;  %v2005_v57 = vld [vmem:[#allocation12 + $0x178] sm:$0xff] }
0x10f4   :  { %5330 = vmatprep.subr.mxu1 %v5948_v1 }
0x11ac   :  { %v1568_v16 = vpop.f32.mrf.mxu1 }
0x11ad   :  { %v1569_v17 = vadd.f32 %v1568_v16, %v1498_v12 }
0x11ae   :  { %v5296_v18 = vpop.f32.mrf.mxu1 }
0x11af   :  { %v1572_v19 = vadd.f32 %v1569_v17, %v1406_v63  ;;  %v1795_v18 = vrot.slane %v6274_v42, %v6113_v52 }
0x11b1   :  { %v1573_v13 = vsel %vm324_vm3, %v1572_v19, 0.0 }
0x11b2   :  { %1574 = vadd.xlane.f32.xlu0 %v1573_v13 }
0x123b   :  { %v1575_v21 = vpop.xlane.xlu0 %1574 }
0x123c   :  { %v1576_v22 = vmul.f32 0.03125, %v1575_v21 }
0x123e   :  { %v1577_v24 = vsub.f32 %v1572_v19, %v1576_v22 }
0x1240   :  { %v1578_v25 = vmul.f32 %v1577_v24, %v1577_v24 }
0x1242   :  { %v1579_v15 = vsel %vm324_vm3, %v1578_v25, 0.0 }
0x1243   :  { %1580 = vadd.xlane.f32.xlu1 %v1579_v15 }
0x12cc   :  { %v1581_v30 = vpop.xlane.xlu1 %1580 }
0x12cd   :  { %v1582_v31 = vmul.f32 0.03125, %v1581_v30  ;;  %v1898_v30 = vld [vmem:[#allocation10 + $0x170] sm:$0xff] }
0x12cf   :  { %v1583_v32 = vadd.f32 1e-05, %v1582_v31  ;;  %v1897_v31 = vld [vmem:[#allocation10 + $0x168] sm:$0xff] }
0x12d1   :  { %5686 = vrsqrt.f32 %v1583_v32  ;;  %v1896_v32 = vld [vmem:[#allocation10 + $0x160] sm:$0xff] }
0x12de   :  { %v5687_v34 = vpop.eup %5686 }
0x12df   :  { %v1585_v37 = vmul.f32 %v5687_v34, %v1577_v24 }
0x12e1   :  { %v1590_v40 = vmul.f32 %v1589_v33, %v1585_v37 }
0x12e3   :  { %v1595_v41 = vadd.f32 %v1594_v39, %v1590_v40  ;;  %v1886_v39 = vrot.slane %v6274_v42, %v6124_v9 }
0x12e5   :  { %5306 = vmatmul.mubr.msk.f32.vlgmr.msra.gmra.mxu0 %vm249_vm2, %v1595_v41 }
0x12e6   :  { %5327 = vmatprep.mubr.msk.f32.mxu0 %vm5949_vm0, %v5948_v1  ;;  %5320 = vmatpush3.msra.mxu0 %v1791_v58  ;;  %v2004_v58 = vld [vmem:[#allocation12 + $0x170] sm:$0xff] }
0x12e7   :  { %5321 = vmatprep.subr.mxu0 %v5948_v1 }
0x12e8   :  { %5322 = vmatpush3.msra.mxu0 %v1790_v5 }
0x12e9   :  { %5323 = vmatprep.subr.mxu0 %v5948_v1 }
0x12ea   :  { %5324 = vmatpush3.msra.mxu0 %v1789_v6 }
0x12eb   :  { %5325 = vmatprep.subr.mxu0 %v5948_v1 }
0x12ec   :  { %5326 = vmatpush3.msra.mxu0 %v1788_v7 }
0x12ed   :  { %5341 = vmatprep.subr.mxu0 %v5948_v1 }
0x13a5   :  { %v1676_v44 = vpop.f32.mrf.mxu0 }
0x13a6   :  { %v1677_v23 = vadd.f32 %v1676_v44, %v1606_v43  ;;  %v1891_v43 = vrot.slane %v6274_v42, %v6127_v10 }
0x13a7   :  { %v5307_v45 = vpop.f32.mrf.mxu0 }
0x13a8   :  { %v1680_v47 = vadd.f32 %v1677_v23, %v1595_v41  ;;  %v6315_v45 = vld [vmem:[#allocation15 + $0x58] sm:$0xff] }
0x13a9   :  { %v1999_v6 = vrot.slane %v6315_v45, %v6092_v36 }
0x13aa   :  { %v1681_v20 = vsel %vm324_vm3, %v1680_v47, 0.0 }
0x13ab   :  { %1682 = vadd.xlane.f32.xlu0 %v1681_v20 }
0x1434   :  { %v1683_v38 = vpop.xlane.xlu0 %1682 }
0x1435   :  { %v1684_v48 = vmul.f32 0.03125, %v1683_v38 }
0x1437   :  { %v1685_v49 = vsub.f32 %v1680_v47, %v1684_v48  ;;  %v1903_v47 = vrot.slane %v6315_v45, %v6075_v14 }
0x1439   :  { %v1686_v50 = vmul.f32 %v1685_v49, %v1685_v49 }
0x143b   :  { %v1687_v51 = vsel %vm324_vm3, %v1686_v50, 0.0 }
0x143c   :  { %1688 = vadd.xlane.f32.xlu1 %v1687_v51 }
0x14c5   :  { %v1689_v59 = vpop.xlane.xlu1 %1688 }
0x14c6   :  { %v1690_v60 = vmul.f32 0.03125, %v1689_v59  ;;  %v2003_v59 = vld [vmem:[#allocation12 + $0x168] sm:$0xff] }
0x14c8   :  { %v1691_v61 = vadd.f32 1e-05, %v1690_v60  ;;  %v2002_v60 = vld [vmem:[#allocation12 + $0x160] sm:$0xff] }
0x14ca   :  { %5688 = vrsqrt.f32 %v1691_v61  ;;  %v2088_v61 = vld [vmem:[#allocation13 + $0x178] sm:$0xff] }
0x14d7   :  { %v5689_v62 = vpop.eup %5688 }
0x14d8   :  { %v1693_v63 = vmul.f32 %v5689_v62, %v1685_v49 }
0x14da   :  { %v1698_v2 = vmul.f32 %v1697_v4, %v1693_v63  ;;  %v2087_v4 = vld [vmem:[#allocation13 + $0x170] sm:$0xff] }
0x14dc   :  { %v1703_v3 = vadd.f32 %v1702_v0, %v1698_v2  ;;  %v1994_v2 = vrot.slane %v6315_v45, %v6089_v35 }
0x14de   :  { %5317 = vmatmul.mubr.msk.f32.vlgmr.msra.gmra.mxu1 %vm249_vm2, %v1703_v3 }
0x14df   :  { %5338 = vmatprep.mubr.msk.f32.mxu1 %vm5949_vm0, %v5948_v1  ;;  %5331 = vmatpush3.msra.mxu1 %v1899_v29 }
0x14e0   :  { %5332 = vmatprep.subr.mxu1 %v5948_v1 }
0x14e1   :  { %5333 = vmatpush3.msra.mxu1 %v1898_v30 }
0x14e2   :  { %5334 = vmatprep.subr.mxu1 %v5948_v1 }
0x14e3   :  { %5335 = vmatpush3.msra.mxu1 %v1897_v31 }
0x14e4   :  { %5336 = vmatprep.subr.mxu1 %v5948_v1 }
0x14e5   :  { %5337 = vmatpush3.msra.mxu1 %v1896_v32  ;;  %v4876_v32 = vld [vmem:[#allocation9 + $0x2] ss:$0 sm:$0xff] }
0x14e6   :  { %5352 = vmatprep.subr.mxu1 %v5948_v1 }
0x159e   :  { %v1782_v11 = vpop.f32.mrf.mxu1 }
0x159f   :  { %v1783_v12 = vadd.f32 %v1782_v11, %v1712_v8  ;;  %v2086_v11 = vld [vmem:[#allocation13 + $0x168] sm:$0xff] }
0x15a0   :  { %v5318_v16 = vpop.f32.mrf.mxu1 }
0x15a1   :  { %v1786_v17 = vmax.f32 %v1783_v12, 0.0  ;;  %v2085_v12 = vld [vmem:[#allocation13 + $0x160] sm:$0xff]  ;;  %v2009_v16 = vrot.slane %v6315_v45, %v6105_v46 }
0x15a3   :  { %5328 = vmatmul.mubr.msk.f32.vlgmr.msra.gmra.mxu0 %vm249_vm2, %v1786_v17 }
0x15a4   :  { %5349 = vmatprep.mubr.msk.f32.mxu0 %vm5949_vm0, %v5948_v1  ;;  %5342 = vmatpush3.msra.mxu0 %v2005_v57 }
0x15a5   :  { %5343 = vmatprep.subr.mxu0 %v5948_v1 }
0x15a6   :  { %5344 = vmatpush3.msra.mxu0 %v2004_v58 }
0x15a7   :  { %5345 = vmatprep.subr.mxu0 %v5948_v1 }
0x15a8   :  { %5346 = vmatpush3.msra.mxu0 %v2003_v59 }
0x15a9   :  { %5347 = vmatprep.subr.mxu0 %v5948_v1 }
0x15aa   :  { %5348 = vmatpush3.msra.mxu0 %v2002_v60 }
0x15ab   :  { %5363 = vmatprep.subr.mxu0 %v5948_v1 }
0x1663   :  { %v1865_v19 = vpop.f32.mrf.mxu0 }
0x1664   :  { %v1866_v13 = vadd.f32 %v1865_v19, %v1795_v18 }
0x1665   :  { %v5329_v21 = vpop.f32.mrf.mxu0 }
0x1666   :  { %v1869_v22 = vadd.f32 %v1866_v13, %v1703_v3  ;;  %v2282_v21 = vld [vmem:[#allocation7 + $0x28] sm:$0xff] }
0x1668   :  { %v1870_v24 = vsel %vm324_vm3, %v1869_v22, 0.0 }
0x1669   :  { %1871 = vadd.xlane.f32.xlu0 %v1870_v24  ;;  %v5728_v24 = vld [vmem:[#allocation6] sm:$0x3] }
0x16f2   :  { %v1872_v25 = vpop.xlane.xlu0 %1871 }
0x16f3   :  { %v1873_v15 = vmul.f32 0.03125, %v1872_v25  ;;  %v2367_v25 = vld [vmem:[#allocation10 + $0x218] sm:$0xff] }
0x16f5   :  { %v1874_v26 = vsub.f32 %v1869_v22, %v1873_v15  ;;  %v2281_v22 = vld [vmem:[#allocation7 + $0x20] sm:$0xff] }
0x16f6   :  { %v2366_v15 = vld [vmem:[#allocation10 + $0x210] sm:$0xff] }
0x16f7   :  { %v1875_v27 = vmul.f32 %v1874_v26, %v1874_v26 }
0x16f9   :  { %v1876_v28 = vsel %vm324_vm3, %v1875_v27, 0.0  ;;  %v2364_v27 = vld [vmem:[#allocation10 + $0x200] sm:$0xff] }
0x16fa   :  { %1877 = vadd.xlane.f32.xlu1 %v1876_v28  ;;  %v2092_v28 = vrot.slane %v6315_v45, %v6113_v52 }
0x1783   :  { %v1878_v33 = vpop.xlane.xlu1 %1877 }
0x1784   :  { %v1879_v34 = vmul.f32 0.03125, %v1878_v33 }
0x1786   :  { %v1880_v37 = vadd.f32 1e-05, %v1879_v34 }
0x1788   :  { %5690 = vrsqrt.f32 %v1880_v37 }
0x1795   :  { %v5691_v40 = vpop.eup %5690 }
0x1796   :  { %v1882_v41 = vmul.f32 %v5691_v40, %v1874_v26  ;;  %v2365_v26 = vld [vmem:[#allocation10 + $0x208] sm:$0xff] }
0x1798   :  { %v1887_v44 = vmul.f32 %v1886_v39, %v1882_v41 }
0x179a   :  { %v1892_v23 = vadd.f32 %v1891_v43, %v1887_v44 }
0x179c   :  { %5339 = vmatmul.mubr.msk.f32.vlgmr.msra.gmra.mxu1 %vm249_vm2, %v1892_v23 }
0x179d   :  { %5360 = vmatprep.mubr.msk.f32.mxu1 %vm5949_vm0, %v5948_v1  ;;  %5353 = vmatpush3.msra.mxu1 %v2088_v61  ;;  %v2183_v61 = vrot.slane %v6315_v45, %v6124_v9 }
0x179e   :  { %5354 = vmatprep.subr.mxu1 %v5948_v1 }
0x179f   :  { %5355 = vmatpush3.msra.mxu1 %v2087_v4 }
0x17a0   :  { %5356 = vmatprep.subr.mxu1 %v5948_v1 }
0x17a1   :  { %5357 = vmatpush3.msra.mxu1 %v2086_v11  ;;  %v2473_v11 = vld [vmem:[#allocation12 + $0x218] sm:$0xff] }
0x17a2   :  { %5358 = vmatprep.subr.mxu1 %v5948_v1 }
0x17a3   :  { %5359 = vmatpush3.msra.mxu1 %v2085_v12  ;;  %v2472_v12 = vld [vmem:[#allocation12 + $0x210] sm:$0xff] }
0x17a4   :  { %5374 = vmatprep.subr.mxu1 %v5948_v1 }
0x185c   :  { %v1973_v20 = vpop.f32.mrf.mxu1 }
0x185d   :  { %v1974_v38 = vadd.f32 %v1973_v20, %v1903_v47  ;;  %v2195_v20 = vld [vmem:[#allocation16 + $0x38] sm:$0xff] }
0x185e   :  { %v5340_v48 = vpop.f32.mrf.mxu1 }
0x185f   :  { %v1977_v49 = vadd.f32 %v1974_v38, %v1892_v23  ;;  %v2194_v38 = vld [vmem:[#allocation16 + $0x30] sm:$0xff]  ;;  %v2193_v48 = vld [vmem:[#allocation16 + $0x28] sm:$0xff] }
0x1861   :  { %v1978_v50 = vsel %vm324_vm3, %v1977_v49, 0.0 }
0x1862   :  { %1979 = vadd.xlane.f32.xlu0 %v1978_v50  ;;  %v6361_v50 = vld [vmem:[#allocation15 + $0x80] sm:$0xff] }
0x18eb   :  { %v1980_v42 = vpop.xlane.xlu0 %1979 }
0x18ec   :  { %v1981_v51 = vmul.f32 0.03125, %v1980_v42  ;;  %v2371_v42 = vrot.slane %v6361_v50, %v6075_v14 }
0x18ee   :  { %v1982_v53 = vsub.f32 %v1977_v49, %v1981_v51  ;;  %v2192_v49 = vld [vmem:[#allocation16 + $0x20] sm:$0xff] }
0x18f0   :  { %v1983_v54 = vmul.f32 %v1982_v53, %v1982_v53 }
0x18f2   :  { %v1984_v55 = vsel %vm324_vm3, %v1983_v54, 0.0 }
0x18f3   :  { %1985 = vadd.xlane.f32.xlu1 %v1984_v55 }
0x197c   :  { %v1986_v62 = vpop.xlane.xlu1 %1985 }
0x197d   :  { %v1987_v63 = vmul.f32 0.03125, %v1986_v62 }
0x197f   :  { %v1988_v0 = vadd.f32 1e-05, %v1987_v63  ;;  %v2188_v63 = vrot.slane %v6315_v45, %v6127_v10  ;;  %v2471_v45 = vld [vmem:[#allocation12 + $0x208] sm:$0xff] }
0x1981   :  { %5692 = vrsqrt.f32 %v1988_v0 }
0x198e   :  { %v5693_v3 = vpop.eup %5692 }
0x198f   :  { %v1990_v5 = vmul.f32 %v5693_v3, %v1982_v53 }
0x1991   :  { %v1995_v7 = vmul.f32 %v1994_v2, %v1990_v5 }
0x1993   :  { %v2000_v8 = vadd.f32 %v1999_v6, %v1995_v7 }
0x1995   :  { %5350 = vmatmul.mubr.msk.f32.vlgmr.msra.gmra.mxu0 %vm249_vm2, %v2000_v8 }
0x1996   :  { %5371 = vmatprep.mubr.msk.f32.mxu0 %vm5949_vm0, %v5948_v1  ;;  %5364 = vmatpush3.msra.mxu0 %v2195_v20 }
0x1997   :  { %5365 = vmatprep.subr.mxu0 %v5948_v1 }
0x1998   :  { %5366 = vmatpush3.msra.mxu0 %v2194_v38 }
0x1999   :  { %5367 = vmatprep.subr.mxu0 %v5948_v1 }
0x199a   :  { %5368 = vmatpush3.msra.mxu0 %v2193_v48  ;;  %v2560_v48 = vrot.slane %v6361_v50, %v6113_v52 }
0x199b   :  { %5369 = vmatprep.subr.mxu0 %v5948_v1 }
0x199c   :  { %5370 = vmatpush3.msra.mxu0 %v2192_v49 }
0x199d   :  { %5392 = vmatprep.subr.mxu0 %v5948_v1 }
0x1a55   :  { %v2079_v17 = vpop.f32.mrf.mxu0 }
0x1a56   :  { %v2080_v18 = vadd.f32 %v2079_v17, %v2009_v16  ;;  %v2470_v16 = vld [vmem:[#allocation12 + $0x200] sm:$0xff]  ;;  %v2556_v17 = vld [vmem:[#allocation13 + $0x218] sm:$0xff] }
0x1a57   :  { %v5351_v19 = vpop.f32.mrf.mxu0 }
0x1a58   :  { %v2083_v13 = vmax.f32 %v2080_v18, 0.0 }
0x1a5a   :  { %5361 = vmatmul.mubr.msk.f32.vlgmr.msra.gmra.mxu1 %vm249_vm2, %v2083_v13 }
0x1a5b   :  { %5375 = vmatpush3.msra.mxu1 %v2282_v21  ;;  %5378 = vmatprep.mubr.msk.f32.mxu1 %vm5949_vm0, %v5948_v1  ;;  %v4856_v21 = vld [vmem:[%s6715_s9] ss:$0 sm:$0xff] }
0x1a5c   :  { %5376 = vmatprep.subr.mxu1 %v5948_v1 }
0x1a5d   :  { %5377 = vmatpush3.msra.mxu1 %v2281_v22  ;;  %v4874_v22 = vld [vmem:[%s6715_s9 + $0x1] ss:$0 sm:$0xff] }
0x1a5e   :  { %5379 = vmatmul.mubr.msk.f32.vlgmr.msra.gmra.mxu1 %vm166_vm1, %v5728_v24  ;;  %5381 = vmatprep.subr.mxu1 %v5948_v1  ;;  %v915_v24 = vadd.f32 %v4856_v21, %v6203_v56  ;;  %v2555_v56 = vld [vmem:[#allocation13 + $0x210] sm:$0xff] }
0x1a5f   :  { %5389 = vmatprep.mubr.msk.f32.mxu1 %vm5949_vm0, %v5948_v1  ;;  %5382 = vmatpush3.msra.mxu1 %v2367_v25  ;;  %v2462_v25 = vrot.slane %v6361_v50, %v6089_v35 }
0x1a60   :  { %5383 = vmatprep.subr.mxu1 %v5948_v1 }
0x1a61   :  { %5384 = vmatpush3.msra.mxu1 %v2366_v15 }
0x1a62   :  { %5385 = vmatprep.subr.mxu1 %v5948_v1 }
0x1a63   :  { %5386 = vmatpush3.msra.mxu1 %v2365_v26  ;;  %v918_v26 = vstv %s833_s7 }
0x1a64   :  { %5387 = vmatprep.subr.mxu1 %v5948_v1 }
0x1a65   :  { %5388 = vmatpush3.msra.mxu1 %v2364_v27 }
0x1a66   :  { %5403 = vmatprep.subr.mxu1 %v5948_v1 }
0x1b1a   :  { %v2162_v29 = vpop.f32.mrf.mxu1 }
0x1b1b   :  { %v2163_v30 = vadd.f32 %v2162_v29, %v2092_v28  ;;  %v2277_v28 = vstv %s4872_s8 }
0x1b1c   :  { %v5362_v31 = vpop.f32.mrf.mxu1 }
0x1b1d   :  { %v2166_v33 = vadd.f32 %v2163_v30, %v2000_v8  ;;  %v2467_v31 = vrot.slane %v6361_v50, %v6092_v36 }
0x1b1e   :  { %v2357_v34 = vpop.f32.mrf.mxu1 }
0x1b1f   :  { %v2358_v37 = vadd.f32 %v4876_v32, %v2357_v34  ;;  %v2167_v39 = vsel %vm324_vm3, %v2166_v33, 0.0 }
0x1b20   :  { %2168 = vadd.xlane.f32.xlu0 %v2167_v39  ;;  %v5380_v40 = vpop.f32.mrf.mxu1 }
0x1b21   :  { %5390 = vmatmul.mubr.msk.f32.vlgmr.msra.gmra.mxu1 %vm249_vm2, %v2358_v37 }
0x1b22   :  { %5411 = vmatprep.mubr.msk.f32.mxu1 %vm5949_vm0, %v5948_v1  ;;  %5404 = vmatpush3.msra.mxu1 %v2556_v17 }
0x1b23   :  { %5405 = vmatprep.subr.mxu1 %v5948_v1 }
0x1b24   :  { %5406 = vmatpush3.msra.mxu1 %v2555_v56 }
0x1b25   :  { %5407 = vmatprep.subr.mxu1 %v5948_v1 }
0x1ba9   :  { %v2169_v41 = vpop.xlane.xlu0 %2168 }
0x1baa   :  { %v2170_v43 = vmul.f32 0.03125, %v2169_v41  ;;  %v2554_v41 = vld [vmem:[#allocation13 + $0x208] sm:$0xff] }
0x1bab   :  { %5408 = vmatpush3.msra.mxu1 %v2554_v41 }
0x1bac   :  { %v2171_v44 = vsub.f32 %v2166_v33, %v2170_v43  ;;  %v919_v33 = vmul.f32 %v918_v26, %v915_v24  ;;  %5409 = vmatprep.subr.mxu1 %v5948_v1  ;;  %v2553_v43 = vld [vmem:[#allocation13 + $0x200] sm:$0xff]  ;;  %v2770_v26 = vld [vmem:[#allocation12 + $0x238] sm:$0xff] }
0x1bad   :  { %5410 = vmatpush3.msra.mxu1 %v2553_v43 }
0x1bae   :  { %v2172_v23 = vmul.f32 %v2171_v44, %v2171_v44  ;;  %5425 = vmatprep.subr.mxu1 %v5948_v1 }
0x1bb0   :  { %v2173_v47 = vsel %vm324_vm3, %v2172_v23, 0.0 }
0x1bb1   :  { %2174 = vadd.xlane.f32.xlu0 %v2173_v47 }
0x1be1   :  { %v2441_v51 = vpop.f32.mrf.mxu1 }
0x1be2   :  { %v2442_v53 = vadd.f32 %v2441_v51, %v2371_v42 }
0x1be3   :  { %v5391_v54 = vpop.f32.mrf.mxu1 }
0x1be4   :  { %v2445_v55 = vadd.f32 %v2442_v53, %v2358_v37 }
0x1be6   :  { %v2446_v57 = vsel %vm324_vm3, %v2445_v55, 0.0 }
0x1be7   :  { %2447 = vadd.xlane.f32.xlu1 %v2446_v57 }
0x1c3a   :  { %v2175_v58 = vpop.xlane.xlu0 %2174 }
0x1c3b   :  { %v2176_v59 = vmul.f32 0.03125, %v2175_v58 }
0x1c3d   :  { %v2177_v60 = vadd.f32 1e-05, %v2176_v59 }
0x1c3f   :  { %5694 = vrsqrt.f32 %v2177_v60 }
0x1c4c   :  { %v5695_v4 = vpop.eup %5694 }
0x1c4d   :  { %v2179_v62 = vmul.f32 %v5695_v4, %v2171_v44  ;;  %v2477_v44 = vrot.slane %v6361_v50, %v6105_v46  ;;  %v2663_v4 = vld [vmem:[#allocation10 + $0x230] sm:$0xff] }
0x1c4f   :  { %v2184_v0 = vmul.f32 %v2183_v61, %v2179_v62  ;;  %v2664_v61 = vld [vmem:[#allocation10 + $0x238] sm:$0xff]  ;;  %v2662_v62 = vld [vmem:[#allocation10 + $0x228] sm:$0xff] }
0x1c51   :  { %v2189_v2 = vadd.f32 %v2188_v63, %v2184_v0  ;;  %v2661_v63 = vld [vmem:[#allocation10 + $0x220] sm:$0xff] }
0x1c53   :  { %5372 = vmatmul.mubr.msk.f32.vlgmr.msra.gmra.mxu0 %vm249_vm2, %v2189_v2 }
0x1c54   :  { %5400 = vmatprep.mubr.msk.f32.mxu0 %vm5949_vm0, %v5948_v1  ;;  %5393 = vmatpush3.msra.mxu0 %v2473_v11 }
0x1c55   :  { %5394 = vmatprep.subr.mxu0 %v5948_v1 }
0x1c56   :  { %5395 = vmatpush3.msra.mxu0 %v2472_v12 }
0x1c57   :  { %5396 = vmatprep.subr.mxu0 %v5948_v1 }
0x1c58   :  { %5397 = vmatpush3.msra.mxu0 %v2471_v45  ;;  %v6418_v45 = vld [vmem:[#allocation15 + $0x88] sm:$0xff] }
0x1c59   :  { %5398 = vmatprep.subr.mxu0 %v5948_v1  ;;  %v2764_v56 = vrot.slane %v6418_v45, %v6092_v36 }
0x1c5a   :  { %5399 = vmatpush3.msra.mxu0 %v2470_v16  ;;  %v2668_v16 = vrot.slane %v6418_v45, %v6075_v14 }
0x1c5b   :  { %5414 = vmatprep.subr.mxu0 %v5948_v1 }
0x1c70   :  { %v2448_v3 = vpop.xlane.xlu1 %2447 }
0x1c71   :  { %v2449_v5 = vmul.f32 0.03125, %v2448_v3 }
0x1c73   :  { %v2450_v6 = vsub.f32 %v2445_v55, %v2449_v5  ;;  %v2651_v5 = vrot.slane %v6361_v50, %v6124_v9 }
0x1c75   :  { %v2451_v7 = vmul.f32 %v2450_v6, %v2450_v6 }
0x1c77   :  { %v2452_v8 = vsel %vm324_vm3, %v2451_v7, 0.0 }
0x1c78   :  { %2453 = vadd.xlane.f32.xlu1 %v2452_v8  ;;  %v2656_v8 = vrot.slane %v6361_v50, %v6127_v10 }
0x1d01   :  { %v2454_v18 = vpop.xlane.xlu1 %2453 }
0x1d02   :  { %v2455_v19 = vmul.f32 0.03125, %v2454_v18 }
0x1d04   :  { %v2456_v13 = vadd.f32 1e-05, %v2455_v19 }
0x1d06   :  { %5696 = vrsqrt.f32 %v2456_v13 }
0x1d13   :  { %v5697_v15 = vpop.eup %5696  ;;  %v2273_v27 = vpop.f32.mrf.mxu0 }
0x1d14   :  { %v2458_v29 = vmul.f32 %v5697_v15, %v2450_v6  ;;  %v2274_v30 = vadd.f32 %v4874_v22, %v2273_v27  ;;  %v2769_v27 = vld [vmem:[#allocation12 + $0x230] sm:$0xff] }
0x1d15   :  { %v5373_v32 = vpop.f32.mrf.mxu0 }
0x1d16   :  { %v2278_v34 = vmul.f32 %v2277_v28, %v2274_v30  ;;  %v2463_v37 = vmul.f32 %v2462_v25, %v2458_v29  ;;  %v2768_v28 = vld [vmem:[#allocation12 + $0x228] sm:$0xff]  ;;  %v2767_v29 = vld [vmem:[#allocation12 + $0x220] sm:$0xff]  ;;  %v2853_v30 = vld [vmem:[#allocation13 + $0x238] sm:$0xff] }
0x1d18   :  { %v2468_v39 = vadd.f32 %v2467_v31, %v2463_v37  ;;  %v6390_v40 = vadd.f32 %v2278_v34, %v919_v33  ;;  %v2759_v34 = vrot.slane %v6418_v45, %v6089_v35 }
0x1d1a   :  { %5401 = vmatmul.mubr.msk.f32.vlgmr.msra.gmra.mxu0 %vm249_vm2, %v2468_v39 }
0x1d1b   :  { %5422 = vmatprep.mubr.msk.f32.mxu0 %vm5949_vm0, %v5948_v1  ;;  %5415 = vmatpush3.msra.mxu0 %v2664_v61 }
0x1d1c   :  { %5416 = vmatprep.subr.mxu0 %v5948_v1 }
0x1d1d   :  { %5417 = vmatpush3.msra.mxu0 %v2663_v4 }
0x1d1e   :  { %5418 = vmatprep.subr.mxu0 %v5948_v1 }
0x1d1f   :  { %5419 = vmatpush3.msra.mxu0 %v2662_v62 }
0x1d20   :  { %5420 = vmatprep.subr.mxu0 %v5948_v1 }
0x1d21   :  { %5421 = vmatpush3.msra.mxu0 %v2661_v63  ;;  %v2961_v63 = vld [vmem:[#allocation10 + $0x258] sm:$0xff] }
0x1d22   :  { %5436 = vmatprep.subr.mxu0 %v5948_v1 }
0x1dda   :  { %v2547_v23 = vpop.f32.mrf.mxu0 }
0x1ddb   :  { %v2548_v47 = vadd.f32 %v2547_v23, %v2477_v44  ;;  %v2852_v44 = vld [vmem:[#allocation13 + $0x230] sm:$0xff]  ;;  %v2851_v23 = vld [vmem:[#allocation13 + $0x228] sm:$0xff] }
0x1ddc   :  { %v5402_v20 = vpop.f32.mrf.mxu0 }
0x1ddd   :  { %v2551_v38 = vmax.f32 %v2548_v47, 0.0  ;;  %v2850_v47 = vld [vmem:[#allocation13 + $0x220] sm:$0xff]  ;;  %v2774_v20 = vrot.slane %v6418_v45, %v6105_v46 }
0x1ddf   :  { %5412 = vmatmul.mubr.msk.f32.vlgmr.msra.gmra.mxu1 %vm249_vm2, %v2551_v38 }
0x1de0   :  { %5433 = vmatprep.mubr.msk.f32.mxu1 %vm5949_vm0, %v5948_v1  ;;  %5426 = vmatpush3.msra.mxu1 %v2770_v26 }
0x1de1   :  { %5427 = vmatprep.subr.mxu1 %v5948_v1 }
0x1de2   :  { %5428 = vmatpush3.msra.mxu1 %v2769_v27 }
0x1de3   :  { %5429 = vmatprep.subr.mxu1 %v5948_v1 }
0x1de4   :  { %5430 = vmatpush3.msra.mxu1 %v2768_v28 }
0x1de5   :  { %5431 = vmatprep.subr.mxu1 %v5948_v1 }
0x1de6   :  { %5432 = vmatpush3.msra.mxu1 %v2767_v29  ;;  %v3067_v29 = vld [vmem:[#allocation12 + $0x258] sm:$0xff] }
0x1de7   :  { %5447 = vmatprep.subr.mxu1 %v5948_v1 }
0x1e9f   :  { %v2630_v49 = vpop.f32.mrf.mxu1 }
0x1ea0   :  { %v2631_v42 = vadd.f32 %v2630_v49, %v2560_v48 }
0x1ea1   :  { %v5413_v51 = vpop.f32.mrf.mxu1 }
0x1ea2   :  { %v2634_v53 = vadd.f32 %v2631_v42, %v2468_v39  ;;  %v2857_v51 = vrot.slane %v6418_v45, %v6113_v52 }
0x1ea4   :  { %v2635_v54 = vsel %vm324_vm3, %v2634_v53, 0.0 }
0x1ea5   :  { %2636 = vadd.xlane.f32.xlu0 %v2635_v54 }
0x1f2e   :  { %v2637_v55 = vpop.xlane.xlu0 %2636 }
0x1f2f   :  { %v2638_v57 = vmul.f32 0.03125, %v2637_v55 }
0x1f31   :  { %v2639_v58 = vsub.f32 %v2634_v53, %v2638_v57 }
0x1f33   :  { %v2640_v59 = vmul.f32 %v2639_v58, %v2639_v58 }
0x1f35   :  { %v2641_v60 = vsel %vm324_vm3, %v2640_v59, 0.0 }
0x1f36   :  { %2642 = vadd.xlane.f32.xlu1 %v2641_v60 }
0x1fbf   :  { %v2643_v0 = vpop.xlane.xlu1 %2642 }
0x1fc0   :  { %v2644_v2 = vmul.f32 0.03125, %v2643_v0  ;;  %v2960_v0 = vld [vmem:[#allocation10 + $0x250] sm:$0xff] }
0x1fc2   :  { %v2645_v3 = vadd.f32 1e-05, %v2644_v2  ;;  %v2959_v2 = vld [vmem:[#allocation10 + $0x248] sm:$0xff] }
0x1fc4   :  { %5698 = vrsqrt.f32 %v2645_v3  ;;  %v2958_v3 = vld [vmem:[#allocation10 + $0x240] sm:$0xff] }
0x1fd1   :  { %v5699_v6 = vpop.eup %5698 }
0x1fd2   :  { %v2647_v7 = vmul.f32 %v5699_v6, %v2639_v58 }
0x1fd4   :  { %v2652_v11 = vmul.f32 %v2651_v5, %v2647_v7 }
0x1fd6   :  { %v2657_v12 = vadd.f32 %v2656_v8, %v2652_v11  ;;  %v2948_v8 = vrot.slane %v6418_v45, %v6124_v9 }
0x1fd8   :  { %5423 = vmatmul.mubr.msk.f32.vlgmr.msra.gmra.mxu0 %vm249_vm2, %v2657_v12 }
0x1fd9   :  { %5444 = vmatprep.mubr.msk.f32.mxu0 %vm5949_vm0, %v5948_v1  ;;  %5437 = vmatpush3.msra.mxu0 %v2853_v30  ;;  %v3066_v30 = vld [vmem:[#allocation12 + $0x250] sm:$0xff] }
0x1fda   :  { %5438 = vmatprep.subr.mxu0 %v5948_v1 }
0x1fdb   :  { %5439 = vmatpush3.msra.mxu0 %v2852_v44 }
0x1fdc   :  { %5440 = vmatprep.subr.mxu0 %v5948_v1 }
0x1fdd   :  { %5441 = vmatpush3.msra.mxu0 %v2851_v23 }
0x1fde   :  { %5442 = vmatprep.subr.mxu0 %v5948_v1 }
0x1fdf   :  { %5443 = vmatpush3.msra.mxu0 %v2850_v47 }
0x1fe0   :  { %5458 = vmatprep.subr.mxu0 %v5948_v1 }
0x2098   :  { %v2738_v17 = vpop.f32.mrf.mxu0 }
0x2099   :  { %v2739_v18 = vadd.f32 %v2738_v17, %v2668_v16  ;;  %v2953_v16 = vrot.slane %v6418_v45, %v6127_v10 }
0x209a   :  { %v5424_v19 = vpop.f32.mrf.mxu0 }
0x209b   :  { %v2742_v13 = vadd.f32 %v2739_v18, %v2657_v12  ;;  %v6459_v19 = vld [vmem:[#allocation15 + $0x90] sm:$0xff] }
0x209c   :  { %v3061_v44 = vrot.slane %v6459_v19, %v6092_v36 }
0x209d   :  { %v2743_v21 = vsel %vm324_vm3, %v2742_v13, 0.0 }
0x209e   :  { %2744 = vadd.xlane.f32.xlu0 %v2743_v21 }
0x2127   :  { %v2745_v50 = vpop.xlane.xlu0 %2744 }
0x2128   :  { %v2746_v22 = vmul.f32 0.03125, %v2745_v50 }
0x212a   :  { %v2747_v24 = vsub.f32 %v2742_v13, %v2746_v22  ;;  %v2965_v13 = vrot.slane %v6459_v19, %v6075_v14 }
0x212c   :  { %v2748_v25 = vmul.f32 %v2747_v24, %v2747_v24 }
0x212e   :  { %v2749_v15 = vsel %vm324_vm3, %v2748_v25, 0.0 }
0x212f   :  { %2750 = vadd.xlane.f32.xlu1 %v2749_v15 }
0x21b8   :  { %v2751_v31 = vpop.xlane.xlu1 %2750 }
0x21b9   :  { %v2752_v32 = vmul.f32 0.03125, %v2751_v31  ;;  %v3065_v31 = vld [vmem:[#allocation12 + $0x248] sm:$0xff] }
0x21bb   :  { %v2753_v33 = vadd.f32 1e-05, %v2752_v32  ;;  %v3064_v32 = vld [vmem:[#allocation12 + $0x240] sm:$0xff] }
0x21bd   :  { %5700 = vrsqrt.f32 %v2753_v33  ;;  %v3150_v33 = vld [vmem:[#allocation13 + $0x258] sm:$0xff] }
0x21ca   :  { %v5701_v37 = vpop.eup %5700 }
0x21cb   :  { %v2755_v39 = vmul.f32 %v5701_v37, %v2747_v24 }
0x21cd   :  { %v2760_v41 = vmul.f32 %v2759_v34, %v2755_v39 }
0x21cf   :  { %v2765_v43 = vadd.f32 %v2764_v56, %v2760_v41  ;;  %v3056_v56 = vrot.slane %v6459_v19, %v6089_v35 }
0x21d1   :  { %5434 = vmatmul.mubr.msk.f32.vlgmr.msra.gmra.mxu1 %vm249_vm2, %v2765_v43 }
0x21d2   :  { %5455 = vmatprep.mubr.msk.f32.mxu1 %vm5949_vm0, %v5948_v1  ;;  %5448 = vmatpush3.msra.mxu1 %v2961_v63 }
0x21d3   :  { %5449 = vmatprep.subr.mxu1 %v5948_v1 }
0x21d4   :  { %5450 = vmatpush3.msra.mxu1 %v2960_v0 }
0x21d5   :  { %5451 = vmatprep.subr.mxu1 %v5948_v1 }
0x21d6   :  { %5452 = vmatpush3.msra.mxu1 %v2959_v2 }
0x21d7   :  { %5453 = vmatprep.subr.mxu1 %v5948_v1 }
0x21d8   :  { %5454 = vmatpush3.msra.mxu1 %v2958_v3  ;;  %v3258_v3 = vld [vmem:[#allocation10 + $0x278] sm:$0xff] }
0x21d9   :  { %5469 = vmatprep.subr.mxu1 %v5948_v1 }
0x2291   :  { %v2844_v38 = vpop.f32.mrf.mxu1 }
0x2292   :  { %v2845_v48 = vadd.f32 %v2844_v38, %v2774_v20  ;;  %v3149_v20 = vld [vmem:[#allocation13 + $0x250] sm:$0xff]  ;;  %v3148_v38 = vld [vmem:[#allocation13 + $0x248] sm:$0xff] }
0x2293   :  { %v5435_v49 = vpop.f32.mrf.mxu1 }
0x2294   :  { %v2848_v42 = vmax.f32 %v2845_v48, 0.0  ;;  %v3147_v48 = vld [vmem:[#allocation13 + $0x240] sm:$0xff]  ;;  %v3071_v49 = vrot.slane %v6459_v19, %v6105_v46 }
0x2296   :  { %5445 = vmatmul.mubr.msk.f32.vlgmr.msra.gmra.mxu0 %vm249_vm2, %v2848_v42 }
0x2297   :  { %5466 = vmatprep.mubr.msk.f32.mxu0 %vm5949_vm0, %v5948_v1  ;;  %5459 = vmatpush3.msra.mxu0 %v3067_v29 }
0x2298   :  { %5460 = vmatprep.subr.mxu0 %v5948_v1 }
0x2299   :  { %5461 = vmatpush3.msra.mxu0 %v3066_v30 }
0x229a   :  { %5462 = vmatprep.subr.mxu0 %v5948_v1 }
0x229b   :  { %5463 = vmatpush3.msra.mxu0 %v3065_v31 }
0x229c   :  { %5464 = vmatprep.subr.mxu0 %v5948_v1 }
0x229d   :  { %5465 = vmatpush3.msra.mxu0 %v3064_v32  ;;  %v3364_v32 = vld [vmem:[#allocation12 + $0x278] sm:$0xff] }
0x229e   :  { %5480 = vmatprep.subr.mxu0 %v5948_v1 }
0x2356   :  { %v2927_v53 = vpop.f32.mrf.mxu0 }
0x2357   :  { %v2928_v54 = vadd.f32 %v2927_v53, %v2857_v51 }
0x2358   :  { %v5446_v55 = vpop.f32.mrf.mxu0 }
0x2359   :  { %v2931_v57 = vadd.f32 %v2928_v54, %v2765_v43  ;;  %v3154_v55 = vrot.slane %v6459_v19, %v6113_v52 }
0x235b   :  { %v2932_v58 = vsel %vm324_vm3, %v2931_v57, 0.0 }
0x235c   :  { %2933 = vadd.xlane.f32.xlu0 %v2932_v58 }
0x23e5   :  { %v2934_v59 = vpop.xlane.xlu0 %2933 }
0x23e6   :  { %v2935_v60 = vmul.f32 0.03125, %v2934_v59 }
0x23e8   :  { %v2936_v61 = vsub.f32 %v2931_v57, %v2935_v60 }
0x23ea   :  { %v2937_v4 = vmul.f32 %v2936_v61, %v2936_v61 }
0x23ec   :  { %v2938_v62 = vsel %vm324_vm3, %v2937_v4, 0.0 }
0x23ed   :  { %2939 = vadd.xlane.f32.xlu1 %v2938_v62 }
0x2476   :  { %v2940_v5 = vpop.xlane.xlu1 %2939 }
0x2477   :  { %v2941_v6 = vmul.f32 0.03125, %v2940_v5  ;;  %v3257_v5 = vld [vmem:[#allocation10 + $0x270] sm:$0xff] }
0x2479   :  { %v2942_v7 = vadd.f32 1e-05, %v2941_v6  ;;  %v3256_v6 = vld [vmem:[#allocation10 + $0x268] sm:$0xff] }
0x247b   :  { %5702 = vrsqrt.f32 %v2942_v7  ;;  %v3255_v7 = vld [vmem:[#allocation10 + $0x260] sm:$0xff] }
0x2488   :  { %v5703_v11 = vpop.eup %5702 }
0x2489   :  { %v2944_v12 = vmul.f32 %v5703_v11, %v2936_v61 }
0x248b   :  { %v2949_v17 = vmul.f32 %v2948_v8, %v2944_v12 }
0x248d   :  { %v2954_v18 = vadd.f32 %v2953_v16, %v2949_v17  ;;  %v3245_v16 = vrot.slane %v6459_v19, %v6124_v9 }
0x248f   :  { %5456 = vmatmul.mubr.msk.f32.vlgmr.msra.gmra.mxu1 %vm249_vm2, %v2954_v18 }
0x2490   :  { %5477 = vmatprep.mubr.msk.f32.mxu1 %vm5949_vm0, %v5948_v1  ;;  %5470 = vmatpush3.msra.mxu1 %v3150_v33  ;;  %v3363_v33 = vld [vmem:[#allocation12 + $0x270] sm:$0xff] }
0x2491   :  { %5471 = vmatprep.subr.mxu1 %v5948_v1 }
0x2492   :  { %5472 = vmatpush3.msra.mxu1 %v3149_v20 }
0x2493   :  { %5473 = vmatprep.subr.mxu1 %v5948_v1 }
0x2494   :  { %5474 = vmatpush3.msra.mxu1 %v3148_v38 }
0x2495   :  { %5475 = vmatprep.subr.mxu1 %v5948_v1 }
0x2496   :  { %5476 = vmatpush3.msra.mxu1 %v3147_v48 }
0x2497   :  { %5491 = vmatprep.subr.mxu1 %v5948_v1 }
0x254f   :  { %v3035_v21 = vpop.f32.mrf.mxu1 }
0x2550   :  { %v3036_v50 = vadd.f32 %v3035_v21, %v2965_v13  ;;  %v3250_v13 = vrot.slane %v6459_v19, %v6127_v10 }
0x2551   :  { %v5457_v22 = vpop.f32.mrf.mxu1 }
0x2552   :  { %v3039_v24 = vadd.f32 %v3036_v50, %v2954_v18  ;;  %v6500_v22 = vld [vmem:[#allocation15 + $0x98] sm:$0xff] }
0x2553   :  { %v3358_v20 = vrot.slane %v6500_v22, %v6092_v36 }
0x2554   :  { %v3040_v25 = vsel %vm324_vm3, %v3039_v24, 0.0 }
0x2555   :  { %3041 = vadd.xlane.f32.xlu0 %v3040_v25 }
0x25de   :  { %v3042_v45 = vpop.xlane.xlu0 %3041 }
0x25df   :  { %v3043_v15 = vmul.f32 0.03125, %v3042_v45 }
0x25e1   :  { %v3044_v26 = vsub.f32 %v3039_v24, %v3043_v15  ;;  %v3262_v24 = vrot.slane %v6500_v22, %v6075_v14 }
0x25e3   :  { %v3045_v27 = vmul.f32 %v3044_v26, %v3044_v26 }
0x25e5   :  { %v3046_v28 = vsel %vm324_vm3, %v3045_v27, 0.0 }
0x25e6   :  { %3047 = vadd.xlane.f32.xlu1 %v3046_v28 }
0x266f   :  { %v3048_v34 = vpop.xlane.xlu1 %3047 }
0x2670   :  { %v3049_v37 = vmul.f32 0.03125, %v3048_v34  ;;  %v3362_v34 = vld [vmem:[#allocation12 + $0x268] sm:$0xff] }
0x2672   :  { %v3050_v39 = vadd.f32 1e-05, %v3049_v37  ;;  %v3361_v37 = vld [vmem:[#allocation12 + $0x260] sm:$0xff] }
0x2674   :  { %5704 = vrsqrt.f32 %v3050_v39  ;;  %v3447_v39 = vld [vmem:[#allocation13 + $0x278] sm:$0xff] }
0x2681   :  { %v5705_v41 = vpop.eup %5704 }
0x2682   :  { %v3052_v43 = vmul.f32 %v5705_v41, %v3044_v26 }
0x2684   :  { %v3057_v23 = vmul.f32 %v3056_v56, %v3052_v43 }
0x2686   :  { %v3062_v47 = vadd.f32 %v3061_v44, %v3057_v23  ;;  %v3353_v44 = vrot.slane %v6500_v22, %v6089_v35 }
0x2688   :  { %5467 = vmatmul.mubr.msk.f32.vlgmr.msra.gmra.mxu0 %vm249_vm2, %v3062_v47 }
0x2689   :  { %5488 = vmatprep.mubr.msk.f32.mxu0 %vm5949_vm0, %v5948_v1  ;;  %5481 = vmatpush3.msra.mxu0 %v3258_v3 }
0x268a   :  { %5482 = vmatprep.subr.mxu0 %v5948_v1 }
0x268b   :  { %5483 = vmatpush3.msra.mxu0 %v3257_v5 }
0x268c   :  { %5484 = vmatprep.subr.mxu0 %v5948_v1 }
0x268d   :  { %5485 = vmatpush3.msra.mxu0 %v3256_v6 }
0x268e   :  { %5486 = vmatprep.subr.mxu0 %v5948_v1 }
0x268f   :  { %5487 = vmatpush3.msra.mxu0 %v3255_v7  ;;  %v3555_v7 = vld [vmem:[#allocation10 + $0x298] sm:$0xff] }
0x2690   :  { %5502 = vmatprep.subr.mxu0 %v5948_v1 }
0x2748   :  { %v3141_v42 = vpop.f32.mrf.mxu0 }
0x2749   :  { %v3142_v51 = vadd.f32 %v3141_v42, %v3071_v49  ;;  %v3446_v49 = vld [vmem:[#allocation13 + $0x270] sm:$0xff]  ;;  %v3445_v42 = vld [vmem:[#allocation13 + $0x268] sm:$0xff] }
0x274a   :  { %v5468_v53 = vpop.f32.mrf.mxu0 }
0x274b   :  { %v3145_v54 = vmax.f32 %v3142_v51, 0.0  ;;  %v3444_v51 = vld [vmem:[#allocation13 + $0x260] sm:$0xff]  ;;  %v3368_v53 = vrot.slane %v6500_v22, %v6105_v46 }
0x274d   :  { %5478 = vmatmul.mubr.msk.f32.vlgmr.msra.gmra.mxu1 %vm249_vm2, %v3145_v54 }
0x274e   :  { %5499 = vmatprep.mubr.msk.f32.mxu1 %vm5949_vm0, %v5948_v1  ;;  %5492 = vmatpush3.msra.mxu1 %v3364_v32 }
0x274f   :  { %5493 = vmatprep.subr.mxu1 %v5948_v1 }
0x2750   :  { %5494 = vmatpush3.msra.mxu1 %v3363_v33 }
0x2751   :  { %5495 = vmatprep.subr.mxu1 %v5948_v1 }
0x2752   :  { %5496 = vmatpush3.msra.mxu1 %v3362_v34 }
0x2753   :  { %5497 = vmatprep.subr.mxu1 %v5948_v1 }
0x2754   :  { %5498 = vmatpush3.msra.mxu1 %v3361_v37  ;;  %v3661_v37 = vld [vmem:[#allocation12 + $0x298] sm:$0xff] }
0x2755   :  { %5513 = vmatprep.subr.mxu1 %v5948_v1 }
0x280d   :  { %v3224_v57 = vpop.f32.mrf.mxu1 }
0x280e   :  { %v3225_v58 = vadd.f32 %v3224_v57, %v3154_v55 }
0x280f   :  { %v5479_v59 = vpop.f32.mrf.mxu1 }
0x2810   :  { %v3228_v60 = vadd.f32 %v3225_v58, %v3062_v47  ;;  %v3451_v59 = vrot.slane %v6500_v22, %v6113_v52 }
0x2812   :  { %v3229_v61 = vsel %vm324_vm3, %v3228_v60, 0.0 }
0x2813   :  { %3230 = vadd.xlane.f32.xlu0 %v3229_v61 }
0x289c   :  { %v3231_v4 = vpop.xlane.xlu0 %3230 }
0x289d   :  { %v3232_v62 = vmul.f32 0.03125, %v3231_v4 }
0x289f   :  { %v3233_v63 = vsub.f32 %v3228_v60, %v3232_v62 }
0x28a1   :  { %v3234_v0 = vmul.f32 %v3233_v63, %v3233_v63 }
0x28a3   :  { %v3235_v2 = vsel %vm324_vm3, %v3234_v0, 0.0 }
0x28a4   :  { %3236 = vadd.xlane.f32.xlu1 %v3235_v2 }
0x292d   :  { %v3237_v8 = vpop.xlane.xlu1 %3236 }
0x292e   :  { %v3238_v11 = vmul.f32 0.03125, %v3237_v8  ;;  %v3554_v8 = vld [vmem:[#allocation10 + $0x290] sm:$0xff] }
0x2930   :  { %v3239_v12 = vadd.f32 1e-05, %v3238_v11  ;;  %v3553_v11 = vld [vmem:[#allocation10 + $0x288] sm:$0xff] }
0x2932   :  { %5706 = vrsqrt.f32 %v3239_v12  ;;  %v3552_v12 = vld [vmem:[#allocation10 + $0x280] sm:$0xff] }
0x293f   :  { %v5707_v17 = vpop.eup %5706 }
0x2940   :  { %v3241_v18 = vmul.f32 %v5707_v17, %v3233_v63 }
0x2942   :  { %v3246_v21 = vmul.f32 %v3245_v16, %v3241_v18 }
0x2944   :  { %v3251_v50 = vadd.f32 %v3250_v13, %v3246_v21  ;;  %v3542_v13 = vrot.slane %v6500_v22, %v6124_v9 }
0x2946   :  { %5489 = vmatmul.mubr.msk.f32.vlgmr.msra.gmra.mxu0 %vm249_vm2, %v3251_v50 }
0x2947   :  { %5510 = vmatprep.mubr.msk.f32.mxu0 %vm5949_vm0, %v5948_v1  ;;  %5503 = vmatpush3.msra.mxu0 %v3447_v39  ;;  %v3660_v39 = vld [vmem:[#allocation12 + $0x290] sm:$0xff] }
0x2948   :  { %5504 = vmatprep.subr.mxu0 %v5948_v1 }
0x2949   :  { %5505 = vmatpush3.msra.mxu0 %v3446_v49 }
0x294a   :  { %5506 = vmatprep.subr.mxu0 %v5948_v1 }
0x294b   :  { %5507 = vmatpush3.msra.mxu0 %v3445_v42 }
0x294c   :  { %5508 = vmatprep.subr.mxu0 %v5948_v1 }
0x294d   :  { %5509 = vmatpush3.msra.mxu0 %v3444_v51 }
0x294e   :  { %5524 = vmatprep.subr.mxu0 %v5948_v1 }
0x2a06   :  { %v3332_v25 = vpop.f32.mrf.mxu0 }
0x2a07   :  { %v3333_v45 = vadd.f32 %v3332_v25, %v3262_v24  ;;  %v3547_v24 = vrot.slane %v6500_v22, %v6127_v10 }
0x2a08   :  { %v5490_v15 = vpop.f32.mrf.mxu0 }
0x2a09   :  { %v3336_v26 = vadd.f32 %v3333_v45, %v3251_v50  ;;  %v6541_v15 = vld [vmem:[#allocation15 + $0xa0] sm:$0xff] }
0x2a0a   :  { %v3655_v49 = vrot.slane %v6541_v15, %v6092_v36 }
0x2a0b   :  { %v3337_v27 = vsel %vm324_vm3, %v3336_v26, 0.0 }
0x2a0c   :  { %3338 = vadd.xlane.f32.xlu0 %v3337_v27 }
0x2a95   :  { %v3339_v19 = vpop.xlane.xlu0 %3338 }
0x2a96   :  { %v3340_v28 = vmul.f32 0.03125, %v3339_v19 }
0x2a98   :  { %v3341_v29 = vsub.f32 %v3336_v26, %v3340_v28  ;;  %v3559_v26 = vrot.slane %v6541_v15, %v6075_v14 }
0x2a9a   :  { %v3342_v30 = vmul.f32 %v3341_v29, %v3341_v29 }
0x2a9c   :  { %v3343_v31 = vsel %vm324_vm3, %v3342_v30, 0.0 }
0x2a9d   :  { %3344 = vadd.xlane.f32.xlu1 %v3343_v31 }
0x2b26   :  { %v3345_v56 = vpop.xlane.xlu1 %3344 }
0x2b27   :  { %v3346_v41 = vmul.f32 0.03125, %v3345_v56  ;;  %v3659_v56 = vld [vmem:[#allocation12 + $0x288] sm:$0xff] }
0x2b29   :  { %v3347_v43 = vadd.f32 1e-05, %v3346_v41  ;;  %v3658_v41 = vld [vmem:[#allocation12 + $0x280] sm:$0xff] }
0x2b2b   :  { %5708 = vrsqrt.f32 %v3347_v43  ;;  %v3744_v43 = vld [vmem:[#allocation13 + $0x298] sm:$0xff] }
0x2b38   :  { %v5709_v23 = vpop.eup %5708 }
0x2b39   :  { %v3349_v47 = vmul.f32 %v5709_v23, %v3341_v29 }
0x2b3b   :  { %v3354_v38 = vmul.f32 %v3353_v44, %v3349_v47 }
0x2b3d   :  { %v3359_v48 = vadd.f32 %v3358_v20, %v3354_v38  ;;  %v3650_v20 = vrot.slane %v6541_v15, %v6089_v35 }
0x2b3f   :  { %5500 = vmatmul.mubr.msk.f32.vlgmr.msra.gmra.mxu1 %vm249_vm2, %v3359_v48 }
0x2b40   :  { %5521 = vmatprep.mubr.msk.f32.mxu1 %vm5949_vm0, %v5948_v1  ;;  %5514 = vmatpush3.msra.mxu1 %v3555_v7 }
0x2b41   :  { %5515 = vmatprep.subr.mxu1 %v5948_v1 }
0x2b42   :  { %5516 = vmatpush3.msra.mxu1 %v3554_v8 }
0x2b43   :  { %5517 = vmatprep.subr.mxu1 %v5948_v1 }
0x2b44   :  { %5518 = vmatpush3.msra.mxu1 %v3553_v11 }
0x2b45   :  { %5519 = vmatprep.subr.mxu1 %v5948_v1 }
0x2b46   :  { %5520 = vmatpush3.msra.mxu1 %v3552_v12  ;;  %v3852_v12 = vld [vmem:[#allocation10 + $0x2b8] sm:$0xff] }
0x2b47   :  { %5535 = vmatprep.subr.mxu1 %v5948_v1 }
0x2bff   :  { %v3438_v54 = vpop.f32.mrf.mxu1 }
0x2c00   :  { %v3439_v55 = vadd.f32 %v3438_v54, %v3368_v53  ;;  %v3743_v53 = vld [vmem:[#allocation13 + $0x290] sm:$0xff]  ;;  %v3742_v54 = vld [vmem:[#allocation13 + $0x288] sm:$0xff] }
0x2c01   :  { %v5501_v57 = vpop.f32.mrf.mxu1 }
0x2c02   :  { %v3442_v58 = vmax.f32 %v3439_v55, 0.0  ;;  %v3741_v55 = vld [vmem:[#allocation13 + $0x280] sm:$0xff]  ;;  %v3665_v57 = vrot.slane %v6541_v15, %v6105_v46 }
0x2c04   :  { %5511 = vmatmul.mubr.msk.f32.vlgmr.msra.gmra.mxu0 %vm249_vm2, %v3442_v58 }
0x2c05   :  { %5532 = vmatprep.mubr.msk.f32.mxu0 %vm5949_vm0, %v5948_v1  ;;  %5525 = vmatpush3.msra.mxu0 %v3661_v37 }
0x2c06   :  { %5526 = vmatprep.subr.mxu0 %v5948_v1 }
0x2c07   :  { %5527 = vmatpush3.msra.mxu0 %v3660_v39 }
0x2c08   :  { %5528 = vmatprep.subr.mxu0 %v5948_v1 }
0x2c09   :  { %5529 = vmatpush3.msra.mxu0 %v3659_v56 }
0x2c0a   :  { %5530 = vmatprep.subr.mxu0 %v5948_v1 }
0x2c0b   :  { %5531 = vmatpush3.msra.mxu0 %v3658_v41  ;;  %v3958_v41 = vld [vmem:[#allocation12 + $0x2b8] sm:$0xff] }
0x2c0c   :  { %5546 = vmatprep.subr.mxu0 %v5948_v1 }
0x2cc4   :  { %v3521_v60 = vpop.f32.mrf.mxu0 }
0x2cc5   :  { %v3522_v61 = vadd.f32 %v3521_v60, %v3451_v59 }
0x2cc6   :  { %v5512_v4 = vpop.f32.mrf.mxu0 }
0x2cc7   :  { %v3525_v62 = vadd.f32 %v3522_v61, %v3359_v48  ;;  %v3748_v4 = vrot.slane %v6541_v15, %v6113_v52 }
0x2cc9   :  { %v3526_v63 = vsel %vm324_vm3, %v3525_v62, 0.0 }
0x2cca   :  { %3527 = vadd.xlane.f32.xlu0 %v3526_v63 }
0x2d53   :  { %v3528_v0 = vpop.xlane.xlu0 %3527 }
0x2d54   :  { %v3529_v2 = vmul.f32 0.03125, %v3528_v0 }
0x2d56   :  { %v3530_v3 = vsub.f32 %v3525_v62, %v3529_v2 }
0x2d58   :  { %v3531_v5 = vmul.f32 %v3530_v3, %v3530_v3 }
0x2d5a   :  { %v3532_v6 = vsel %vm324_vm3, %v3531_v5, 0.0 }
0x2d5b   :  { %3533 = vadd.xlane.f32.xlu1 %v3532_v6 }
0x2de4   :  { %v3534_v16 = vpop.xlane.xlu1 %3533 }
0x2de5   :  { %v3535_v17 = vmul.f32 0.03125, %v3534_v16  ;;  %v3851_v16 = vld [vmem:[#allocation10 + $0x2b0] sm:$0xff] }
0x2de7   :  { %v3536_v18 = vadd.f32 1e-05, %v3535_v17  ;;  %v3850_v17 = vld [vmem:[#allocation10 + $0x2a8] sm:$0xff] }
0x2de9   :  { %5710 = vrsqrt.f32 %v3536_v18  ;;  %v3849_v18 = vld [vmem:[#allocation10 + $0x2a0] sm:$0xff] }
0x2df6   :  { %v5711_v21 = vpop.eup %5710 }
0x2df7   :  { %v3538_v50 = vmul.f32 %v5711_v21, %v3530_v3 }
0x2df9   :  { %v3543_v25 = vmul.f32 %v3542_v13, %v3538_v50 }
0x2dfb   :  { %v3548_v45 = vadd.f32 %v3547_v24, %v3543_v25  ;;  %v3839_v24 = vrot.slane %v6541_v15, %v6124_v9 }
0x2dfd   :  { %5522 = vmatmul.mubr.msk.f32.vlgmr.msra.gmra.mxu1 %vm249_vm2, %v3548_v45 }
0x2dfe   :  { %5543 = vmatprep.mubr.msk.f32.mxu1 %vm5949_vm0, %v5948_v1  ;;  %5536 = vmatpush3.msra.mxu1 %v3744_v43  ;;  %v3957_v43 = vld [vmem:[#allocation12 + $0x2b0] sm:$0xff] }
0x2dff   :  { %5537 = vmatprep.subr.mxu1 %v5948_v1 }
0x2e00   :  { %5538 = vmatpush3.msra.mxu1 %v3743_v53 }
0x2e01   :  { %5539 = vmatprep.subr.mxu1 %v5948_v1 }
0x2e02   :  { %5540 = vmatpush3.msra.mxu1 %v3742_v54 }
0x2e03   :  { %5541 = vmatprep.subr.mxu1 %v5948_v1 }
0x2e04   :  { %5542 = vmatpush3.msra.mxu1 %v3741_v55 }
0x2e05   :  { %5557 = vmatprep.subr.mxu1 %v5948_v1 }
0x2ebd   :  { %v3629_v27 = vpop.f32.mrf.mxu1 }
0x2ebe   :  { %v3630_v19 = vadd.f32 %v3629_v27, %v3559_v26  ;;  %v3844_v26 = vrot.slane %v6541_v15, %v6127_v10 }
0x2ebf   :  { %v5523_v28 = vpop.f32.mrf.mxu1 }
0x2ec0   :  { %v3633_v29 = vadd.f32 %v3630_v19, %v3548_v45  ;;  %v6582_v28 = vld [vmem:[#allocation15 + $0xa8] sm:$0xff] }
0x2ec1   :  { %v3952_v53 = vrot.slane %v6582_v28, %v6092_v36 }
0x2ec2   :  { %v3634_v30 = vsel %vm324_vm3, %v3633_v29, 0.0 }
0x2ec3   :  { %3635 = vadd.xlane.f32.xlu0 %v3634_v30 }
0x2f4c   :  { %v3636_v22 = vpop.xlane.xlu0 %3635 }
0x2f4d   :  { %v3637_v31 = vmul.f32 0.03125, %v3636_v22 }
0x2f4f   :  { %v3638_v32 = vsub.f32 %v3633_v29, %v3637_v31  ;;  %v3856_v29 = vrot.slane %v6582_v28, %v6075_v14 }
0x2f51   :  { %v3639_v33 = vmul.f32 %v3638_v32, %v3638_v32 }
0x2f53   :  { %v3640_v34 = vsel %vm324_vm3, %v3639_v33, 0.0 }
0x2f54   :  { %3641 = vadd.xlane.f32.xlu1 %v3640_v34 }
0x2fdd   :  { %v3642_v44 = vpop.xlane.xlu1 %3641 }
0x2fde   :  { %v3643_v23 = vmul.f32 0.03125, %v3642_v44  ;;  %v3956_v44 = vld [vmem:[#allocation12 + $0x2a8] sm:$0xff] }
0x2fe0   :  { %v3644_v47 = vadd.f32 1e-05, %v3643_v23  ;;  %v3955_v23 = vld [vmem:[#allocation12 + $0x2a0] sm:$0xff] }
0x2fe2   :  { %5712 = vrsqrt.f32 %v3644_v47  ;;  %v4041_v47 = vld [vmem:[#allocation13 + $0x2b8] sm:$0xff] }
0x2fef   :  { %v5713_v38 = vpop.eup %5712 }
0x2ff0   :  { %v3646_v48 = vmul.f32 %v5713_v38, %v3638_v32 }
0x2ff2   :  { %v3651_v42 = vmul.f32 %v3650_v20, %v3646_v48 }
0x2ff4   :  { %v3656_v51 = vadd.f32 %v3655_v49, %v3651_v42  ;;  %v3947_v49 = vrot.slane %v6582_v28, %v6089_v35 }
0x2ff6   :  { %5533 = vmatmul.mubr.msk.f32.vlgmr.msra.gmra.mxu0 %vm249_vm2, %v3656_v51 }
0x2ff7   :  { %5554 = vmatprep.mubr.msk.f32.mxu0 %vm5949_vm0, %v5948_v1  ;;  %5547 = vmatpush3.msra.mxu0 %v3852_v12 }
0x2ff8   :  { %5548 = vmatprep.subr.mxu0 %v5948_v1 }
0x2ff9   :  { %5549 = vmatpush3.msra.mxu0 %v3851_v16 }
0x2ffa   :  { %5550 = vmatprep.subr.mxu0 %v5948_v1 }
0x2ffb   :  { %5551 = vmatpush3.msra.mxu0 %v3850_v17 }
0x2ffc   :  { %5552 = vmatprep.subr.mxu0 %v5948_v1 }
0x2ffd   :  { %5553 = vmatpush3.msra.mxu0 %v3849_v18  ;;  %v4149_v18 = vld [vmem:[#allocation10 + $0x2d8] sm:$0xff] }
0x2ffe   :  { %5568 = vmatprep.subr.mxu0 %v5948_v1 }
0x30b6   :  { %v3735_v58 = vpop.f32.mrf.mxu0 }
0x30b7   :  { %v3736_v59 = vadd.f32 %v3735_v58, %v3665_v57  ;;  %v4040_v57 = vld [vmem:[#allocation13 + $0x2b0] sm:$0xff]  ;;  %v4039_v58 = vld [vmem:[#allocation13 + $0x2a8] sm:$0xff] }
0x30b8   :  { %v5534_v60 = vpop.f32.mrf.mxu0 }
0x30b9   :  { %v3739_v61 = vmax.f32 %v3736_v59, 0.0  ;;  %v4038_v59 = vld [vmem:[#allocation13 + $0x2a0] sm:$0xff]  ;;  %v3962_v60 = vrot.slane %v6582_v28, %v6105_v46 }
0x30bb   :  { %5544 = vmatmul.mubr.msk.f32.vlgmr.msra.gmra.mxu1 %vm249_vm2, %v3739_v61 }
0x30bc   :  { %5565 = vmatprep.mubr.msk.f32.mxu1 %vm5949_vm0, %v5948_v1  ;;  %5558 = vmatpush3.msra.mxu1 %v3958_v41 }
0x30bd   :  { %5559 = vmatprep.subr.mxu1 %v5948_v1 }
0x30be   :  { %5560 = vmatpush3.msra.mxu1 %v3957_v43 }
0x30bf   :  { %5561 = vmatprep.subr.mxu1 %v5948_v1 }
0x30c0   :  { %5562 = vmatpush3.msra.mxu1 %v3956_v44 }
0x30c1   :  { %5563 = vmatprep.subr.mxu1 %v5948_v1 }
0x30c2   :  { %5564 = vmatpush3.msra.mxu1 %v3955_v23  ;;  %v4255_v23 = vld [vmem:[#allocation12 + $0x2d8] sm:$0xff] }
0x30c3   :  { %5579 = vmatprep.subr.mxu1 %v5948_v1 }
0x317b   :  { %v3818_v62 = vpop.f32.mrf.mxu1 }
0x317c   :  { %v3819_v63 = vadd.f32 %v3818_v62, %v3748_v4 }
0x317d   :  { %v5545_v0 = vpop.f32.mrf.mxu1 }
0x317e   :  { %v3822_v2 = vadd.f32 %v3819_v63, %v3656_v51  ;;  %v4045_v0 = vrot.slane %v6582_v28, %v6113_v52 }
0x3180   :  { %v3823_v3 = vsel %vm324_vm3, %v3822_v2, 0.0 }
0x3181   :  { %3824 = vadd.xlane.f32.xlu0 %v3823_v3 }
0x320a   :  { %v3825_v5 = vpop.xlane.xlu0 %3824 }
0x320b   :  { %v3826_v6 = vmul.f32 0.03125, %v3825_v5 }
0x320d   :  { %v3827_v7 = vsub.f32 %v3822_v2, %v3826_v6 }
0x320f   :  { %v3828_v8 = vmul.f32 %v3827_v7, %v3827_v7 }
0x3211   :  { %v3829_v11 = vsel %vm324_vm3, %v3828_v8, 0.0 }
0x3212   :  { %3830 = vadd.xlane.f32.xlu1 %v3829_v11 }
0x329b   :  { %v3831_v13 = vpop.xlane.xlu1 %3830 }
0x329c   :  { %v3832_v21 = vmul.f32 0.03125, %v3831_v13  ;;  %v4148_v13 = vld [vmem:[#allocation10 + $0x2d0] sm:$0xff] }
0x329e   :  { %v3833_v50 = vadd.f32 1e-05, %v3832_v21  ;;  %v4147_v21 = vld [vmem:[#allocation10 + $0x2c8] sm:$0xff] }
0x32a0   :  { %5714 = vrsqrt.f32 %v3833_v50  ;;  %v4146_v50 = vld [vmem:[#allocation10 + $0x2c0] sm:$0xff] }
0x32ad   :  { %v5715_v25 = vpop.eup %5714 }
0x32ae   :  { %v3835_v45 = vmul.f32 %v5715_v25, %v3827_v7 }
0x32b0   :  { %v3840_v27 = vmul.f32 %v3839_v24, %v3835_v45 }
0x32b2   :  { %v3845_v19 = vadd.f32 %v3844_v26, %v3840_v27  ;;  %v4136_v26 = vrot.slane %v6582_v28, %v6124_v9 }
0x32b4   :  { %5555 = vmatmul.mubr.msk.f32.vlgmr.msra.gmra.mxu0 %vm249_vm2, %v3845_v19 }
0x32b5   :  { %5576 = vmatprep.mubr.msk.f32.mxu0 %vm5949_vm0, %v5948_v1  ;;  %5569 = vmatpush3.msra.mxu0 %v4041_v47  ;;  %v4254_v47 = vld [vmem:[#allocation12 + $0x2d0] sm:$0xff] }
0x32b6   :  { %5570 = vmatprep.subr.mxu0 %v5948_v1 }
0x32b7   :  { %5571 = vmatpush3.msra.mxu0 %v4040_v57 }
0x32b8   :  { %5572 = vmatprep.subr.mxu0 %v5948_v1 }
0x32b9   :  { %5573 = vmatpush3.msra.mxu0 %v4039_v58 }
0x32ba   :  { %5574 = vmatprep.subr.mxu0 %v5948_v1 }
0x32bb   :  { %5575 = vmatpush3.msra.mxu0 %v4038_v59 }
0x32bc   :  { %5590 = vmatprep.subr.mxu0 %v5948_v1 }
0x3374   :  { %v3926_v30 = vpop.f32.mrf.mxu0 }
0x3375   :  { %v3927_v22 = vadd.f32 %v3926_v30, %v3856_v29  ;;  %v4141_v29 = vrot.slane %v6582_v28, %v6127_v10 }
0x3376   :  { %v5556_v31 = vpop.f32.mrf.mxu0 }
0x3377   :  { %v3930_v32 = vadd.f32 %v3927_v22, %v3845_v19  ;;  %v6623_v31 = vld [vmem:[#allocation15 + $0xb0] sm:$0xff] }
0x3378   :  { %v4249_v57 = vrot.slane %v6623_v31, %v6092_v36 }
0x3379   :  { %v3931_v33 = vsel %vm324_vm3, %v3930_v32, 0.0 }
0x337a   :  { %3932 = vadd.xlane.f32.xlu0 %v3931_v33 }
0x3403   :  { %v3933_v15 = vpop.xlane.xlu0 %3932 }
0x3404   :  { %v3934_v34 = vmul.f32 0.03125, %v3933_v15 }
0x3406   :  { %v3935_v37 = vsub.f32 %v3930_v32, %v3934_v34  ;;  %v4153_v32 = vrot.slane %v6623_v31, %v6075_v14 }
0x3408   :  { %v3936_v39 = vmul.f32 %v3935_v37, %v3935_v37 }
0x340a   :  { %v3937_v56 = vsel %vm324_vm3, %v3936_v39, 0.0 }
0x340b   :  { %3938 = vadd.xlane.f32.xlu1 %v3937_v56 }
0x3494   :  { %v3939_v20 = vpop.xlane.xlu1 %3938 }
0x3495   :  { %v3940_v38 = vmul.f32 0.03125, %v3939_v20  ;;  %v4253_v20 = vld [vmem:[#allocation12 + $0x2c8] sm:$0xff] }
0x3497   :  { %v3941_v48 = vadd.f32 1e-05, %v3940_v38  ;;  %v4252_v38 = vld [vmem:[#allocation12 + $0x2c0] sm:$0xff] }
0x3499   :  { %5716 = vrsqrt.f32 %v3941_v48  ;;  %v4338_v48 = vld [vmem:[#allocation13 + $0x2d8] sm:$0xff] }
0x34a6   :  { %v5717_v42 = vpop.eup %5716 }
0x34a7   :  { %v3943_v51 = vmul.f32 %v5717_v42, %v3935_v37 }
0x34a9   :  { %v3948_v54 = vmul.f32 %v3947_v49, %v3943_v51 }
0x34ab   :  { %v3953_v55 = vadd.f32 %v3952_v53, %v3948_v54  ;;  %v4244_v53 = vrot.slane %v6623_v31, %v6089_v35 }
0x34ad   :  { %5566 = vmatmul.mubr.msk.f32.vlgmr.msra.gmra.mxu1 %vm249_vm2, %v3953_v55 }
0x34ae   :  { %5587 = vmatprep.mubr.msk.f32.mxu1 %vm5949_vm0, %v5948_v1  ;;  %5580 = vmatpush3.msra.mxu1 %v4149_v18 }
0x34af   :  { %5581 = vmatprep.subr.mxu1 %v5948_v1 }
0x34b0   :  { %5582 = vmatpush3.msra.mxu1 %v4148_v13 }
0x34b1   :  { %5583 = vmatprep.subr.mxu1 %v5948_v1 }
0x34b2   :  { %5584 = vmatpush3.msra.mxu1 %v4147_v21 }
0x34b3   :  { %5585 = vmatprep.subr.mxu1 %v5948_v1 }
0x34b4   :  { %5586 = vmatpush3.msra.mxu1 %v4146_v50  ;;  %v4446_v50 = vld [vmem:[#allocation10 + $0x2f8] sm:$0xff] }
0x34b5   :  { %5601 = vmatprep.subr.mxu1 %v5948_v1 }
0x356d   :  { %v4032_v61 = vpop.f32.mrf.mxu1 }
0x356e   :  { %v4033_v4 = vadd.f32 %v4032_v61, %v3962_v60  ;;  %v4337_v60 = vld [vmem:[#allocation13 + $0x2d0] sm:$0xff]  ;;  %v4336_v61 = vld [vmem:[#allocation13 + $0x2c8] sm:$0xff] }
0x356f   :  { %v5567_v62 = vpop.f32.mrf.mxu1 }
0x3570   :  { %v4036_v63 = vmax.f32 %v4033_v4, 0.0  ;;  %v4335_v4 = vld [vmem:[#allocation13 + $0x2c0] sm:$0xff]  ;;  %v4259_v62 = vrot.slane %v6623_v31, %v6105_v46 }
0x3572   :  { %5577 = vmatmul.mubr.msk.f32.vlgmr.msra.gmra.mxu0 %vm249_vm2, %v4036_v63 }
0x3573   :  { %5598 = vmatprep.mubr.msk.f32.mxu0 %vm5949_vm0, %v5948_v1  ;;  %5591 = vmatpush3.msra.mxu0 %v4255_v23 }
0x3574   :  { %5592 = vmatprep.subr.mxu0 %v5948_v1 }
0x3575   :  { %5593 = vmatpush3.msra.mxu0 %v4254_v47 }
0x3576   :  { %5594 = vmatprep.subr.mxu0 %v5948_v1 }
0x3577   :  { %5595 = vmatpush3.msra.mxu0 %v4253_v20 }
0x3578   :  { %5596 = vmatprep.subr.mxu0 %v5948_v1 }
0x3579   :  { %5597 = vmatpush3.msra.mxu0 %v4252_v38  ;;  %v4552_v38 = vld [vmem:[#allocation12 + $0x2f8] sm:$0xff] }
0x357a   :  { %5612 = vmatprep.subr.mxu0 %v5948_v1 }
0x3632   :  { %v4115_v2 = vpop.f32.mrf.mxu0 }
0x3633   :  { %v4116_v3 = vadd.f32 %v4115_v2, %v4045_v0 }
0x3634   :  { %v5578_v5 = vpop.f32.mrf.mxu0 }
0x3635   :  { %v4119_v6 = vadd.f32 %v4116_v3, %v3953_v55  ;;  %v4342_v5 = vrot.slane %v6623_v31, %v6113_v52 }
0x3637   :  { %v4120_v7 = vsel %vm324_vm3, %v4119_v6, 0.0 }
0x3638   :  { %4121 = vadd.xlane.f32.xlu0 %v4120_v7 }
0x36c1   :  { %v4122_v8 = vpop.xlane.xlu0 %4121 }
0x36c2   :  { %v4123_v11 = vmul.f32 0.03125, %v4122_v8 }
0x36c4   :  { %v4124_v12 = vsub.f32 %v4119_v6, %v4123_v11 }
0x36c6   :  { %v4125_v16 = vmul.f32 %v4124_v12, %v4124_v12 }
0x36c8   :  { %v4126_v17 = vsel %vm324_vm3, %v4125_v16, 0.0 }
0x36c9   :  { %4127 = vadd.xlane.f32.xlu1 %v4126_v17 }
0x3752   :  { %v4128_v24 = vpop.xlane.xlu1 %4127 }
0x3753   :  { %v4129_v25 = vmul.f32 0.03125, %v4128_v24  ;;  %v4445_v24 = vld [vmem:[#allocation10 + $0x2f0] sm:$0xff] }
0x3755   :  { %v4130_v45 = vadd.f32 1e-05, %v4129_v25  ;;  %v4444_v25 = vld [vmem:[#allocation10 + $0x2e8] sm:$0xff] }
0x3757   :  { %5718 = vrsqrt.f32 %v4130_v45  ;;  %v4443_v45 = vld [vmem:[#allocation10 + $0x2e0] sm:$0xff] }
0x3764   :  { %v5719_v27 = vpop.eup %5718 }
0x3765   :  { %v4132_v19 = vmul.f32 %v5719_v27, %v4124_v12 }
0x3767   :  { %v4137_v30 = vmul.f32 %v4136_v26, %v4132_v19 }
0x3769   :  { %v4142_v22 = vadd.f32 %v4141_v29, %v4137_v30  ;;  %v4433_v29 = vrot.slane %v6623_v31, %v6124_v9 }
0x376b   :  { %5588 = vmatmul.mubr.msk.f32.vlgmr.msra.gmra.mxu1 %vm249_vm2, %v4142_v22 }
0x376c   :  { %5609 = vmatprep.mubr.msk.f32.mxu1 %vm5949_vm0, %v5948_v1  ;;  %5602 = vmatpush3.msra.mxu1 %v4338_v48  ;;  %v4551_v48 = vld [vmem:[#allocation12 + $0x2f0] sm:$0xff] }
0x376d   :  { %5603 = vmatprep.subr.mxu1 %v5948_v1 }
0x376e   :  { %5604 = vmatpush3.msra.mxu1 %v4337_v60 }
0x376f   :  { %5605 = vmatprep.subr.mxu1 %v5948_v1 }
0x3770   :  { %5606 = vmatpush3.msra.mxu1 %v4336_v61 }
0x3771   :  { %5607 = vmatprep.subr.mxu1 %v5948_v1 }
0x3772   :  { %5608 = vmatpush3.msra.mxu1 %v4335_v4  ;;  %v4634_v4 = vld [vmem:[#allocation13 + $0x2f0] sm:$0xff] }
0x3773   :  { %5623 = vmatprep.subr.mxu1 %v5948_v1 }
0x382b   :  { %v4223_v33 = vpop.f32.mrf.mxu1 }
0x382c   :  { %v4224_v15 = vadd.f32 %v4223_v33, %v4153_v32  ;;  %v4438_v32 = vrot.slane %v6623_v31, %v6127_v10 }
0x382d   :  { %v5589_v34 = vpop.f32.mrf.mxu1 }
0x382e   :  { %v4227_v37 = vadd.f32 %v4224_v15, %v4142_v22  ;;  %v6664_v34 = vld [vmem:[#allocation15 + $0xb8] sm:$0xff] }
0x3830   :  { %v4228_v39 = vsel %vm324_vm3, %v4227_v37, 0.0 }
0x3831   :  { %4229 = vadd.xlane.f32.xlu0 %v4228_v39 }
0x38ba   :  { %v4230_v28 = vpop.xlane.xlu0 %4229 }
0x38bb   :  { %v4231_v56 = vmul.f32 0.03125, %v4230_v28 }
0x38bd   :  { %v4232_v41 = vsub.f32 %v4227_v37, %v4231_v56  ;;  %v4450_v37 = vrot.slane %v6664_v34, %v6075_v14  ;;  %v4550_v14 = vld [vmem:[#allocation12 + $0x2e8] sm:$0xff] }
0x38bf   :  { %v4233_v43 = vmul.f32 %v4232_v41, %v4232_v41 }
0x38c1   :  { %v4234_v44 = vsel %vm324_vm3, %v4233_v43, 0.0 }
0x38c2   :  { %4235 = vadd.xlane.f32.xlu1 %v4234_v44 }
0x394b   :  { %v4236_v49 = vpop.xlane.xlu1 %4235 }
0x394c   :  { %v4237_v42 = vmul.f32 0.03125, %v4236_v49  ;;  %v4549_v49 = vld [vmem:[#allocation12 + $0x2e0] sm:$0xff] }
0x394e   :  { %v4238_v51 = vadd.f32 1e-05, %v4237_v42  ;;  %v4635_v42 = vld [vmem:[#allocation13 + $0x2f8] sm:$0xff] }
0x3950   :  { %5720 = vrsqrt.f32 %v4238_v51 }
0x395d   :  { %v5721_v54 = vpop.eup %5720 }
0x395e   :  { %v4240_v55 = vmul.f32 %v5721_v54, %v4232_v41 }
0x3960   :  { %v4245_v58 = vmul.f32 %v4244_v53, %v4240_v55  ;;  %v4541_v55 = vrot.slane %v6664_v34, %v6089_v35  ;;  %v4632_v35 = vld [vmem:[#allocation13 + $0x2e0] sm:$0xff] }
0x3962   :  { %v4250_v59 = vadd.f32 %v4249_v57, %v4245_v58 }
0x3964   :  { %5599 = vmatmul.mubr.msk.f32.vlgmr.msra.gmra.mxu0 %vm249_vm2, %v4250_v59 }
0x3965   :  { %5620 = vmatprep.mubr.msk.f32.mxu0 %vm5949_vm0, %v5948_v1  ;;  %5613 = vmatpush3.msra.mxu0 %v4446_v50  ;;  %v4741_v50 = vld [vmem:[#allocation16 + $0x50] sm:$0xff] }
0x3966   :  { %5614 = vmatprep.subr.mxu0 %v5948_v1 }
0x3967   :  { %5615 = vmatpush3.msra.mxu0 %v4445_v24  ;;  %v4739_v24 = vld [vmem:[#allocation16 + $0x40] sm:$0xff] }
0x3968   :  { %5616 = vmatprep.subr.mxu0 %v5948_v1 }
0x3969   :  { %5617 = vmatpush3.msra.mxu0 %v4444_v25 }
0x396a   :  { %5618 = vmatprep.subr.mxu0 %v5948_v1 }
0x396b   :  { %5619 = vmatpush3.msra.mxu0 %v4443_v45 }
0x396c   :  { %5634 = vmatprep.subr.mxu0 %v5948_v1 }
0x3a24   :  { %v4329_v63 = vpop.f32.mrf.mxu0 }
0x3a25   :  { %v4330_v0 = vadd.f32 %v4329_v63, %v4259_v62  ;;  %v4633_v62 = vld [vmem:[#allocation13 + $0x2e8] sm:$0xff] }
0x3a26   :  { %v5600_v2 = vpop.f32.mrf.mxu0 }
0x3a27   :  { %v4333_v3 = vmax.f32 %v4330_v0, 0.0 }
0x3a29   :  { %5610 = vmatmul.mubr.msk.f32.vlgmr.msra.gmra.mxu1 %vm249_vm2, %v4333_v3 }
0x3a2a   :  { %5631 = vmatprep.mubr.msk.f32.mxu1 %vm5949_vm0, %v5948_v1  ;;  %5624 = vmatpush3.msra.mxu1 %v4552_v38 }
0x3a2b   :  { %5625 = vmatprep.subr.mxu1 %v5948_v1 }
0x3a2c   :  { %5626 = vmatpush3.msra.mxu1 %v4551_v48 }
0x3a2d   :  { %5627 = vmatprep.subr.mxu1 %v5948_v1 }
0x3a2e   :  { %5628 = vmatpush3.msra.mxu1 %v4550_v14 }
0x3a2f   :  { %5629 = vmatprep.subr.mxu1 %v5948_v1 }
0x3a30   :  { %5630 = vmatpush3.msra.mxu1 %v4549_v49 }
0x3a31   :  { %5645 = vmatprep.subr.mxu1 %v5948_v1 }
0x3ae9   :  { %v4412_v6 = vpop.f32.mrf.mxu1 }
0x3aea   :  { %v4413_v7 = vadd.f32 %v4412_v6, %v4342_v5  ;;  %v4639_v5 = vrot.slane %v6664_v34, %v6113_v52  ;;  %v4740_v52 = vld [vmem:[#allocation16 + $0x48] sm:$0xff] }
0x3aeb   :  { %v5611_v8 = vpop.f32.mrf.mxu1 }
0x3aec   :  { %v4416_v11 = vadd.f32 %v4413_v7, %v4250_v59  ;;  %v4546_v59 = vrot.slane %v6664_v34, %v6092_v36  ;;  %v4556_v36 = vrot.slane %v6664_v34, %v6105_v46 }
0x3aee   :  { %v4417_v12 = vsel %vm324_vm3, %v4416_v11, 0.0 }
0x3aef   :  { %4418 = vadd.xlane.f32.xlu0 %v4417_v12 }
0x3b78   :  { %v4419_v16 = vpop.xlane.xlu0 %4418 }
0x3b79   :  { %v4420_v17 = vmul.f32 0.03125, %v4419_v16 }
0x3b7b   :  { %v4421_v18 = vsub.f32 %v4416_v11, %v4420_v17 }
0x3b7d   :  { %v4422_v13 = vmul.f32 %v4421_v18, %v4421_v18 }
0x3b7f   :  { %v4423_v21 = vsel %vm324_vm3, %v4422_v13, 0.0 }
0x3b80   :  { %4424 = vadd.xlane.f32.xlu1 %v4423_v21  ;;  %v4742_v21 = vld [vmem:[#allocation16 + $0x58] sm:$0xff] }
0x3c09   :  { %v4425_v26 = vpop.xlane.xlu1 %4424 }
0x3c0a   :  { %v4426_v27 = vmul.f32 0.03125, %v4425_v26 }
0x3c0c   :  { %v4427_v19 = vadd.f32 1e-05, %v4426_v27  ;;  %v4730_v27 = vrot.slane %v6664_v34, %v6124_v9 }
0x3c0e   :  { %5722 = vrsqrt.f32 %v4427_v19 }
0x3c1b   :  { %v5723_v30 = vpop.eup %5722 }
0x3c1c   :  { %v4429_v22 = vmul.f32 %v5723_v30, %v4421_v18  ;;  %v4735_v30 = vrot.slane %v6664_v34, %v6127_v10 }
0x3c1e   :  { %v4434_v33 = vmul.f32 %v4433_v29, %v4429_v22 }
0x3c20   :  { %v4439_v15 = vadd.f32 %v4438_v32, %v4434_v33 }
0x3c22   :  { %5621 = vmatmul.mubr.msk.f32.vlgmr.msra.gmra.mxu0 %vm249_vm2, %v4439_v15 }
0x3c23   :  { %5642 = vmatprep.mubr.msk.f32.mxu0 %vm5949_vm0, %v5948_v1  ;;  %5635 = vmatpush3.msra.mxu0 %v4635_v42 }
0x3c24   :  { %5636 = vmatprep.subr.mxu0 %v5948_v1 }
0x3c25   :  { %5637 = vmatpush3.msra.mxu0 %v4634_v4 }
0x3c26   :  { %5638 = vmatprep.subr.mxu0 %v5948_v1 }
0x3c27   :  { %5639 = vmatpush3.msra.mxu0 %v4633_v62 }
0x3c28   :  { %5640 = vmatprep.subr.mxu0 %v5948_v1 }
0x3c29   :  { %5641 = vmatpush3.msra.mxu0 %v4632_v35 }
0x3ce2   :  { %v4520_v39 = vpop.f32.mrf.mxu0 }
0x3ce3   :  { %v4521_v28 = vadd.f32 %v4520_v39, %v4450_v37 }
0x3ce4   :  { %v5622_v56 = vpop.f32.mrf.mxu0 }
0x3ce5   :  { %v4524_v41 = vadd.f32 %v4521_v28, %v4439_v15  ;;  %v4824_v15 = vstv %s4902_s6 }
0x3ce7   :  { %v4525_v43 = vsel %vm324_vm3, %v4524_v41, 0.0 }
0x3ce8   :  { %4526 = vadd.xlane.f32.xlu0 %v4525_v43 }
0x3d71   :  { %v4527_v31 = vpop.xlane.xlu0 %4526 }
0x3d72   :  { %v4528_v44 = vmul.f32 0.03125, %v4527_v31 }
0x3d74   :  { %v4529_v23 = vsub.f32 %v4524_v41, %v4528_v44 }
0x3d76   :  { %v4530_v47 = vmul.f32 %v4529_v23, %v4529_v23 }
0x3d78   :  { %v4531_v20 = vsel %vm324_vm3, %v4530_v47, 0.0 }
0x3d79   :  { %4532 = vadd.xlane.f32.xlu1 %v4531_v20 }
0x3e02   :  { %v4533_v51 = vpop.xlane.xlu1 %4532 }
0x3e03   :  { %v4534_v53 = vmul.f32 0.03125, %v4533_v51 }
0x3e05   :  { %v4535_v54 = vadd.f32 1e-05, %v4534_v53 }
0x3e07   :  { %5724 = vrsqrt.f32 %v4535_v54 }
0x3e14   :  { %v5725_v57 = vpop.eup %5724 }
0x3e15   :  { %v4537_v58 = vmul.f32 %v5725_v57, %v4529_v23 }
0x3e17   :  { %v4542_v60 = vmul.f32 %v4541_v55, %v4537_v58 }
0x3e19   :  { %v4547_v61 = vadd.f32 %v4546_v59, %v4542_v60 }
0x3e1b   :  { %5632 = vmatmul.mubr.msk.f32.vlgmr.msra.gmra.mxu1 %vm249_vm2, %v4547_v61 }
0x3e1c   :  { %5653 = vmatprep.mubr.msk.f32.mxu1 %vm5949_vm0, %v5948_v1  ;;  %5646 = vmatpush3.msra.mxu1 %v4742_v21 }
0x3e1d   :  { %5647 = vmatprep.subr.mxu1 %v5948_v1 }
0x3e1e   :  { %5648 = vmatpush3.msra.mxu1 %v4741_v50 }
0x3e1f   :  { %5649 = vmatprep.subr.mxu1 %v5948_v1 }
0x3e20   :  { %5650 = vmatpush3.msra.mxu1 %v4740_v52 }
0x3e21   :  { %5651 = vmatprep.subr.mxu1 %v5948_v1  ;;  %v4904_v1 = vld [vmem:[%s6715_s9 + $0x2] ss:$0 sm:$0xff] }
0x3e22   :  { %5652 = vmatpush3.msra.mxu1 %v4739_v24 }
0x3edb   :  { %v4626_v63 = vpop.f32.mrf.mxu1 }
0x3edc   :  { %v4627_v0 = vadd.f32 %v4626_v63, %v4556_v36 }
0x3edd   :  { %v5633_v2 = vpop.f32.mrf.mxu1 }
0x3ede   :  { %v4630_v3 = vmax.f32 %v4627_v0, 0.0 }
0x3ee0   :  { %5643 = vmatmul.mubr.msk.f32.vlgmr.msra.gmra.mxu0 %vm249_vm2, %v4630_v3 }
0x3fa0   :  { %v4709_v6 = vpop.f32.mrf.mxu0 }
0x3fa1   :  { %v4710_v7 = vadd.f32 %v4709_v6, %v4639_v5 }
0x3fa2   :  { %v5644_v8 = vpop.f32.mrf.mxu0 }
0x3fa3   :  { %v4713_v11 = vadd.f32 %v4710_v7, %v4547_v61 }
0x3fa5   :  { %v4714_v12 = vsel %vm324_vm3, %v4713_v11, 0.0 }
0x3fa6   :  { %4715 = vadd.xlane.f32.xlu0 %v4714_v12 }
0x402f   :  { %v4716_v16 = vpop.xlane.xlu0 %4715 }
0x4030   :  { %v4717_v17 = vmul.f32 0.03125, %v4716_v16 }
0x4032   :  { %v4718_v18 = vsub.f32 %v4713_v11, %v4717_v17 }
0x4034   :  { %v4719_v46 = vmul.f32 %v4718_v18, %v4718_v18 }
0x4036   :  { %v4720_v13 = vsel %vm324_vm3, %v4719_v46, 0.0 }
0x4037   :  { %4721 = vadd.xlane.f32.xlu1 %v4720_v13 }
0x40c0   :  { %v4722_v25 = vpop.xlane.xlu1 %4721 }
0x40c1   :  { %v4723_v45 = vmul.f32 0.03125, %v4722_v25 }
0x40c3   :  { %v4724_v26 = vadd.f32 1e-05, %v4723_v45 }
0x40c5   :  { %5726 = vrsqrt.f32 %v4724_v26 }
0x40d2   :  { %v5727_v19 = vpop.eup %5726 }
0x40d3   :  { %v4726_v29 = vmul.f32 %v5727_v19, %v4718_v18 }
0x40d5   :  { %v4731_v22 = vmul.f32 %v4730_v27, %v4726_v29 }
0x40d7   :  { %v4736_v32 = vadd.f32 %v4735_v30, %v4731_v22 }
0x40d9   :  { %5654 = vmatmul.mubr.msk.f32.vlgmr.msra.gmra.mxu1 %vm249_vm2, %v4736_v32 }
0x4199   :  { %v4820_v33 = vpop.f32.mrf.mxu1 }
0x419a   :  { %v4821_v37 = vadd.f32 %v4904_v1, %v4820_v33 }
0x419b   :  { %v5655_v39 = vpop.f32.mrf.mxu1 }
0x419c   :  { %v4825_v9 = vmul.f32 %v4824_v15, %v4821_v37 }
0x419e   :  { %v4826_v28 = vadd.f32 %v4825_v9, %v6390_v40 }
0x41a0   :  { %4827 = vst [vmem:[#allocation18] sm:$0x3] %v4826_v28 }
0x41a1   :  { %5912 = shalt.err (!%p5909_p7)
}
0x41a2   :  { %4837 = dma.vmem_to_hbm [thread:$0]  %s4835_s22, 32, %s6716_s10, [#allocation4]  }
0x41a3   :  { %5933 = dma.done.wait [#allocation4], 32  }
0x41a4   :  { %5934 = vsyncadd [#allocation4], 4294967264 }
0x41a5   :  { %4841 = vsyncpa [#allocation3], 1 }
0x41a6   :  { %4842 = vsyncpa [#allocation8], 1 }
0x41a7   :  { %4843 = vsyncpa [#allocation11], 1 }
0x41a8   :  { %4844 = vsyncpa [#allocation14], 1 }
0x41a9   :  { %4845 = vsyncpa [#allocation17], 1 }
0x41aa   :  { %4846 = vsyncpa [#allocation4], 1 }
0x41ab   :  { %4847 = vsyncpa [#allocation5], 1 }

</bundles_post_ra>
